<compile_context>
chip_gen: v6e
topology: v6e:2x2x1
jax: 0.10.0
libtpu: 0.0.40
codegen_flags: <defaults>
</compile_context>

<pallas_src>
import functools
import math

import numpy as np
import jax
import jax.numpy as jnp
from jax.experimental import pallas as pl
from jax.experimental.pallas import tpu as pltpu


# ----------------------------- in-kernel helpers -----------------------------

def _mm(a, b):
    return jnp.dot(a, b, preferred_element_type=jnp.float32)


def _layernorm(x, g, b, eps):
    # one-pass variance: E[x^2] - mean^2
    m = jnp.mean(x, axis=-1, keepdims=True)
    var = jnp.mean(x * x, axis=-1, keepdims=True) - m * m
    return (x - m) * jax.lax.rsqrt(var + eps) * g + b


def _softmax_rows(s):
    s = s - jnp.max(s, axis=-1, keepdims=True)
    p = jnp.exp(s)
    return p * pl.reciprocal(jnp.sum(p, axis=-1, keepdims=True), approx=True)


def _mha(q, k, v, wo, bo, nhead, mask=None):
    # q: (Sq, D), k/v: (Sk, D), wo: (D, D), bo: (1, D).
    # Per-head score/softmax/context (heads are tiny & static -> unrolled),
    # then contexts are concatenated along lanes and ONE out-projection matmul
    # (K = D) is issued instead of nhead accumulating K=Dh matmuls.
    Sq, D = q.shape
    Dh = D // nhead
    scale = 1.0 / math.sqrt(Dh)
    ctxs = []
    for h in range(nhead):
        sl = slice(h * Dh, (h + 1) * Dh)
        s = jax.lax.dot_general(q[:, sl], k[:, sl],
                                (((1,), (1,)), ((), ())),
                                preferred_element_type=jnp.float32) * scale
        if mask is not None:
            s = s + mask
        ctxs.append(_mm(_softmax_rows(s), v[:, sl]))          # (Sq, Dh)
    ctx = jnp.concatenate(ctxs, axis=-1)                       # (Sq, D)
    return _mm(ctx, wo) + bo


# ----------------------------- fused whole-model kernel -----------------------------

def _fused_forward_kernel(
        src_ref, tgt_ref,
        inw_ref, inb_ref, pes_ref, pet_ref, interp_ref, mask_ref,
        e_wqkv, e_bqkv, e_wo, e_bo, e_w1, e_b1, e_w2, e_b2, e_ln,
        d_wqkv, d_bqkv, d_wo1, d_bo1, d_wq, d_bq, d_wkv, d_bkv,
        d_wo2, d_bo2, d_w1, d_b1, d_w2, d_b2, d_ln,
        ow_ref, ob_ref, c1w_ref, c1b_ref, c2w_ref, c2b_ref,
        o_ref, *, nhead, num_layers, eps):
    inw = inw_ref[...]
    inb = inb_ref[...]

    # ---- embedding: input_projection + PE; linear interpolation of src to tgt_len ----
    src_e = _mm(src_ref[0], inw) + inb + pes_ref[...]          # (S_src, D)
    mem = _mm(interp_ref[...], src_e)                          # (S_tgt, D)
    x = _mm(tgt_ref[0], inw) + inb + pet_ref[...]              # (S_tgt, D)

    D = mem.shape[-1]

    # ---- encoder stack (post-norm, relu FFN) -- static unrolled layer loop ----
    for l in range(num_layers):
        ln = e_ln[l]                                           # (4, D)
        qkv = _mm(mem, e_wqkv[l]) + e_bqkv[l]                  # fused QKV
        a = _mha(qkv[:, :D], qkv[:, D:2 * D], qkv[:, 2 * D:],
                 e_wo[l], e_bo[l], nhead)
        mem = _layernorm(mem + a, ln[0:1], ln[1:2], eps)
        h = jnp.maximum(_mm(mem, e_w1[l]) + e_b1[l], 0.0)
        h = _mm(h, e_w2[l]) + e_b2[l]
        mem = _layernorm(mem + h, ln[2:3], ln[3:4], eps)

    # ---- decoder stack: masked self-attn + cross-attn + FFN, 3 LayerNorms ----
    mask = mask_ref[...]
    for l in range(num_layers):
        ln = d_ln[l]                                           # (6, D)
        qkv = _mm(x, d_wqkv[l]) + d_bqkv[l]
        a = _mha(qkv[:, :D], qkv[:, D:2 * D], qkv[:, 2 * D:],
                 d_wo1[l], d_bo1[l], nhead, mask=mask)
        x = _layernorm(x + a, ln[0:1], ln[1:2], eps)
        q = _mm(x, d_wq[l]) + d_bq[l]
        kv = _mm(mem, d_wkv[l]) + d_bkv[l]                     # fused KV
        a = _mha(q, kv[:, :D], kv[:, D:], d_wo2[l], d_bo2[l], nhead)
        x = _layernorm(x + a, ln[2:3], ln[3:4], eps)
        h = jnp.maximum(_mm(x, d_w1[l]) + d_b1[l], 0.0)
        h = _mm(h, d_w2[l]) + d_b2[l]
        x = _layernorm(x + h, ln[4:5], ln[5:6], eps)

    # ---- tail: output_projection + Conv1d(3,pad=1) + ReLU + Conv1d(3,pad=1) ----
    y = _mm(x, ow_ref[...]) + ob_ref[...]                      # (S_tgt, C)
    S, C = y.shape
    row = jax.lax.broadcasted_iota(jnp.int32, (S, C), 0)
    first_row = row == 0
    last_row = row == S - 1

    def conv3(inp, w_ref, bias):
        # w_ref: (3, Cin, Cout) with w_ref[k][ci, co] == torch_weight[co, ci, k]
        prev = jnp.where(first_row, 0.0, pltpu.roll(inp, shift=1, axis=0))      # inp[t-1]
        nxt = jnp.where(last_row, 0.0, pltpu.roll(inp, shift=S - 1, axis=0))    # inp[t+1]
        return _mm(prev, w_ref[0]) + _mm(inp, w_ref[1]) + _mm(nxt, w_ref[2]) + bias

    h = jnp.maximum(conv3(y, c1w_ref, c1b_ref[...]), 0.0)
    o_ref[0] = conv3(h, c2w_ref, c2b_ref[...]).astype(o_ref.dtype)


# ----------------------------- pallas_call wrapper -----------------------------

def _full(a):
    shp = tuple(a.shape)
    return pl.BlockSpec(shp, lambda b, _n=len(shp): (0,) * _n)


def _batched(a):
    shp = tuple(a.shape)
    return pl.BlockSpec((1,) + shp[1:], lambda b, _n=len(shp): (b,) + (0,) * (_n - 1))


_PARALLEL = pltpu.CompilerParams(dimension_semantics=("parallel",))


def transformer_generator_forward(params, src, tgt, *, nhead, eps=1e-5):
    # src: (B, input_dim, S_src), tgt: (B, input_dim, S_tgt)   [PyTorch NCL]
    B, C, S_src = src.shape
    S_tgt = tgt.shape[2]

    # NCL -> NLC only at the model boundary (tiny; fused by XLA with input prep).
    src_t = jnp.transpose(src, (0, 2, 1))
    tgt_t = jnp.transpose(tgt, (0, 2, 1))

    pe_src = params["pe"][:S_src]
    pe_tgt = params["pe"][:S_tgt]
    interp = make_interp_matrix(S_src, S_tgt)                  # trace-time constant
    mask = make_causal_mask(S_tgt)                             # trace-time constant

    enc, dec = params["enc"], params["dec"]
    num_layers = int(enc["wqkv"].shape[0])
    C_out = params["out_proj_w"].shape[1]

    inputs = [
        src_t, tgt_t,
        params["in_proj_w"], params["in_proj_b"], pe_src, pe_tgt, interp, mask,
        enc["wqkv"], enc["bqkv"], enc["wo"], enc["bo"],
        enc["w1"], enc["b1"], enc["w2"], enc["b2"], enc["ln"],
        dec["wqkv"], dec["bqkv"], dec["wo1"], dec["bo1"],
        dec["wq"], dec["bq"], dec["wkv"], dec["bkv"],
        dec["wo2"], dec["bo2"], dec["w1"], dec["b1"], dec["w2"], dec["b2"], dec["ln"],
        params["out_proj_w"], params["out_proj_b"],
        params["conv1_wt"], params["conv1_b"], params["conv2_wt"], params["conv2_b"],
    ]
    in_specs = [_batched(src_t), _batched(tgt_t)] + [_full(a) for a in inputs[2:]]

    out = pl.pallas_call(
        functools.partial(_fused_forward_kernel, nhead=nhead,
                          num_layers=num_layers, eps=eps),
        out_shape=jax.ShapeDtypeStruct((B, S_tgt, C_out), jnp.float32),
        grid=(B,),
        in_specs=in_specs,
        out_specs=pl.BlockSpec((1, S_tgt, C_out), lambda b: (b, 0, 0)),
        compiler_params=_PARALLEL,
    )(*inputs)

    # single layout change at the model boundary: (B, S, C) -> (B, C, S)
    return jnp.transpose(out, (0, 2, 1))


# ----------------------------- trace-time constants -----------------------------

def make_pe(max_len, d_model):
    position = np.arange(max_len, dtype=np.float32)[:, None]
    div_term = np.exp(np.arange(0, d_model, 2, dtype=np.float32)
                      * (-math.log(10000.0) / d_model))
    pe = np.zeros((max_len, d_model), np.float32)
    pe[:, 0::2] = np.sin(position * div_term)
    pe[:, 1::2] = np.cos(position * div_term)
    return jnp.asarray(pe)


def make_interp_matrix(in_len, out_len):
    # F.interpolate(mode='linear', align_corners=False) as a constant (out,in) matrix.
    m = np.zeros((out_len, in_len), np.float32)
    scale = in_len / out_len
    for t in range(out_len):
        coord = min(max((t + 0.5) * scale - 0.5, 0.0), in_len - 1)
        i0 = int(math.floor(coord))
        i1 = min(i0 + 1, in_len - 1)
        w1 = coord - i0
        m[t, i0] += 1.0 - w1
        m[t, i1] += w1
    return jnp.asarray(m)


def make_causal_mask(n):
    # nn.Transformer.generate_square_subsequent_mask (additive, -inf above diag)
    return jnp.asarray(np.triu(np.full((n, n), -1e30, np.float32), k=1))


# ----------------------------- parameter init -----------------------------

def init_params(key, input_dim, d_model, nhead, num_layers, dim_ff, max_len=64):
    keys = iter(jax.random.split(key, 64))
    L = num_layers

    def nrm(shape, scale=0.02):
        return (scale * jax.random.normal(next(keys), shape)).astype(jnp.float32)

    def ln_pack(n_norms):                                      # rows: [g1,b1,g2,b2,...]
        rows = []
        for _ in range(n_norms):
            rows.append(jnp.ones((d_model,), jnp.float32))
            rows.append(jnp.zeros((d_model,), jnp.float32))
        return jnp.tile(jnp.stack(rows)[None], (L, 1, 1))      # (L, 2*n_norms, D)

    enc = dict(
        wqkv=nrm((L, d_model, 3 * d_model)), bqkv=nrm((L, 1, 3 * d_model)),
        wo=nrm((L, d_model, d_model)), bo=nrm((L, 1, d_model)),
        w1=nrm((L, d_model, dim_ff)), b1=nrm((L, 1, dim_ff)),
        w2=nrm((L, dim_ff, d_model)), b2=nrm((L, 1, d_model)),
        ln=ln_pack(2),
    )
    dec = dict(
        wqkv=nrm((L, d_model, 3 * d_model)), bqkv=nrm((L, 1, 3 * d_model)),
        wo1=nrm((L, d_model, d_model)), bo1=nrm((L, 1, d_model)),
        wq=nrm((L, d_model, d_model)), bq=nrm((L, 1, d_model)),
        wkv=nrm((L, d_model, 2 * d_model)), bkv=nrm((L, 1, 2 * d_model)),
        wo2=nrm((L, d_model, d_model)), bo2=nrm((L, 1, d_model)),
        w1=nrm((L, d_model, dim_ff)), b1=nrm((L, 1, dim_ff)),
        w2=nrm((L, dim_ff, d_model)), b2=nrm((L, 1, d_model)),
        ln=ln_pack(3),
    )

    def conv_taps(w):   # PyTorch Conv1d weight (Cout, Cin, K) -> (K, Cin, Cout)
        return jnp.transpose(w, (2, 1, 0))

    return dict(
        in_proj_w=nrm((input_dim, d_model)), in_proj_b=nrm((1, d_model)),
        out_proj_w=nrm((d_model, input_dim)), out_proj_b=nrm((1, input_dim)),
        conv1_wt=conv_taps(nrm((input_dim, input_dim, 3))), conv1_b=nrm((1, input_dim)),
        conv2_wt=conv_taps(nrm((input_dim, input_dim, 3))), conv2_b=nrm((1, input_dim)),
        pe=make_pe(max_len, d_model),
        enc=enc, dec=dec,
    )


# ----------------------------- main -----------------------------

if __name__ == "__main__":
    # small config consistent with the module's forward
    input_dim, d_model, nhead, num_layers, dim_ff = 16, 32, 4, 2, 64
    B, S_src, S_tgt = 2, 12, 8

    root = jax.random.PRNGKey(0)
    k_p, k_src, k_tgt = jax.random.split(root, 3)
    params = init_params(k_p, input_dim, d_model, nhead, num_layers, dim_ff)

    # PyTorch-style NCL inputs: (B, input_dim, L)
    src = jax.random.normal(k_src, (B, input_dim, S_src), dtype=jnp.float32)
    tgt = jax.random.normal(k_tgt, (B, input_dim, S_tgt), dtype=jnp.float32)

    fwd = jax.jit(functools.partial(transformer_generator_forward, nhead=nhead))
    out = jax.block_until_ready(fwd(params, src, tgt))

    assert out.shape == (B, input_dim, S_tgt), out.shape
    assert bool(jnp.all(jnp.isfinite(out)))
    print("KERNEL_OK")
</pallas_src>

<mosaic_0001>
module attributes {stable_mosaic.version = 11 : i64} {
  func.func @_fused_forward_kernel(%arg0: i32, %arg1: memref<1x12x16xf32, #tpu.memory_space<vmem>>, %arg2: memref<1x8x16xf32, #tpu.memory_space<vmem>>, %arg3: memref<16x32xf32, #tpu.memory_space<vmem>>, %arg4: memref<1x32xf32, #tpu.memory_space<vmem>>, %arg5: memref<12x32xf32, #tpu.memory_space<vmem>>, %arg6: memref<8x32xf32, #tpu.memory_space<vmem>>, %arg7: memref<8x12xf32, #tpu.memory_space<vmem>>, %arg8: memref<8x8xf32, #tpu.memory_space<vmem>>, %arg9: memref<2x32x96xf32, #tpu.memory_space<vmem>>, %arg10: memref<2x1x96xf32, #tpu.memory_space<vmem>>, %arg11: memref<2x32x32xf32, #tpu.memory_space<vmem>>, %arg12: memref<2x1x32xf32, #tpu.memory_space<vmem>>, %arg13: memref<2x32x64xf32, #tpu.memory_space<vmem>>, %arg14: memref<2x1x64xf32, #tpu.memory_space<vmem>>, %arg15: memref<2x64x32xf32, #tpu.memory_space<vmem>>, %arg16: memref<2x1x32xf32, #tpu.memory_space<vmem>>, %arg17: memref<2x4x32xf32, #tpu.memory_space<vmem>>, %arg18: memref<2x32x96xf32, #tpu.memory_space<vmem>>, %arg19: memref<2x1x96xf32, #tpu.memory_space<vmem>>, %arg20: memref<2x32x32xf32, #tpu.memory_space<vmem>>, %arg21: memref<2x1x32xf32, #tpu.memory_space<vmem>>, %arg22: memref<2x32x32xf32, #tpu.memory_space<vmem>>, %arg23: memref<2x1x32xf32, #tpu.memory_space<vmem>>, %arg24: memref<2x32x64xf32, #tpu.memory_space<vmem>>, %arg25: memref<2x1x64xf32, #tpu.memory_space<vmem>>, %arg26: memref<2x32x32xf32, #tpu.memory_space<vmem>>, %arg27: memref<2x1x32xf32, #tpu.memory_space<vmem>>, %arg28: memref<2x32x64xf32, #tpu.memory_space<vmem>>, %arg29: memref<2x1x64xf32, #tpu.memory_space<vmem>>, %arg30: memref<2x64x32xf32, #tpu.memory_space<vmem>>, %arg31: memref<2x1x32xf32, #tpu.memory_space<vmem>>, %arg32: memref<2x6x32xf32, #tpu.memory_space<vmem>>, %arg33: memref<32x16xf32, #tpu.memory_space<vmem>>, %arg34: memref<1x16xf32, #tpu.memory_space<vmem>>, %arg35: memref<3x16x16xf32, #tpu.memory_space<vmem>>, %arg36: memref<1x16xf32, #tpu.memory_space<vmem>>, %arg37: memref<3x16x16xf32, #tpu.memory_space<vmem>>, %arg38: memref<1x16xf32, #tpu.memory_space<vmem>>, %arg39: memref<1x8x16xf32, #tpu.memory_space<vmem>>) attributes {dimension_semantics = [#tpu.dimension_semantics<parallel>], iteration_bounds = array<i64: 2>, scalar_prefetch = 0 : i64, scratch_operands = 0 : i64, tpu.core_type = #tpu.core_type<tc>, window_params = [{transform_indices = @transform_0, window_bounds = array<i64: 1, 12, 16>}, {transform_indices = @transform_1, window_bounds = array<i64: 1, 8, 16>}, {pipeline_mode = #tpu.pipeline_mode<synchronous>, transform_indices = @transform_2, window_bounds = array<i64: 16, 32>}, {pipeline_mode = #tpu.pipeline_mode<synchronous>, transform_indices = @transform_3, window_bounds = array<i64: 1, 32>}, {pipeline_mode = #tpu.pipeline_mode<synchronous>, transform_indices = @transform_4, window_bounds = array<i64: 12, 32>}, {pipeline_mode = #tpu.pipeline_mode<synchronous>, transform_indices = @transform_5, window_bounds = array<i64: 8, 32>}, {pipeline_mode = #tpu.pipeline_mode<synchronous>, transform_indices = @transform_6, window_bounds = array<i64: 8, 12>}, {pipeline_mode = #tpu.pipeline_mode<synchronous>, transform_indices = @transform_7, window_bounds = array<i64: 8, 8>}, {pipeline_mode = #tpu.pipeline_mode<synchronous>, transform_indices = @transform_8, window_bounds = array<i64: 2, 32, 96>}, {pipeline_mode = #tpu.pipeline_mode<synchronous>, transform_indices = @transform_9, window_bounds = array<i64: 2, 1, 96>}, {pipeline_mode = #tpu.pipeline_mode<synchronous>, transform_indices = @transform_10, window_bounds = array<i64: 2, 32, 32>}, {pipeline_mode = #tpu.pipeline_mode<synchronous>, transform_indices = @transform_11, window_bounds = array<i64: 2, 1, 32>}, {pipeline_mode = #tpu.pipeline_mode<synchronous>, transform_indices = @transform_12, window_bounds = array<i64: 2, 32, 64>}, {pipeline_mode = #tpu.pipeline_mode<synchronous>, transform_indices = @transform_13, window_bounds = array<i64: 2, 1, 64>}, {pipeline_mode = #tpu.pipeline_mode<synchronous>, transform_indices = @transform_14, window_bounds = array<i64: 2, 64, 32>}, {pipeline_mode = #tpu.pipeline_mode<synchronous>, transform_indices = @transform_15, window_bounds = array<i64: 2, 1, 32>}, {pipeline_mode = #tpu.pipeline_mode<synchronous>, transform_indices = @transform_16, window_bounds = array<i64: 2, 4, 32>}, {pipeline_mode = #tpu.pipeline_mode<synchronous>, transform_indices = @transform_17, window_bounds = array<i64: 2, 32, 96>}, {pipeline_mode = #tpu.pipeline_mode<synchronous>, transform_indices = @transform_18, window_bounds = array<i64: 2, 1, 96>}, {pipeline_mode = #tpu.pipeline_mode<synchronous>, transform_indices = @transform_19, window_bounds = array<i64: 2, 32, 32>}, {pipeline_mode = #tpu.pipeline_mode<synchronous>, transform_indices = @transform_20, window_bounds = array<i64: 2, 1, 32>}, {pipeline_mode = #tpu.pipeline_mode<synchronous>, transform_indices = @transform_21, window_bounds = array<i64: 2, 32, 32>}, {pipeline_mode = #tpu.pipeline_mode<synchronous>, transform_indices = @transform_22, window_bounds = array<i64: 2, 1, 32>}, {pipeline_mode = #tpu.pipeline_mode<synchronous>, transform_indices = @transform_23, window_bounds = array<i64: 2, 32, 64>}, {pipeline_mode = #tpu.pipeline_mode<synchronous>, transform_indices = @transform_24, window_bounds = array<i64: 2, 1, 64>}, {pipeline_mode = #tpu.pipeline_mode<synchronous>, transform_indices = @transform_25, window_bounds = array<i64: 2, 32, 32>}, {pipeline_mode = #tpu.pipeline_mode<synchronous>, transform_indices = @transform_26, window_bounds = array<i64: 2, 1, 32>}, {pipeline_mode = #tpu.pipeline_mode<synchronous>, transform_indices = @transform_27, window_bounds = array<i64: 2, 32, 64>}, {pipeline_mode = #tpu.pipeline_mode<synchronous>, transform_indices = @transform_28, window_bounds = array<i64: 2, 1, 64>}, {pipeline_mode = #tpu.pipeline_mode<synchronous>, transform_indices = @transform_29, window_bounds = array<i64: 2, 64, 32>}, {pipeline_mode = #tpu.pipeline_mode<synchronous>, transform_indices = @transform_30, window_bounds = array<i64: 2, 1, 32>}, {pipeline_mode = #tpu.pipeline_mode<synchronous>, transform_indices = @transform_31, window_bounds = array<i64: 2, 6, 32>}, {pipeline_mode = #tpu.pipeline_mode<synchronous>, transform_indices = @transform_32, window_bounds = array<i64: 32, 16>}, {pipeline_mode = #tpu.pipeline_mode<synchronous>, transform_indices = @transform_33, window_bounds = array<i64: 1, 16>}, {pipeline_mode = #tpu.pipeline_mode<synchronous>, transform_indices = @transform_34, window_bounds = array<i64: 3, 16, 16>}, {pipeline_mode = #tpu.pipeline_mode<synchronous>, transform_indices = @transform_35, window_bounds = array<i64: 1, 16>}, {pipeline_mode = #tpu.pipeline_mode<synchronous>, transform_indices = @transform_36, window_bounds = array<i64: 3, 16, 16>}, {pipeline_mode = #tpu.pipeline_mode<synchronous>, transform_indices = @transform_37, window_bounds = array<i64: 1, 16>}, {transform_indices = @transform_38, window_bounds = array<i64: 1, 8, 16>}]} {
    %c0 = arith.constant 0 : index
    %c0_0 = arith.constant 0 : index
    %0 = vector.load %arg3[%c0, %c0_0] : memref<16x32xf32, #tpu.memory_space<vmem>>, vector<16x32xf32>
    %c0_1 = arith.constant 0 : index
    %c0_2 = arith.constant 0 : index
    %1 = vector.load %arg4[%c0_1, %c0_2] : memref<1x32xf32, #tpu.memory_space<vmem>>, vector<1x32xf32>
    %c0_3 = arith.constant 0 : index
    %c0_4 = arith.constant 0 : index
    %c0_5 = arith.constant 0 : index
    %2 = vector.load %arg1[%c0_3, %c0_4, %c0_5] : memref<1x12x16xf32, #tpu.memory_space<vmem>>, vector<1x12x16xf32>
    %3 = vector.shape_cast %2 : vector<1x12x16xf32> to vector<12x16xf32>
    %cst = arith.constant dense<0.000000e+00> : vector<12x32xf32>
    %4 = tpu.matmul %3, %0, %cst {dimension_numbers = #tpu.dot_dimension_numbers<[1], [0], [0], [1], [0, 0, 1, 1], [], []>} : vector<12x16xf32>, vector<16x32xf32>, vector<12x32xf32> -> vector<12x32xf32>
    %5 = vector.broadcast %1 : vector<1x32xf32> to vector<12x32xf32>
    %6 = arith.addf %4, %5 : vector<12x32xf32>
    %c0_6 = arith.constant 0 : index
    %c0_7 = arith.constant 0 : index
    %7 = vector.load %arg5[%c0_6, %c0_7] : memref<12x32xf32, #tpu.memory_space<vmem>>, vector<12x32xf32>
    %8 = arith.addf %6, %7 : vector<12x32xf32>
    %c0_8 = arith.constant 0 : index
    %c0_9 = arith.constant 0 : index
    %9 = vector.load %arg7[%c0_8, %c0_9] : memref<8x12xf32, #tpu.memory_space<vmem>>, vector<8x12xf32>
    %cst_10 = arith.constant dense<0.000000e+00> : vector<8x32xf32>
    %10 = tpu.matmul %9, %8, %cst_10 {dimension_numbers = #tpu.dot_dimension_numbers<[1], [0], [0], [1], [0, 0, 1, 1], [], []>} : vector<8x12xf32>, vector<12x32xf32>, vector<8x32xf32> -> vector<8x32xf32>
    %c0_11 = arith.constant 0 : index
    %c0_12 = arith.constant 0 : index
    %c0_13 = arith.constant 0 : index
    %11 = vector.load %arg2[%c0_11, %c0_12, %c0_13] : memref<1x8x16xf32, #tpu.memory_space<vmem>>, vector<1x8x16xf32>
    %12 = vector.shape_cast %11 : vector<1x8x16xf32> to vector<8x16xf32>
    %cst_14 = arith.constant dense<0.000000e+00> : vector<8x32xf32>
    %13 = tpu.matmul %12, %0, %cst_14 {dimension_numbers = #tpu.dot_dimension_numbers<[1], [0], [0], [1], [0, 0, 1, 1], [], []>} : vector<8x16xf32>, vector<16x32xf32>, vector<8x32xf32> -> vector<8x32xf32>
    %14 = vector.broadcast %1 : vector<1x32xf32> to vector<8x32xf32>
    %15 = arith.addf %13, %14 : vector<8x32xf32>
    %c0_15 = arith.constant 0 : index
    %c0_16 = arith.constant 0 : index
    %16 = vector.load %arg6[%c0_15, %c0_16] : memref<8x32xf32, #tpu.memory_space<vmem>>, vector<8x32xf32>
    %17 = arith.addf %15, %16 : vector<8x32xf32>
    %c0_17 = arith.constant 0 : index
    %c0_18 = arith.constant 0 : index
    %c0_19 = arith.constant 0 : index
    %18 = vector.load %arg17[%c0_17, %c0_18, %c0_19] : memref<2x4x32xf32, #tpu.memory_space<vmem>>, vector<1x4x32xf32>
    %19 = vector.shape_cast %18 : vector<1x4x32xf32> to vector<4x32xf32>
    %c0_20 = arith.constant 0 : index
    %c0_21 = arith.constant 0 : index
    %c0_22 = arith.constant 0 : index
    %20 = vector.load %arg9[%c0_20, %c0_21, %c0_22] : memref<2x32x96xf32, #tpu.memory_space<vmem>>, vector<1x32x96xf32>
    %21 = vector.shape_cast %20 : vector<1x32x96xf32> to vector<32x96xf32>
    %cst_23 = arith.constant dense<0.000000e+00> : vector<8x96xf32>
    %22 = tpu.matmul %10, %21, %cst_23 {dimension_numbers = #tpu.dot_dimension_numbers<[1], [0], [0], [1], [0, 0, 1, 1], [], []>} : vector<8x32xf32>, vector<32x96xf32>, vector<8x96xf32> -> vector<8x96xf32>
    %c0_24 = arith.constant 0 : index
    %c0_25 = arith.constant 0 : index
    %c0_26 = arith.constant 0 : index
    %23 = vector.load %arg10[%c0_24, %c0_25, %c0_26] : memref<2x1x96xf32, #tpu.memory_space<vmem>>, vector<1x1x96xf32>
    %24 = vector.shape_cast %23 : vector<1x1x96xf32> to vector<1x96xf32>
    %25 = vector.broadcast %24 : vector<1x96xf32> to vector<8x96xf32>
    %26 = arith.addf %22, %25 : vector<8x96xf32>
    %27 = vector.extract_strided_slice %26 {offsets = [0, 0], sizes = [8, 32], strides = [1, 1]} : vector<8x96xf32> to vector<8x32xf32>
    %28 = vector.extract_strided_slice %26 {offsets = [0, 32], sizes = [8, 32], strides = [1, 1]} : vector<8x96xf32> to vector<8x32xf32>
    %29 = vector.extract_strided_slice %26 {offsets = [0, 64], sizes = [8, 32], strides = [1, 1]} : vector<8x96xf32> to vector<8x32xf32>
    %c0_27 = arith.constant 0 : index
    %c0_28 = arith.constant 0 : index
    %c0_29 = arith.constant 0 : index
    %30 = vector.load %arg11[%c0_27, %c0_28, %c0_29] : memref<2x32x32xf32, #tpu.memory_space<vmem>>, vector<1x32x32xf32>
    %31 = vector.shape_cast %30 : vector<1x32x32xf32> to vector<32x32xf32>
    %c0_30 = arith.constant 0 : index
    %c0_31 = arith.constant 0 : index
    %c0_32 = arith.constant 0 : index
    %32 = vector.load %arg12[%c0_30, %c0_31, %c0_32] : memref<2x1x32xf32, #tpu.memory_space<vmem>>, vector<1x1x32xf32>
    %33 = vector.shape_cast %32 : vector<1x1x32xf32> to vector<1x32xf32>
    %34 = vector.extract_strided_slice %27 {offsets = [0, 0], sizes = [8, 8], strides = [1, 1]} : vector<8x32xf32> to vector<8x8xf32>
    %35 = vector.extract_strided_slice %28 {offsets = [0, 0], sizes = [8, 8], strides = [1, 1]} : vector<8x32xf32> to vector<8x8xf32>
    %cst_33 = arith.constant dense<0.000000e+00> : vector<8x8xf32>
    %36 = tpu.matmul %34, %35, %cst_33 {dimension_numbers = #tpu.dot_dimension_numbers<[1], [1], [0], [0], [0, 0, 1, 0], [], []>} : vector<8x8xf32>, vector<8x8xf32>, vector<8x8xf32> -> vector<8x8xf32>
    %cst_34 = arith.constant 0.353553385 : f32
    %37 = vector.broadcast %cst_34 : f32 to vector<8x8xf32>
    %38 = arith.mulf %36, %37 : vector<8x8xf32>
    %cst_35 = arith.constant dense<0xFF800000> : vector<8xf32>
    %39 = vector.multi_reduction <maximumf>, %38, %cst_35 [1] : vector<8x8xf32> to vector<8xf32>
    %40 = vector.shape_cast %39 : vector<8xf32> to vector<8x1xf32>
    %41 = vector.broadcast %40 : vector<8x1xf32> to vector<8x8xf32>
    %42 = arith.subf %38, %41 : vector<8x8xf32>
    %43 = math.exp %42 : vector<8x8xf32>
    %cst_36 = arith.constant dense<0.000000e+00> : vector<8xf32>
    %44 = vector.multi_reduction <add>, %43, %cst_36 [1] : vector<8x8xf32> to vector<8xf32>
    %45 = vector.shape_cast %44 : vector<8xf32> to vector<8x1xf32>
    %46 = tpu.reciprocal %45 {approx = true} : vector<8x1xf32> -> vector<8x1xf32>
    %47 = vector.broadcast %46 : vector<8x1xf32> to vector<8x8xf32>
    %48 = arith.mulf %43, %47 : vector<8x8xf32>
    %49 = vector.extract_strided_slice %29 {offsets = [0, 0], sizes = [8, 8], strides = [1, 1]} : vector<8x32xf32> to vector<8x8xf32>
    %cst_37 = arith.constant dense<0.000000e+00> : vector<8x8xf32>
    %50 = tpu.matmul %48, %49, %cst_37 {dimension_numbers = #tpu.dot_dimension_numbers<[1], [0], [0], [1], [0, 0, 1, 1], [], []>} : vector<8x8xf32>, vector<8x8xf32>, vector<8x8xf32> -> vector<8x8xf32>
    %51 = vector.extract_strided_slice %27 {offsets = [0, 8], sizes = [8, 8], strides = [1, 1]} : vector<8x32xf32> to vector<8x8xf32>
    %52 = vector.extract_strided_slice %28 {offsets = [0, 8], sizes = [8, 8], strides = [1, 1]} : vector<8x32xf32> to vector<8x8xf32>
    %cst_38 = arith.constant dense<0.000000e+00> : vector<8x8xf32>
    %53 = tpu.matmul %51, %52, %cst_38 {dimension_numbers = #tpu.dot_dimension_numbers<[1], [1], [0], [0], [0, 0, 1, 0], [], []>} : vector<8x8xf32>, vector<8x8xf32>, vector<8x8xf32> -> vector<8x8xf32>
    %cst_39 = arith.constant 0.353553385 : f32
    %54 = vector.broadcast %cst_39 : f32 to vector<8x8xf32>
    %55 = arith.mulf %53, %54 : vector<8x8xf32>
    %cst_40 = arith.constant dense<0xFF800000> : vector<8xf32>
    %56 = vector.multi_reduction <maximumf>, %55, %cst_40 [1] : vector<8x8xf32> to vector<8xf32>
    %57 = vector.shape_cast %56 : vector<8xf32> to vector<8x1xf32>
    %58 = vector.broadcast %57 : vector<8x1xf32> to vector<8x8xf32>
    %59 = arith.subf %55, %58 : vector<8x8xf32>
    %60 = math.exp %59 : vector<8x8xf32>
    %cst_41 = arith.constant dense<0.000000e+00> : vector<8xf32>
    %61 = vector.multi_reduction <add>, %60, %cst_41 [1] : vector<8x8xf32> to vector<8xf32>
    %62 = vector.shape_cast %61 : vector<8xf32> to vector<8x1xf32>
    %63 = tpu.reciprocal %62 {approx = true} : vector<8x1xf32> -> vector<8x1xf32>
    %64 = vector.broadcast %63 : vector<8x1xf32> to vector<8x8xf32>
    %65 = arith.mulf %60, %64 : vector<8x8xf32>
    %66 = vector.extract_strided_slice %29 {offsets = [0, 8], sizes = [8, 8], strides = [1, 1]} : vector<8x32xf32> to vector<8x8xf32>
    %cst_42 = arith.constant dense<0.000000e+00> : vector<8x8xf32>
    %67 = tpu.matmul %65, %66, %cst_42 {dimension_numbers = #tpu.dot_dimension_numbers<[1], [0], [0], [1], [0, 0, 1, 1], [], []>} : vector<8x8xf32>, vector<8x8xf32>, vector<8x8xf32> -> vector<8x8xf32>
    %68 = vector.extract_strided_slice %27 {offsets = [0, 16], sizes = [8, 8], strides = [1, 1]} : vector<8x32xf32> to vector<8x8xf32>
    %69 = vector.extract_strided_slice %28 {offsets = [0, 16], sizes = [8, 8], strides = [1, 1]} : vector<8x32xf32> to vector<8x8xf32>
    %cst_43 = arith.constant dense<0.000000e+00> : vector<8x8xf32>
    %70 = tpu.matmul %68, %69, %cst_43 {dimension_numbers = #tpu.dot_dimension_numbers<[1], [1], [0], [0], [0, 0, 1, 0], [], []>} : vector<8x8xf32>, vector<8x8xf32>, vector<8x8xf32> -> vector<8x8xf32>
    %cst_44 = arith.constant 0.353553385 : f32
    %71 = vector.broadcast %cst_44 : f32 to vector<8x8xf32>
    %72 = arith.mulf %70, %71 : vector<8x8xf32>
    %cst_45 = arith.constant dense<0xFF800000> : vector<8xf32>
    %73 = vector.multi_reduction <maximumf>, %72, %cst_45 [1] : vector<8x8xf32> to vector<8xf32>
    %74 = vector.shape_cast %73 : vector<8xf32> to vector<8x1xf32>
    %75 = vector.broadcast %74 : vector<8x1xf32> to vector<8x8xf32>
    %76 = arith.subf %72, %75 : vector<8x8xf32>
    %77 = math.exp %76 : vector<8x8xf32>
    %cst_46 = arith.constant dense<0.000000e+00> : vector<8xf32>
    %78 = vector.multi_reduction <add>, %77, %cst_46 [1] : vector<8x8xf32> to vector<8xf32>
    %79 = vector.shape_cast %78 : vector<8xf32> to vector<8x1xf32>
    %80 = tpu.reciprocal %79 {approx = true} : vector<8x1xf32> -> vector<8x1xf32>
    %81 = vector.broadcast %80 : vector<8x1xf32> to vector<8x8xf32>
    %82 = arith.mulf %77, %81 : vector<8x8xf32>
    %83 = vector.extract_strided_slice %29 {offsets = [0, 16], sizes = [8, 8], strides = [1, 1]} : vector<8x32xf32> to vector<8x8xf32>
    %cst_47 = arith.constant dense<0.000000e+00> : vector<8x8xf32>
    %84 = tpu.matmul %82, %83, %cst_47 {dimension_numbers = #tpu.dot_dimension_numbers<[1], [0], [0], [1], [0, 0, 1, 1], [], []>} : vector<8x8xf32>, vector<8x8xf32>, vector<8x8xf32> -> vector<8x8xf32>
    %85 = vector.extract_strided_slice %27 {offsets = [0, 24], sizes = [8, 8], strides = [1, 1]} : vector<8x32xf32> to vector<8x8xf32>
    %86 = vector.extract_strided_slice %28 {offsets = [0, 24], sizes = [8, 8], strides = [1, 1]} : vector<8x32xf32> to vector<8x8xf32>
    %cst_48 = arith.constant dense<0.000000e+00> : vector<8x8xf32>
    %87 = tpu.matmul %85, %86, %cst_48 {dimension_numbers = #tpu.dot_dimension_numbers<[1], [1], [0], [0], [0, 0, 1, 0], [], []>} : vector<8x8xf32>, vector<8x8xf32>, vector<8x8xf32> -> vector<8x8xf32>
    %cst_49 = arith.constant 0.353553385 : f32
    %88 = vector.broadcast %cst_49 : f32 to vector<8x8xf32>
    %89 = arith.mulf %87, %88 : vector<8x8xf32>
    %cst_50 = arith.constant dense<0xFF800000> : vector<8xf32>
    %90 = vector.multi_reduction <maximumf>, %89, %cst_50 [1] : vector<8x8xf32> to vector<8xf32>
    %91 = vector.shape_cast %90 : vector<8xf32> to vector<8x1xf32>
    %92 = vector.broadcast %91 : vector<8x1xf32> to vector<8x8xf32>
    %93 = arith.subf %89, %92 : vector<8x8xf32>
    %94 = math.exp %93 : vector<8x8xf32>
    %cst_51 = arith.constant dense<0.000000e+00> : vector<8xf32>
    %95 = vector.multi_reduction <add>, %94, %cst_51 [1] : vector<8x8xf32> to vector<8xf32>
    %96 = vector.shape_cast %95 : vector<8xf32> to vector<8x1xf32>
    %97 = tpu.reciprocal %96 {approx = true} : vector<8x1xf32> -> vector<8x1xf32>
    %98 = vector.broadcast %97 : vector<8x1xf32> to vector<8x8xf32>
    %99 = arith.mulf %94, %98 : vector<8x8xf32>
    %100 = vector.extract_strided_slice %29 {offsets = [0, 24], sizes = [8, 8], strides = [1, 1]} : vector<8x32xf32> to vector<8x8xf32>
    %cst_52 = arith.constant dense<0.000000e+00> : vector<8x8xf32>
    %101 = tpu.matmul %99, %100, %cst_52 {dimension_numbers = #tpu.dot_dimension_numbers<[1], [0], [0], [1], [0, 0, 1, 1], [], []>} : vector<8x8xf32>, vector<8x8xf32>, vector<8x8xf32> -> vector<8x8xf32>
    %102 = tpu.concatenate %50, %67, %84, %101 in 1 : vector<8x8xf32>, vector<8x8xf32>, vector<8x8xf32>, vector<8x8xf32> -> vector<8x32xf32>
    %cst_53 = arith.constant dense<0.000000e+00> : vector<8x32xf32>
    %103 = tpu.matmul %102, %31, %cst_53 {dimension_numbers = #tpu.dot_dimension_numbers<[1], [0], [0], [1], [0, 0, 1, 1], [], []>} : vector<8x32xf32>, vector<32x32xf32>, vector<8x32xf32> -> vector<8x32xf32>
    %104 = vector.broadcast %33 : vector<1x32xf32> to vector<8x32xf32>
    %105 = arith.addf %103, %104 : vector<8x32xf32>
    %106 = arith.addf %10, %105 : vector<8x32xf32>
    %107 = vector.extract_strided_slice %19 {offsets = [0, 0], sizes = [1, 32], strides = [1, 1]} : vector<4x32xf32> to vector<1x32xf32>
    %108 = vector.extract_strided_slice %19 {offsets = [1, 0], sizes = [1, 32], strides = [1, 1]} : vector<4x32xf32> to vector<1x32xf32>
    %cst_54 = arith.constant dense<0.000000e+00> : vector<8xf32>
    %109 = vector.multi_reduction <add>, %106, %cst_54 [1] : vector<8x32xf32> to vector<8xf32>
    %110 = vector.shape_cast %109 : vector<8xf32> to vector<8x1xf32>
    %cst_55 = arith.constant 3.200000e+01 : f32
    %111 = vector.broadcast %cst_55 : f32 to vector<8x1xf32>
    %112 = arith.divf %110, %111 : vector<8x1xf32>
    %113 = arith.mulf %106, %106 : vector<8x32xf32>
    %cst_56 = arith.constant dense<0.000000e+00> : vector<8xf32>
    %114 = vector.multi_reduction <add>, %113, %cst_56 [1] : vector<8x32xf32> to vector<8xf32>
    %115 = vector.shape_cast %114 : vector<8xf32> to vector<8x1xf32>
    %cst_57 = arith.constant 3.200000e+01 : f32
    %116 = vector.broadcast %cst_57 : f32 to vector<8x1xf32>
    %117 = arith.divf %115, %116 : vector<8x1xf32>
    %118 = arith.mulf %112, %112 : vector<8x1xf32>
    %119 = arith.subf %117, %118 : vector<8x1xf32>
    %120 = vector.broadcast %112 : vector<8x1xf32> to vector<8x32xf32>
    %121 = arith.subf %106, %120 : vector<8x32xf32>
    %cst_58 = arith.constant 9.99999974E-6 : f32
    %122 = vector.broadcast %cst_58 : f32 to vector<8x1xf32>
    %123 = arith.addf %119, %122 : vector<8x1xf32>
    %124 = math.rsqrt %123 : vector<8x1xf32>
    %125 = vector.broadcast %124 : vector<8x1xf32> to vector<8x32xf32>
    %126 = arith.mulf %121, %125 : vector<8x32xf32>
    %127 = vector.broadcast %107 : vector<1x32xf32> to vector<8x32xf32>
    %128 = arith.mulf %126, %127 : vector<8x32xf32>
    %129 = vector.broadcast %108 : vector<1x32xf32> to vector<8x32xf32>
    %130 = arith.addf %128, %129 : vector<8x32xf32>
    %c0_59 = arith.constant 0 : index
    %c0_60 = arith.constant 0 : index
    %c0_61 = arith.constant 0 : index
    %131 = vector.load %arg13[%c0_59, %c0_60, %c0_61] : memref<2x32x64xf32, #tpu.memory_space<vmem>>, vector<1x32x64xf32>
    %132 = vector.shape_cast %131 : vector<1x32x64xf32> to vector<32x64xf32>
    %cst_62 = arith.constant dense<0.000000e+00> : vector<8x64xf32>
    %133 = tpu.matmul %130, %132, %cst_62 {dimension_numbers = #tpu.dot_dimension_numbers<[1], [0], [0], [1], [0, 0, 1, 1], [], []>} : vector<8x32xf32>, vector<32x64xf32>, vector<8x64xf32> -> vector<8x64xf32>
    %c0_63 = arith.constant 0 : index
    %c0_64 = arith.constant 0 : index
    %c0_65 = arith.constant 0 : index
    %134 = vector.load %arg14[%c0_63, %c0_64, %c0_65] : memref<2x1x64xf32, #tpu.memory_space<vmem>>, vector<1x1x64xf32>
    %135 = vector.shape_cast %134 : vector<1x1x64xf32> to vector<1x64xf32>
    %136 = vector.broadcast %135 : vector<1x64xf32> to vector<8x64xf32>
    %137 = arith.addf %133, %136 : vector<8x64xf32>
    %cst_66 = arith.constant 0.000000e+00 : f32
    %138 = vector.broadcast %cst_66 : f32 to vector<8x64xf32>
    %139 = arith.maximumf %137, %138 : vector<8x64xf32>
    %c0_67 = arith.constant 0 : index
    %c0_68 = arith.constant 0 : index
    %c0_69 = arith.constant 0 : index
    %140 = vector.load %arg15[%c0_67, %c0_68, %c0_69] : memref<2x64x32xf32, #tpu.memory_space<vmem>>, vector<1x64x32xf32>
    %141 = vector.shape_cast %140 : vector<1x64x32xf32> to vector<64x32xf32>
    %cst_70 = arith.constant dense<0.000000e+00> : vector<8x32xf32>
    %142 = tpu.matmul %139, %141, %cst_70 {dimension_numbers = #tpu.dot_dimension_numbers<[1], [0], [0], [1], [0, 0, 1, 1], [], []>} : vector<8x64xf32>, vector<64x32xf32>, vector<8x32xf32> -> vector<8x32xf32>
    %c0_71 = arith.constant 0 : index
    %c0_72 = arith.constant 0 : index
    %c0_73 = arith.constant 0 : index
    %143 = vector.load %arg16[%c0_71, %c0_72, %c0_73] : memref<2x1x32xf32, #tpu.memory_space<vmem>>, vector<1x1x32xf32>
    %144 = vector.shape_cast %143 : vector<1x1x32xf32> to vector<1x32xf32>
    %145 = vector.broadcast %144 : vector<1x32xf32> to vector<8x32xf32>
    %146 = arith.addf %142, %145 : vector<8x32xf32>
    %147 = arith.addf %130, %146 : vector<8x32xf32>
    %148 = vector.extract_strided_slice %19 {offsets = [2, 0], sizes = [1, 32], strides = [1, 1]} : vector<4x32xf32> to vector<1x32xf32>
    %149 = vector.extract_strided_slice %19 {offsets = [3, 0], sizes = [1, 32], strides = [1, 1]} : vector<4x32xf32> to vector<1x32xf32>
    %cst_74 = arith.constant dense<0.000000e+00> : vector<8xf32>
    %150 = vector.multi_reduction <add>, %147, %cst_74 [1] : vector<8x32xf32> to vector<8xf32>
    %151 = vector.shape_cast %150 : vector<8xf32> to vector<8x1xf32>
    %cst_75 = arith.constant 3.200000e+01 : f32
    %152 = vector.broadcast %cst_75 : f32 to vector<8x1xf32>
    %153 = arith.divf %151, %152 : vector<8x1xf32>
    %154 = arith.mulf %147, %147 : vector<8x32xf32>
    %cst_76 = arith.constant dense<0.000000e+00> : vector<8xf32>
    %155 = vector.multi_reduction <add>, %154, %cst_76 [1] : vector<8x32xf32> to vector<8xf32>
    %156 = vector.shape_cast %155 : vector<8xf32> to vector<8x1xf32>
    %cst_77 = arith.constant 3.200000e+01 : f32
    %157 = vector.broadcast %cst_77 : f32 to vector<8x1xf32>
    %158 = arith.divf %156, %157 : vector<8x1xf32>
    %159 = arith.mulf %153, %153 : vector<8x1xf32>
    %160 = arith.subf %158, %159 : vector<8x1xf32>
    %161 = vector.broadcast %153 : vector<8x1xf32> to vector<8x32xf32>
    %162 = arith.subf %147, %161 : vector<8x32xf32>
    %cst_78 = arith.constant 9.99999974E-6 : f32
    %163 = vector.broadcast %cst_78 : f32 to vector<8x1xf32>
    %164 = arith.addf %160, %163 : vector<8x1xf32>
    %165 = math.rsqrt %164 : vector<8x1xf32>
    %166 = vector.broadcast %165 : vector<8x1xf32> to vector<8x32xf32>
    %167 = arith.mulf %162, %166 : vector<8x32xf32>
    %168 = vector.broadcast %148 : vector<1x32xf32> to vector<8x32xf32>
    %169 = arith.mulf %167, %168 : vector<8x32xf32>
    %170 = vector.broadcast %149 : vector<1x32xf32> to vector<8x32xf32>
    %171 = arith.addf %169, %170 : vector<8x32xf32>
    %c1 = arith.constant 1 : index
    %c0_79 = arith.constant 0 : index
    %c0_80 = arith.constant 0 : index
    %172 = vector.load %arg17[%c1, %c0_79, %c0_80] : memref<2x4x32xf32, #tpu.memory_space<vmem>>, vector<1x4x32xf32>
    %173 = vector.shape_cast %172 : vector<1x4x32xf32> to vector<4x32xf32>
    %c1_81 = arith.constant 1 : index
    %c0_82 = arith.constant 0 : index
    %c0_83 = arith.constant 0 : index
    %174 = vector.load %arg9[%c1_81, %c0_82, %c0_83] : memref<2x32x96xf32, #tpu.memory_space<vmem>>, vector<1x32x96xf32>
    %175 = vector.shape_cast %174 : vector<1x32x96xf32> to vector<32x96xf32>
    %cst_84 = arith.constant dense<0.000000e+00> : vector<8x96xf32>
    %176 = tpu.matmul %171, %175, %cst_84 {dimension_numbers = #tpu.dot_dimension_numbers<[1], [0], [0], [1], [0, 0, 1, 1], [], []>} : vector<8x32xf32>, vector<32x96xf32>, vector<8x96xf32> -> vector<8x96xf32>
    %c1_85 = arith.constant 1 : index
    %c0_86 = arith.constant 0 : index
    %c0_87 = arith.constant 0 : index
    %177 = vector.load %arg10[%c1_85, %c0_86, %c0_87] : memref<2x1x96xf32, #tpu.memory_space<vmem>>, vector<1x1x96xf32>
    %178 = vector.shape_cast %177 : vector<1x1x96xf32> to vector<1x96xf32>
    %179 = vector.broadcast %178 : vector<1x96xf32> to vector<8x96xf32>
    %180 = arith.addf %176, %179 : vector<8x96xf32>
    %181 = vector.extract_strided_slice %180 {offsets = [0, 0], sizes = [8, 32], strides = [1, 1]} : vector<8x96xf32> to vector<8x32xf32>
    %182 = vector.extract_strided_slice %180 {offsets = [0, 32], sizes = [8, 32], strides = [1, 1]} : vector<8x96xf32> to vector<8x32xf32>
    %183 = vector.extract_strided_slice %180 {offsets = [0, 64], sizes = [8, 32], strides = [1, 1]} : vector<8x96xf32> to vector<8x32xf32>
    %c1_88 = arith.constant 1 : index
    %c0_89 = arith.constant 0 : index
    %c0_90 = arith.constant 0 : index
    %184 = vector.load %arg11[%c1_88, %c0_89, %c0_90] : memref<2x32x32xf32, #tpu.memory_space<vmem>>, vector<1x32x32xf32>
    %185 = vector.shape_cast %184 : vector<1x32x32xf32> to vector<32x32xf32>
    %c1_91 = arith.constant 1 : index
    %c0_92 = arith.constant 0 : index
    %c0_93 = arith.constant 0 : index
    %186 = vector.load %arg12[%c1_91, %c0_92, %c0_93] : memref<2x1x32xf32, #tpu.memory_space<vmem>>, vector<1x1x32xf32>
    %187 = vector.shape_cast %186 : vector<1x1x32xf32> to vector<1x32xf32>
    %188 = vector.extract_strided_slice %181 {offsets = [0, 0], sizes = [8, 8], strides = [1, 1]} : vector<8x32xf32> to vector<8x8xf32>
    %189 = vector.extract_strided_slice %182 {offsets = [0, 0], sizes = [8, 8], strides = [1, 1]} : vector<8x32xf32> to vector<8x8xf32>
    %cst_94 = arith.constant dense<0.000000e+00> : vector<8x8xf32>
    %190 = tpu.matmul %188, %189, %cst_94 {dimension_numbers = #tpu.dot_dimension_numbers<[1], [1], [0], [0], [0, 0, 1, 0], [], []>} : vector<8x8xf32>, vector<8x8xf32>, vector<8x8xf32> -> vector<8x8xf32>
    %cst_95 = arith.constant 0.353553385 : f32
    %191 = vector.broadcast %cst_95 : f32 to vector<8x8xf32>
    %192 = arith.mulf %190, %191 : vector<8x8xf32>
    %cst_96 = arith.constant dense<0xFF800000> : vector<8xf32>
    %193 = vector.multi_reduction <maximumf>, %192, %cst_96 [1] : vector<8x8xf32> to vector<8xf32>
    %194 = vector.shape_cast %193 : vector<8xf32> to vector<8x1xf32>
    %195 = vector.broadcast %194 : vector<8x1xf32> to vector<8x8xf32>
    %196 = arith.subf %192, %195 : vector<8x8xf32>
    %197 = math.exp %196 : vector<8x8xf32>
    %cst_97 = arith.constant dense<0.000000e+00> : vector<8xf32>
    %198 = vector.multi_reduction <add>, %197, %cst_97 [1] : vector<8x8xf32> to vector<8xf32>
    %199 = vector.shape_cast %198 : vector<8xf32> to vector<8x1xf32>
    %200 = tpu.reciprocal %199 {approx = true} : vector<8x1xf32> -> vector<8x1xf32>
    %201 = vector.broadcast %200 : vector<8x1xf32> to vector<8x8xf32>
    %202 = arith.mulf %197, %201 : vector<8x8xf32>
    %203 = vector.extract_strided_slice %183 {offsets = [0, 0], sizes = [8, 8], strides = [1, 1]} : vector<8x32xf32> to vector<8x8xf32>
    %cst_98 = arith.constant dense<0.000000e+00> : vector<8x8xf32>
    %204 = tpu.matmul %202, %203, %cst_98 {dimension_numbers = #tpu.dot_dimension_numbers<[1], [0], [0], [1], [0, 0, 1, 1], [], []>} : vector<8x8xf32>, vector<8x8xf32>, vector<8x8xf32> -> vector<8x8xf32>
    %205 = vector.extract_strided_slice %181 {offsets = [0, 8], sizes = [8, 8], strides = [1, 1]} : vector<8x32xf32> to vector<8x8xf32>
    %206 = vector.extract_strided_slice %182 {offsets = [0, 8], sizes = [8, 8], strides = [1, 1]} : vector<8x32xf32> to vector<8x8xf32>
    %cst_99 = arith.constant dense<0.000000e+00> : vector<8x8xf32>
    %207 = tpu.matmul %205, %206, %cst_99 {dimension_numbers = #tpu.dot_dimension_numbers<[1], [1], [0], [0], [0, 0, 1, 0], [], []>} : vector<8x8xf32>, vector<8x8xf32>, vector<8x8xf32> -> vector<8x8xf32>
    %cst_100 = arith.constant 0.353553385 : f32
    %208 = vector.broadcast %cst_100 : f32 to vector<8x8xf32>
    %209 = arith.mulf %207, %208 : vector<8x8xf32>
    %cst_101 = arith.constant dense<0xFF800000> : vector<8xf32>
    %210 = vector.multi_reduction <maximumf>, %209, %cst_101 [1] : vector<8x8xf32> to vector<8xf32>
    %211 = vector.shape_cast %210 : vector<8xf32> to vector<8x1xf32>
    %212 = vector.broadcast %211 : vector<8x1xf32> to vector<8x8xf32>
    %213 = arith.subf %209, %212 : vector<8x8xf32>
    %214 = math.exp %213 : vector<8x8xf32>
    %cst_102 = arith.constant dense<0.000000e+00> : vector<8xf32>
    %215 = vector.multi_reduction <add>, %214, %cst_102 [1] : vector<8x8xf32> to vector<8xf32>
    %216 = vector.shape_cast %215 : vector<8xf32> to vector<8x1xf32>
    %217 = tpu.reciprocal %216 {approx = true} : vector<8x1xf32> -> vector<8x1xf32>
    %218 = vector.broadcast %217 : vector<8x1xf32> to vector<8x8xf32>
    %219 = arith.mulf %214, %218 : vector<8x8xf32>
    %220 = vector.extract_strided_slice %183 {offsets = [0, 8], sizes = [8, 8], strides = [1, 1]} : vector<8x32xf32> to vector<8x8xf32>
    %cst_103 = arith.constant dense<0.000000e+00> : vector<8x8xf32>
    %221 = tpu.matmul %219, %220, %cst_103 {dimension_numbers = #tpu.dot_dimension_numbers<[1], [0], [0], [1], [0, 0, 1, 1], [], []>} : vector<8x8xf32>, vector<8x8xf32>, vector<8x8xf32> -> vector<8x8xf32>
    %222 = vector.extract_strided_slice %181 {offsets = [0, 16], sizes = [8, 8], strides = [1, 1]} : vector<8x32xf32> to vector<8x8xf32>
    %223 = vector.extract_strided_slice %182 {offsets = [0, 16], sizes = [8, 8], strides = [1, 1]} : vector<8x32xf32> to vector<8x8xf32>
    %cst_104 = arith.constant dense<0.000000e+00> : vector<8x8xf32>
    %224 = tpu.matmul %222, %223, %cst_104 {dimension_numbers = #tpu.dot_dimension_numbers<[1], [1], [0], [0], [0, 0, 1, 0], [], []>} : vector<8x8xf32>, vector<8x8xf32>, vector<8x8xf32> -> vector<8x8xf32>
    %cst_105 = arith.constant 0.353553385 : f32
    %225 = vector.broadcast %cst_105 : f32 to vector<8x8xf32>
    %226 = arith.mulf %224, %225 : vector<8x8xf32>
    %cst_106 = arith.constant dense<0xFF800000> : vector<8xf32>
    %227 = vector.multi_reduction <maximumf>, %226, %cst_106 [1] : vector<8x8xf32> to vector<8xf32>
    %228 = vector.shape_cast %227 : vector<8xf32> to vector<8x1xf32>
    %229 = vector.broadcast %228 : vector<8x1xf32> to vector<8x8xf32>
    %230 = arith.subf %226, %229 : vector<8x8xf32>
    %231 = math.exp %230 : vector<8x8xf32>
    %cst_107 = arith.constant dense<0.000000e+00> : vector<8xf32>
    %232 = vector.multi_reduction <add>, %231, %cst_107 [1] : vector<8x8xf32> to vector<8xf32>
    %233 = vector.shape_cast %232 : vector<8xf32> to vector<8x1xf32>
    %234 = tpu.reciprocal %233 {approx = true} : vector<8x1xf32> -> vector<8x1xf32>
    %235 = vector.broadcast %234 : vector<8x1xf32> to vector<8x8xf32>
    %236 = arith.mulf %231, %235 : vector<8x8xf32>
    %237 = vector.extract_strided_slice %183 {offsets = [0, 16], sizes = [8, 8], strides = [1, 1]} : vector<8x32xf32> to vector<8x8xf32>
    %cst_108 = arith.constant dense<0.000000e+00> : vector<8x8xf32>
    %238 = tpu.matmul %236, %237, %cst_108 {dimension_numbers = #tpu.dot_dimension_numbers<[1], [0], [0], [1], [0, 0, 1, 1], [], []>} : vector<8x8xf32>, vector<8x8xf32>, vector<8x8xf32> -> vector<8x8xf32>
    %239 = vector.extract_strided_slice %181 {offsets = [0, 24], sizes = [8, 8], strides = [1, 1]} : vector<8x32xf32> to vector<8x8xf32>
    %240 = vector.extract_strided_slice %182 {offsets = [0, 24], sizes = [8, 8], strides = [1, 1]} : vector<8x32xf32> to vector<8x8xf32>
    %cst_109 = arith.constant dense<0.000000e+00> : vector<8x8xf32>
    %241 = tpu.matmul %239, %240, %cst_109 {dimension_numbers = #tpu.dot_dimension_numbers<[1], [1], [0], [0], [0, 0, 1, 0], [], []>} : vector<8x8xf32>, vector<8x8xf32>, vector<8x8xf32> -> vector<8x8xf32>
    %cst_110 = arith.constant 0.353553385 : f32
    %242 = vector.broadcast %cst_110 : f32 to vector<8x8xf32>
    %243 = arith.mulf %241, %242 : vector<8x8xf32>
    %cst_111 = arith.constant dense<0xFF800000> : vector<8xf32>
    %244 = vector.multi_reduction <maximumf>, %243, %cst_111 [1] : vector<8x8xf32> to vector<8xf32>
    %245 = vector.shape_cast %244 : vector<8xf32> to vector<8x1xf32>
    %246 = vector.broadcast %245 : vector<8x1xf32> to vector<8x8xf32>
    %247 = arith.subf %243, %246 : vector<8x8xf32>
    %248 = math.exp %247 : vector<8x8xf32>
    %cst_112 = arith.constant dense<0.000000e+00> : vector<8xf32>
    %249 = vector.multi_reduction <add>, %248, %cst_112 [1] : vector<8x8xf32> to vector<8xf32>
    %250 = vector.shape_cast %249 : vector<8xf32> to vector<8x1xf32>
    %251 = tpu.reciprocal %250 {approx = true} : vector<8x1xf32> -> vector<8x1xf32>
    %252 = vector.broadcast %251 : vector<8x1xf32> to vector<8x8xf32>
    %253 = arith.mulf %248, %252 : vector<8x8xf32>
    %254 = vector.extract_strided_slice %183 {offsets = [0, 24], sizes = [8, 8], strides = [1, 1]} : vector<8x32xf32> to vector<8x8xf32>
    %cst_113 = arith.constant dense<0.000000e+00> : vector<8x8xf32>
    %255 = tpu.matmul %253, %254, %cst_113 {dimension_numbers = #tpu.dot_dimension_numbers<[1], [0], [0], [1], [0, 0, 1, 1], [], []>} : vector<8x8xf32>, vector<8x8xf32>, vector<8x8xf32> -> vector<8x8xf32>
    %256 = tpu.concatenate %204, %221, %238, %255 in 1 : vector<8x8xf32>, vector<8x8xf32>, vector<8x8xf32>, vector<8x8xf32> -> vector<8x32xf32>
    %cst_114 = arith.constant dense<0.000000e+00> : vector<8x32xf32>
    %257 = tpu.matmul %256, %185, %cst_114 {dimension_numbers = #tpu.dot_dimension_numbers<[1], [0], [0], [1], [0, 0, 1, 1], [], []>} : vector<8x32xf32>, vector<32x32xf32>, vector<8x32xf32> -> vector<8x32xf32>
    %258 = vector.broadcast %187 : vector<1x32xf32> to vector<8x32xf32>
    %259 = arith.addf %257, %258 : vector<8x32xf32>
    %260 = arith.addf %171, %259 : vector<8x32xf32>
    %261 = vector.extract_strided_slice %173 {offsets = [0, 0], sizes = [1, 32], strides = [1, 1]} : vector<4x32xf32> to vector<1x32xf32>
    %262 = vector.extract_strided_slice %173 {offsets = [1, 0], sizes = [1, 32], strides = [1, 1]} : vector<4x32xf32> to vector<1x32xf32>
    %cst_115 = arith.constant dense<0.000000e+00> : vector<8xf32>
    %263 = vector.multi_reduction <add>, %260, %cst_115 [1] : vector<8x32xf32> to vector<8xf32>
    %264 = vector.shape_cast %263 : vector<8xf32> to vector<8x1xf32>
    %cst_116 = arith.constant 3.200000e+01 : f32
    %265 = vector.broadcast %cst_116 : f32 to vector<8x1xf32>
    %266 = arith.divf %264, %265 : vector<8x1xf32>
    %267 = arith.mulf %260, %260 : vector<8x32xf32>
    %cst_117 = arith.constant dense<0.000000e+00> : vector<8xf32>
    %268 = vector.multi_reduction <add>, %267, %cst_117 [1] : vector<8x32xf32> to vector<8xf32>
    %269 = vector.shape_cast %268 : vector<8xf32> to vector<8x1xf32>
    %cst_118 = arith.constant 3.200000e+01 : f32
    %270 = vector.broadcast %cst_118 : f32 to vector<8x1xf32>
    %271 = arith.divf %269, %270 : vector<8x1xf32>
    %272 = arith.mulf %266, %266 : vector<8x1xf32>
    %273 = arith.subf %271, %272 : vector<8x1xf32>
    %274 = vector.broadcast %266 : vector<8x1xf32> to vector<8x32xf32>
    %275 = arith.subf %260, %274 : vector<8x32xf32>
    %cst_119 = arith.constant 9.99999974E-6 : f32
    %276 = vector.broadcast %cst_119 : f32 to vector<8x1xf32>
    %277 = arith.addf %273, %276 : vector<8x1xf32>
    %278 = math.rsqrt %277 : vector<8x1xf32>
    %279 = vector.broadcast %278 : vector<8x1xf32> to vector<8x32xf32>
    %280 = arith.mulf %275, %279 : vector<8x32xf32>
    %281 = vector.broadcast %261 : vector<1x32xf32> to vector<8x32xf32>
    %282 = arith.mulf %280, %281 : vector<8x32xf32>
    %283 = vector.broadcast %262 : vector<1x32xf32> to vector<8x32xf32>
    %284 = arith.addf %282, %283 : vector<8x32xf32>
    %c1_120 = arith.constant 1 : index
    %c0_121 = arith.constant 0 : index
    %c0_122 = arith.constant 0 : index
    %285 = vector.load %arg13[%c1_120, %c0_121, %c0_122] : memref<2x32x64xf32, #tpu.memory_space<vmem>>, vector<1x32x64xf32>
    %286 = vector.shape_cast %285 : vector<1x32x64xf32> to vector<32x64xf32>
    %cst_123 = arith.constant dense<0.000000e+00> : vector<8x64xf32>
    %287 = tpu.matmul %284, %286, %cst_123 {dimension_numbers = #tpu.dot_dimension_numbers<[1], [0], [0], [1], [0, 0, 1, 1], [], []>} : vector<8x32xf32>, vector<32x64xf32>, vector<8x64xf32> -> vector<8x64xf32>
    %c1_124 = arith.constant 1 : index
    %c0_125 = arith.constant 0 : index
    %c0_126 = arith.constant 0 : index
    %288 = vector.load %arg14[%c1_124, %c0_125, %c0_126] : memref<2x1x64xf32, #tpu.memory_space<vmem>>, vector<1x1x64xf32>
    %289 = vector.shape_cast %288 : vector<1x1x64xf32> to vector<1x64xf32>
    %290 = vector.broadcast %289 : vector<1x64xf32> to vector<8x64xf32>
    %291 = arith.addf %287, %290 : vector<8x64xf32>
    %cst_127 = arith.constant 0.000000e+00 : f32
    %292 = vector.broadcast %cst_127 : f32 to vector<8x64xf32>
    %293 = arith.maximumf %291, %292 : vector<8x64xf32>
    %c1_128 = arith.constant 1 : index
    %c0_129 = arith.constant 0 : index
    %c0_130 = arith.constant 0 : index
    %294 = vector.load %arg15[%c1_128, %c0_129, %c0_130] : memref<2x64x32xf32, #tpu.memory_space<vmem>>, vector<1x64x32xf32>
    %295 = vector.shape_cast %294 : vector<1x64x32xf32> to vector<64x32xf32>
    %cst_131 = arith.constant dense<0.000000e+00> : vector<8x32xf32>
    %296 = tpu.matmul %293, %295, %cst_131 {dimension_numbers = #tpu.dot_dimension_numbers<[1], [0], [0], [1], [0, 0, 1, 1], [], []>} : vector<8x64xf32>, vector<64x32xf32>, vector<8x32xf32> -> vector<8x32xf32>
    %c1_132 = arith.constant 1 : index
    %c0_133 = arith.constant 0 : index
    %c0_134 = arith.constant 0 : index
    %297 = vector.load %arg16[%c1_132, %c0_133, %c0_134] : memref<2x1x32xf32, #tpu.memory_space<vmem>>, vector<1x1x32xf32>
    %298 = vector.shape_cast %297 : vector<1x1x32xf32> to vector<1x32xf32>
    %299 = vector.broadcast %298 : vector<1x32xf32> to vector<8x32xf32>
    %300 = arith.addf %296, %299 : vector<8x32xf32>
    %301 = arith.addf %284, %300 : vector<8x32xf32>
    %302 = vector.extract_strided_slice %173 {offsets = [2, 0], sizes = [1, 32], strides = [1, 1]} : vector<4x32xf32> to vector<1x32xf32>
    %303 = vector.extract_strided_slice %173 {offsets = [3, 0], sizes = [1, 32], strides = [1, 1]} : vector<4x32xf32> to vector<1x32xf32>
    %cst_135 = arith.constant dense<0.000000e+00> : vector<8xf32>
    %304 = vector.multi_reduction <add>, %301, %cst_135 [1] : vector<8x32xf32> to vector<8xf32>
    %305 = vector.shape_cast %304 : vector<8xf32> to vector<8x1xf32>
    %cst_136 = arith.constant 3.200000e+01 : f32
    %306 = vector.broadcast %cst_136 : f32 to vector<8x1xf32>
    %307 = arith.divf %305, %306 : vector<8x1xf32>
    %308 = arith.mulf %301, %301 : vector<8x32xf32>
    %cst_137 = arith.constant dense<0.000000e+00> : vector<8xf32>
    %309 = vector.multi_reduction <add>, %308, %cst_137 [1] : vector<8x32xf32> to vector<8xf32>
    %310 = vector.shape_cast %309 : vector<8xf32> to vector<8x1xf32>
    %cst_138 = arith.constant 3.200000e+01 : f32
    %311 = vector.broadcast %cst_138 : f32 to vector<8x1xf32>
    %312 = arith.divf %310, %311 : vector<8x1xf32>
    %313 = arith.mulf %307, %307 : vector<8x1xf32>
    %314 = arith.subf %312, %313 : vector<8x1xf32>
    %315 = vector.broadcast %307 : vector<8x1xf32> to vector<8x32xf32>
    %316 = arith.subf %301, %315 : vector<8x32xf32>
    %cst_139 = arith.constant 9.99999974E-6 : f32
    %317 = vector.broadcast %cst_139 : f32 to vector<8x1xf32>
    %318 = arith.addf %314, %317 : vector<8x1xf32>
    %319 = math.rsqrt %318 : vector<8x1xf32>
    %320 = vector.broadcast %319 : vector<8x1xf32> to vector<8x32xf32>
    %321 = arith.mulf %316, %320 : vector<8x32xf32>
    %322 = vector.broadcast %302 : vector<1x32xf32> to vector<8x32xf32>
    %323 = arith.mulf %321, %322 : vector<8x32xf32>
    %324 = vector.broadcast %303 : vector<1x32xf32> to vector<8x32xf32>
    %325 = arith.addf %323, %324 : vector<8x32xf32>
    %c0_140 = arith.constant 0 : index
    %c0_141 = arith.constant 0 : index
    %326 = vector.load %arg8[%c0_140, %c0_141] : memref<8x8xf32, #tpu.memory_space<vmem>>, vector<8x8xf32>
    %c0_142 = arith.constant 0 : index
    %c0_143 = arith.constant 0 : index
    %c0_144 = arith.constant 0 : index
    %327 = vector.load %arg32[%c0_142, %c0_143, %c0_144] : memref<2x6x32xf32, #tpu.memory_space<vmem>>, vector<1x6x32xf32>
    %328 = vector.shape_cast %327 : vector<1x6x32xf32> to vector<6x32xf32>
    %c0_145 = arith.constant 0 : index
    %c0_146 = arith.constant 0 : index
    %c0_147 = arith.constant 0 : index
    %329 = vector.load %arg18[%c0_145, %c0_146, %c0_147] : memref<2x32x96xf32, #tpu.memory_space<vmem>>, vector<1x32x96xf32>
    %330 = vector.shape_cast %329 : vector<1x32x96xf32> to vector<32x96xf32>
    %cst_148 = arith.constant dense<0.000000e+00> : vector<8x96xf32>
    %331 = tpu.matmul %17, %330, %cst_148 {dimension_numbers = #tpu.dot_dimension_numbers<[1], [0], [0], [1], [0, 0, 1, 1], [], []>} : vector<8x32xf32>, vector<32x96xf32>, vector<8x96xf32> -> vector<8x96xf32>
    %c0_149 = arith.constant 0 : index
    %c0_150 = arith.constant 0 : index
    %c0_151 = arith.constant 0 : index
    %332 = vector.load %arg19[%c0_149, %c0_150, %c0_151] : memref<2x1x96xf32, #tpu.memory_space<vmem>>, vector<1x1x96xf32>
    %333 = vector.shape_cast %332 : vector<1x1x96xf32> to vector<1x96xf32>
    %334 = vector.broadcast %333 : vector<1x96xf32> to vector<8x96xf32>
    %335 = arith.addf %331, %334 : vector<8x96xf32>
    %336 = vector.extract_strided_slice %335 {offsets = [0, 0], sizes = [8, 32], strides = [1, 1]} : vector<8x96xf32> to vector<8x32xf32>
    %337 = vector.extract_strided_slice %335 {offsets = [0, 32], sizes = [8, 32], strides = [1, 1]} : vector<8x96xf32> to vector<8x32xf32>
    %338 = vector.extract_strided_slice %335 {offsets = [0, 64], sizes = [8, 32], strides = [1, 1]} : vector<8x96xf32> to vector<8x32xf32>
    %c0_152 = arith.constant 0 : index
    %c0_153 = arith.constant 0 : index
    %c0_154 = arith.constant 0 : index
    %339 = vector.load %arg20[%c0_152, %c0_153, %c0_154] : memref<2x32x32xf32, #tpu.memory_space<vmem>>, vector<1x32x32xf32>
    %340 = vector.shape_cast %339 : vector<1x32x32xf32> to vector<32x32xf32>
    %c0_155 = arith.constant 0 : index
    %c0_156 = arith.constant 0 : index
    %c0_157 = arith.constant 0 : index
    %341 = vector.load %arg21[%c0_155, %c0_156, %c0_157] : memref<2x1x32xf32, #tpu.memory_space<vmem>>, vector<1x1x32xf32>
    %342 = vector.shape_cast %341 : vector<1x1x32xf32> to vector<1x32xf32>
    %343 = vector.extract_strided_slice %336 {offsets = [0, 0], sizes = [8, 8], strides = [1, 1]} : vector<8x32xf32> to vector<8x8xf32>
    %344 = vector.extract_strided_slice %337 {offsets = [0, 0], sizes = [8, 8], strides = [1, 1]} : vector<8x32xf32> to vector<8x8xf32>
    %cst_158 = arith.constant dense<0.000000e+00> : vector<8x8xf32>
    %345 = tpu.matmul %343, %344, %cst_158 {dimension_numbers = #tpu.dot_dimension_numbers<[1], [1], [0], [0], [0, 0, 1, 0], [], []>} : vector<8x8xf32>, vector<8x8xf32>, vector<8x8xf32> -> vector<8x8xf32>
    %cst_159 = arith.constant 0.353553385 : f32
    %346 = vector.broadcast %cst_159 : f32 to vector<8x8xf32>
    %347 = arith.mulf %345, %346 : vector<8x8xf32>
    %348 = arith.addf %347, %326 : vector<8x8xf32>
    %cst_160 = arith.constant dense<0xFF800000> : vector<8xf32>
    %349 = vector.multi_reduction <maximumf>, %348, %cst_160 [1] : vector<8x8xf32> to vector<8xf32>
    %350 = vector.shape_cast %349 : vector<8xf32> to vector<8x1xf32>
    %351 = vector.broadcast %350 : vector<8x1xf32> to vector<8x8xf32>
    %352 = arith.subf %348, %351 : vector<8x8xf32>
    %353 = math.exp %352 : vector<8x8xf32>
    %cst_161 = arith.constant dense<0.000000e+00> : vector<8xf32>
    %354 = vector.multi_reduction <add>, %353, %cst_161 [1] : vector<8x8xf32> to vector<8xf32>
    %355 = vector.shape_cast %354 : vector<8xf32> to vector<8x1xf32>
    %356 = tpu.reciprocal %355 {approx = true} : vector<8x1xf32> -> vector<8x1xf32>
    %357 = vector.broadcast %356 : vector<8x1xf32> to vector<8x8xf32>
    %358 = arith.mulf %353, %357 : vector<8x8xf32>
    %359 = vector.extract_strided_slice %338 {offsets = [0, 0], sizes = [8, 8], strides = [1, 1]} : vector<8x32xf32> to vector<8x8xf32>
    %cst_162 = arith.constant dense<0.000000e+00> : vector<8x8xf32>
    %360 = tpu.matmul %358, %359, %cst_162 {dimension_numbers = #tpu.dot_dimension_numbers<[1], [0], [0], [1], [0, 0, 1, 1], [], []>} : vector<8x8xf32>, vector<8x8xf32>, vector<8x8xf32> -> vector<8x8xf32>
    %361 = vector.extract_strided_slice %336 {offsets = [0, 8], sizes = [8, 8], strides = [1, 1]} : vector<8x32xf32> to vector<8x8xf32>
    %362 = vector.extract_strided_slice %337 {offsets = [0, 8], sizes = [8, 8], strides = [1, 1]} : vector<8x32xf32> to vector<8x8xf32>
    %cst_163 = arith.constant dense<0.000000e+00> : vector<8x8xf32>
    %363 = tpu.matmul %361, %362, %cst_163 {dimension_numbers = #tpu.dot_dimension_numbers<[1], [1], [0], [0], [0, 0, 1, 0], [], []>} : vector<8x8xf32>, vector<8x8xf32>, vector<8x8xf32> -> vector<8x8xf32>
    %cst_164 = arith.constant 0.353553385 : f32
    %364 = vector.broadcast %cst_164 : f32 to vector<8x8xf32>
    %365 = arith.mulf %363, %364 : vector<8x8xf32>
    %366 = arith.addf %365, %326 : vector<8x8xf32>
    %cst_165 = arith.constant dense<0xFF800000> : vector<8xf32>
    %367 = vector.multi_reduction <maximumf>, %366, %cst_165 [1] : vector<8x8xf32> to vector<8xf32>
    %368 = vector.shape_cast %367 : vector<8xf32> to vector<8x1xf32>
    %369 = vector.broadcast %368 : vector<8x1xf32> to vector<8x8xf32>
    %370 = arith.subf %366, %369 : vector<8x8xf32>
    %371 = math.exp %370 : vector<8x8xf32>
    %cst_166 = arith.constant dense<0.000000e+00> : vector<8xf32>
    %372 = vector.multi_reduction <add>, %371, %cst_166 [1] : vector<8x8xf32> to vector<8xf32>
    %373 = vector.shape_cast %372 : vector<8xf32> to vector<8x1xf32>
    %374 = tpu.reciprocal %373 {approx = true} : vector<8x1xf32> -> vector<8x1xf32>
    %375 = vector.broadcast %374 : vector<8x1xf32> to vector<8x8xf32>
    %376 = arith.mulf %371, %375 : vector<8x8xf32>
    %377 = vector.extract_strided_slice %338 {offsets = [0, 8], sizes = [8, 8], strides = [1, 1]} : vector<8x32xf32> to vector<8x8xf32>
    %cst_167 = arith.constant dense<0.000000e+00> : vector<8x8xf32>
    %378 = tpu.matmul %376, %377, %cst_167 {dimension_numbers = #tpu.dot_dimension_numbers<[1], [0], [0], [1], [0, 0, 1, 1], [], []>} : vector<8x8xf32>, vector<8x8xf32>, vector<8x8xf32> -> vector<8x8xf32>
    %379 = vector.extract_strided_slice %336 {offsets = [0, 16], sizes = [8, 8], strides = [1, 1]} : vector<8x32xf32> to vector<8x8xf32>
    %380 = vector.extract_strided_slice %337 {offsets = [0, 16], sizes = [8, 8], strides = [1, 1]} : vector<8x32xf32> to vector<8x8xf32>
    %cst_168 = arith.constant dense<0.000000e+00> : vector<8x8xf32>
    %381 = tpu.matmul %379, %380, %cst_168 {dimension_numbers = #tpu.dot_dimension_numbers<[1], [1], [0], [0], [0, 0, 1, 0], [], []>} : vector<8x8xf32>, vector<8x8xf32>, vector<8x8xf32> -> vector<8x8xf32>
    %cst_169 = arith.constant 0.353553385 : f32
    %382 = vector.broadcast %cst_169 : f32 to vector<8x8xf32>
    %383 = arith.mulf %381, %382 : vector<8x8xf32>
    %384 = arith.addf %383, %326 : vector<8x8xf32>
    %cst_170 = arith.constant dense<0xFF800000> : vector<8xf32>
    %385 = vector.multi_reduction <maximumf>, %384, %cst_170 [1] : vector<8x8xf32> to vector<8xf32>
    %386 = vector.shape_cast %385 : vector<8xf32> to vector<8x1xf32>
    %387 = vector.broadcast %386 : vector<8x1xf32> to vector<8x8xf32>
    %388 = arith.subf %384, %387 : vector<8x8xf32>
    %389 = math.exp %388 : vector<8x8xf32>
    %cst_171 = arith.constant dense<0.000000e+00> : vector<8xf32>
    %390 = vector.multi_reduction <add>, %389, %cst_171 [1] : vector<8x8xf32> to vector<8xf32>
    %391 = vector.shape_cast %390 : vector<8xf32> to vector<8x1xf32>
    %392 = tpu.reciprocal %391 {approx = true} : vector<8x1xf32> -> vector<8x1xf32>
    %393 = vector.broadcast %392 : vector<8x1xf32> to vector<8x8xf32>
    %394 = arith.mulf %389, %393 : vector<8x8xf32>
    %395 = vector.extract_strided_slice %338 {offsets = [0, 16], sizes = [8, 8], strides = [1, 1]} : vector<8x32xf32> to vector<8x8xf32>
    %cst_172 = arith.constant dense<0.000000e+00> : vector<8x8xf32>
    %396 = tpu.matmul %394, %395, %cst_172 {dimension_numbers = #tpu.dot_dimension_numbers<[1], [0], [0], [1], [0, 0, 1, 1], [], []>} : vector<8x8xf32>, vector<8x8xf32>, vector<8x8xf32> -> vector<8x8xf32>
    %397 = vector.extract_strided_slice %336 {offsets = [0, 24], sizes = [8, 8], strides = [1, 1]} : vector<8x32xf32> to vector<8x8xf32>
    %398 = vector.extract_strided_slice %337 {offsets = [0, 24], sizes = [8, 8], strides = [1, 1]} : vector<8x32xf32> to vector<8x8xf32>
    %cst_173 = arith.constant dense<0.000000e+00> : vector<8x8xf32>
    %399 = tpu.matmul %397, %398, %cst_173 {dimension_numbers = #tpu.dot_dimension_numbers<[1], [1], [0], [0], [0, 0, 1, 0], [], []>} : vector<8x8xf32>, vector<8x8xf32>, vector<8x8xf32> -> vector<8x8xf32>
    %cst_174 = arith.constant 0.353553385 : f32
    %400 = vector.broadcast %cst_174 : f32 to vector<8x8xf32>
    %401 = arith.mulf %399, %400 : vector<8x8xf32>
    %402 = arith.addf %401, %326 : vector<8x8xf32>
    %cst_175 = arith.constant dense<0xFF800000> : vector<8xf32>
    %403 = vector.multi_reduction <maximumf>, %402, %cst_175 [1] : vector<8x8xf32> to vector<8xf32>
    %404 = vector.shape_cast %403 : vector<8xf32> to vector<8x1xf32>
    %405 = vector.broadcast %404 : vector<8x1xf32> to vector<8x8xf32>
    %406 = arith.subf %402, %405 : vector<8x8xf32>
    %407 = math.exp %406 : vector<8x8xf32>
    %cst_176 = arith.constant dense<0.000000e+00> : vector<8xf32>
    %408 = vector.multi_reduction <add>, %407, %cst_176 [1] : vector<8x8xf32> to vector<8xf32>
    %409 = vector.shape_cast %408 : vector<8xf32> to vector<8x1xf32>
    %410 = tpu.reciprocal %409 {approx = true} : vector<8x1xf32> -> vector<8x1xf32>
    %411 = vector.broadcast %410 : vector<8x1xf32> to vector<8x8xf32>
    %412 = arith.mulf %407, %411 : vector<8x8xf32>
    %413 = vector.extract_strided_slice %338 {offsets = [0, 24], sizes = [8, 8], strides = [1, 1]} : vector<8x32xf32> to vector<8x8xf32>
    %cst_177 = arith.constant dense<0.000000e+00> : vector<8x8xf32>
    %414 = tpu.matmul %412, %413, %cst_177 {dimension_numbers = #tpu.dot_dimension_numbers<[1], [0], [0], [1], [0, 0, 1, 1], [], []>} : vector<8x8xf32>, vector<8x8xf32>, vector<8x8xf32> -> vector<8x8xf32>
    %415 = tpu.concatenate %360, %378, %396, %414 in 1 : vector<8x8xf32>, vector<8x8xf32>, vector<8x8xf32>, vector<8x8xf32> -> vector<8x32xf32>
    %cst_178 = arith.constant dense<0.000000e+00> : vector<8x32xf32>
    %416 = tpu.matmul %415, %340, %cst_178 {dimension_numbers = #tpu.dot_dimension_numbers<[1], [0], [0], [1], [0, 0, 1, 1], [], []>} : vector<8x32xf32>, vector<32x32xf32>, vector<8x32xf32> -> vector<8x32xf32>
    %417 = vector.broadcast %342 : vector<1x32xf32> to vector<8x32xf32>
    %418 = arith.addf %416, %417 : vector<8x32xf32>
    %419 = arith.addf %17, %418 : vector<8x32xf32>
    %420 = vector.extract_strided_slice %328 {offsets = [0, 0], sizes = [1, 32], strides = [1, 1]} : vector<6x32xf32> to vector<1x32xf32>
    %421 = vector.extract_strided_slice %328 {offsets = [1, 0], sizes = [1, 32], strides = [1, 1]} : vector<6x32xf32> to vector<1x32xf32>
    %cst_179 = arith.constant dense<0.000000e+00> : vector<8xf32>
    %422 = vector.multi_reduction <add>, %419, %cst_179 [1] : vector<8x32xf32> to vector<8xf32>
    %423 = vector.shape_cast %422 : vector<8xf32> to vector<8x1xf32>
    %cst_180 = arith.constant 3.200000e+01 : f32
    %424 = vector.broadcast %cst_180 : f32 to vector<8x1xf32>
    %425 = arith.divf %423, %424 : vector<8x1xf32>
    %426 = arith.mulf %419, %419 : vector<8x32xf32>
    %cst_181 = arith.constant dense<0.000000e+00> : vector<8xf32>
    %427 = vector.multi_reduction <add>, %426, %cst_181 [1] : vector<8x32xf32> to vector<8xf32>
    %428 = vector.shape_cast %427 : vector<8xf32> to vector<8x1xf32>
    %cst_182 = arith.constant 3.200000e+01 : f32
    %429 = vector.broadcast %cst_182 : f32 to vector<8x1xf32>
    %430 = arith.divf %428, %429 : vector<8x1xf32>
    %431 = arith.mulf %425, %425 : vector<8x1xf32>
    %432 = arith.subf %430, %431 : vector<8x1xf32>
    %433 = vector.broadcast %425 : vector<8x1xf32> to vector<8x32xf32>
    %434 = arith.subf %419, %433 : vector<8x32xf32>
    %cst_183 = arith.constant 9.99999974E-6 : f32
    %435 = vector.broadcast %cst_183 : f32 to vector<8x1xf32>
    %436 = arith.addf %432, %435 : vector<8x1xf32>
    %437 = math.rsqrt %436 : vector<8x1xf32>
    %438 = vector.broadcast %437 : vector<8x1xf32> to vector<8x32xf32>
    %439 = arith.mulf %434, %438 : vector<8x32xf32>
    %440 = vector.broadcast %420 : vector<1x32xf32> to vector<8x32xf32>
    %441 = arith.mulf %439, %440 : vector<8x32xf32>
    %442 = vector.broadcast %421 : vector<1x32xf32> to vector<8x32xf32>
    %443 = arith.addf %441, %442 : vector<8x32xf32>
    %c0_184 = arith.constant 0 : index
    %c0_185 = arith.constant 0 : index
    %c0_186 = arith.constant 0 : index
    %444 = vector.load %arg22[%c0_184, %c0_185, %c0_186] : memref<2x32x32xf32, #tpu.memory_space<vmem>>, vector<1x32x32xf32>
    %445 = vector.shape_cast %444 : vector<1x32x32xf32> to vector<32x32xf32>
    %cst_187 = arith.constant dense<0.000000e+00> : vector<8x32xf32>
    %446 = tpu.matmul %443, %445, %cst_187 {dimension_numbers = #tpu.dot_dimension_numbers<[1], [0], [0], [1], [0, 0, 1, 1], [], []>} : vector<8x32xf32>, vector<32x32xf32>, vector<8x32xf32> -> vector<8x32xf32>
    %c0_188 = arith.constant 0 : index
    %c0_189 = arith.constant 0 : index
    %c0_190 = arith.constant 0 : index
    %447 = vector.load %arg23[%c0_188, %c0_189, %c0_190] : memref<2x1x32xf32, #tpu.memory_space<vmem>>, vector<1x1x32xf32>
    %448 = vector.shape_cast %447 : vector<1x1x32xf32> to vector<1x32xf32>
    %449 = vector.broadcast %448 : vector<1x32xf32> to vector<8x32xf32>
    %450 = arith.addf %446, %449 : vector<8x32xf32>
    %c0_191 = arith.constant 0 : index
    %c0_192 = arith.constant 0 : index
    %c0_193 = arith.constant 0 : index
    %451 = vector.load %arg24[%c0_191, %c0_192, %c0_193] : memref<2x32x64xf32, #tpu.memory_space<vmem>>, vector<1x32x64xf32>
    %452 = vector.shape_cast %451 : vector<1x32x64xf32> to vector<32x64xf32>
    %cst_194 = arith.constant dense<0.000000e+00> : vector<8x64xf32>
    %453 = tpu.matmul %325, %452, %cst_194 {dimension_numbers = #tpu.dot_dimension_numbers<[1], [0], [0], [1], [0, 0, 1, 1], [], []>} : vector<8x32xf32>, vector<32x64xf32>, vector<8x64xf32> -> vector<8x64xf32>
    %c0_195 = arith.constant 0 : index
    %c0_196 = arith.constant 0 : index
    %c0_197 = arith.constant 0 : index
    %454 = vector.load %arg25[%c0_195, %c0_196, %c0_197] : memref<2x1x64xf32, #tpu.memory_space<vmem>>, vector<1x1x64xf32>
    %455 = vector.shape_cast %454 : vector<1x1x64xf32> to vector<1x64xf32>
    %456 = vector.broadcast %455 : vector<1x64xf32> to vector<8x64xf32>
    %457 = arith.addf %453, %456 : vector<8x64xf32>
    %458 = vector.extract_strided_slice %457 {offsets = [0, 0], sizes = [8, 32], strides = [1, 1]} : vector<8x64xf32> to vector<8x32xf32>
    %459 = vector.extract_strided_slice %457 {offsets = [0, 32], sizes = [8, 32], strides = [1, 1]} : vector<8x64xf32> to vector<8x32xf32>
    %c0_198 = arith.constant 0 : index
    %c0_199 = arith.constant 0 : index
    %c0_200 = arith.constant 0 : index
    %460 = vector.load %arg26[%c0_198, %c0_199, %c0_200] : memref<2x32x32xf32, #tpu.memory_space<vmem>>, vector<1x32x32xf32>
    %461 = vector.shape_cast %460 : vector<1x32x32xf32> to vector<32x32xf32>
    %c0_201 = arith.constant 0 : index
    %c0_202 = arith.constant 0 : index
    %c0_203 = arith.constant 0 : index
    %462 = vector.load %arg27[%c0_201, %c0_202, %c0_203] : memref<2x1x32xf32, #tpu.memory_space<vmem>>, vector<1x1x32xf32>
    %463 = vector.shape_cast %462 : vector<1x1x32xf32> to vector<1x32xf32>
    %464 = vector.extract_strided_slice %450 {offsets = [0, 0], sizes = [8, 8], strides = [1, 1]} : vector<8x32xf32> to vector<8x8xf32>
    %465 = vector.extract_strided_slice %458 {offsets = [0, 0], sizes = [8, 8], strides = [1, 1]} : vector<8x32xf32> to vector<8x8xf32>
    %cst_204 = arith.constant dense<0.000000e+00> : vector<8x8xf32>
    %466 = tpu.matmul %464, %465, %cst_204 {dimension_numbers = #tpu.dot_dimension_numbers<[1], [1], [0], [0], [0, 0, 1, 0], [], []>} : vector<8x8xf32>, vector<8x8xf32>, vector<8x8xf32> -> vector<8x8xf32>
    %cst_205 = arith.constant 0.353553385 : f32
    %467 = vector.broadcast %cst_205 : f32 to vector<8x8xf32>
    %468 = arith.mulf %466, %467 : vector<8x8xf32>
    %cst_206 = arith.constant dense<0xFF800000> : vector<8xf32>
    %469 = vector.multi_reduction <maximumf>, %468, %cst_206 [1] : vector<8x8xf32> to vector<8xf32>
    %470 = vector.shape_cast %469 : vector<8xf32> to vector<8x1xf32>
    %471 = vector.broadcast %470 : vector<8x1xf32> to vector<8x8xf32>
    %472 = arith.subf %468, %471 : vector<8x8xf32>
    %473 = math.exp %472 : vector<8x8xf32>
    %cst_207 = arith.constant dense<0.000000e+00> : vector<8xf32>
    %474 = vector.multi_reduction <add>, %473, %cst_207 [1] : vector<8x8xf32> to vector<8xf32>
    %475 = vector.shape_cast %474 : vector<8xf32> to vector<8x1xf32>
    %476 = tpu.reciprocal %475 {approx = true} : vector<8x1xf32> -> vector<8x1xf32>
    %477 = vector.broadcast %476 : vector<8x1xf32> to vector<8x8xf32>
    %478 = arith.mulf %473, %477 : vector<8x8xf32>
    %479 = vector.extract_strided_slice %459 {offsets = [0, 0], sizes = [8, 8], strides = [1, 1]} : vector<8x32xf32> to vector<8x8xf32>
    %cst_208 = arith.constant dense<0.000000e+00> : vector<8x8xf32>
    %480 = tpu.matmul %478, %479, %cst_208 {dimension_numbers = #tpu.dot_dimension_numbers<[1], [0], [0], [1], [0, 0, 1, 1], [], []>} : vector<8x8xf32>, vector<8x8xf32>, vector<8x8xf32> -> vector<8x8xf32>
    %481 = vector.extract_strided_slice %450 {offsets = [0, 8], sizes = [8, 8], strides = [1, 1]} : vector<8x32xf32> to vector<8x8xf32>
    %482 = vector.extract_strided_slice %458 {offsets = [0, 8], sizes = [8, 8], strides = [1, 1]} : vector<8x32xf32> to vector<8x8xf32>
    %cst_209 = arith.constant dense<0.000000e+00> : vector<8x8xf32>
    %483 = tpu.matmul %481, %482, %cst_209 {dimension_numbers = #tpu.dot_dimension_numbers<[1], [1], [0], [0], [0, 0, 1, 0], [], []>} : vector<8x8xf32>, vector<8x8xf32>, vector<8x8xf32> -> vector<8x8xf32>
    %cst_210 = arith.constant 0.353553385 : f32
    %484 = vector.broadcast %cst_210 : f32 to vector<8x8xf32>
    %485 = arith.mulf %483, %484 : vector<8x8xf32>
    %cst_211 = arith.constant dense<0xFF800000> : vector<8xf32>
    %486 = vector.multi_reduction <maximumf>, %485, %cst_211 [1] : vector<8x8xf32> to vector<8xf32>
    %487 = vector.shape_cast %486 : vector<8xf32> to vector<8x1xf32>
    %488 = vector.broadcast %487 : vector<8x1xf32> to vector<8x8xf32>
    %489 = arith.subf %485, %488 : vector<8x8xf32>
    %490 = math.exp %489 : vector<8x8xf32>
    %cst_212 = arith.constant dense<0.000000e+00> : vector<8xf32>
    %491 = vector.multi_reduction <add>, %490, %cst_212 [1] : vector<8x8xf32> to vector<8xf32>
    %492 = vector.shape_cast %491 : vector<8xf32> to vector<8x1xf32>
    %493 = tpu.reciprocal %492 {approx = true} : vector<8x1xf32> -> vector<8x1xf32>
    %494 = vector.broadcast %493 : vector<8x1xf32> to vector<8x8xf32>
    %495 = arith.mulf %490, %494 : vector<8x8xf32>
    %496 = vector.extract_strided_slice %459 {offsets = [0, 8], sizes = [8, 8], strides = [1, 1]} : vector<8x32xf32> to vector<8x8xf32>
    %cst_213 = arith.constant dense<0.000000e+00> : vector<8x8xf32>
    %497 = tpu.matmul %495, %496, %cst_213 {dimension_numbers = #tpu.dot_dimension_numbers<[1], [0], [0], [1], [0, 0, 1, 1], [], []>} : vector<8x8xf32>, vector<8x8xf32>, vector<8x8xf32> -> vector<8x8xf32>
    %498 = vector.extract_strided_slice %450 {offsets = [0, 16], sizes = [8, 8], strides = [1, 1]} : vector<8x32xf32> to vector<8x8xf32>
    %499 = vector.extract_strided_slice %458 {offsets = [0, 16], sizes = [8, 8], strides = [1, 1]} : vector<8x32xf32> to vector<8x8xf32>
    %cst_214 = arith.constant dense<0.000000e+00> : vector<8x8xf32>
    %500 = tpu.matmul %498, %499, %cst_214 {dimension_numbers = #tpu.dot_dimension_numbers<[1], [1], [0], [0], [0, 0, 1, 0], [], []>} : vector<8x8xf32>, vector<8x8xf32>, vector<8x8xf32> -> vector<8x8xf32>
    %cst_215 = arith.constant 0.353553385 : f32
    %501 = vector.broadcast %cst_215 : f32 to vector<8x8xf32>
    %502 = arith.mulf %500, %501 : vector<8x8xf32>
    %cst_216 = arith.constant dense<0xFF800000> : vector<8xf32>
    %503 = vector.multi_reduction <maximumf>, %502, %cst_216 [1] : vector<8x8xf32> to vector<8xf32>
    %504 = vector.shape_cast %503 : vector<8xf32> to vector<8x1xf32>
    %505 = vector.broadcast %504 : vector<8x1xf32> to vector<8x8xf32>
    %506 = arith.subf %502, %505 : vector<8x8xf32>
    %507 = math.exp %506 : vector<8x8xf32>
    %cst_217 = arith.constant dense<0.000000e+00> : vector<8xf32>
    %508 = vector.multi_reduction <add>, %507, %cst_217 [1] : vector<8x8xf32> to vector<8xf32>
    %509 = vector.shape_cast %508 : vector<8xf32> to vector<8x1xf32>
    %510 = tpu.reciprocal %509 {approx = true} : vector<8x1xf32> -> vector<8x1xf32>
    %511 = vector.broadcast %510 : vector<8x1xf32> to vector<8x8xf32>
    %512 = arith.mulf %507, %511 : vector<8x8xf32>
    %513 = vector.extract_strided_slice %459 {offsets = [0, 16], sizes = [8, 8], strides = [1, 1]} : vector<8x32xf32> to vector<8x8xf32>
    %cst_218 = arith.constant dense<0.000000e+00> : vector<8x8xf32>
    %514 = tpu.matmul %512, %513, %cst_218 {dimension_numbers = #tpu.dot_dimension_numbers<[1], [0], [0], [1], [0, 0, 1, 1], [], []>} : vector<8x8xf32>, vector<8x8xf32>, vector<8x8xf32> -> vector<8x8xf32>
    %515 = vector.extract_strided_slice %450 {offsets = [0, 24], sizes = [8, 8], strides = [1, 1]} : vector<8x32xf32> to vector<8x8xf32>
    %516 = vector.extract_strided_slice %458 {offsets = [0, 24], sizes = [8, 8], strides = [1, 1]} : vector<8x32xf32> to vector<8x8xf32>
    %cst_219 = arith.constant dense<0.000000e+00> : vector<8x8xf32>
    %517 = tpu.matmul %515, %516, %cst_219 {dimension_numbers = #tpu.dot_dimension_numbers<[1], [1], [0], [0], [0, 0, 1, 0], [], []>} : vector<8x8xf32>, vector<8x8xf32>, vector<8x8xf32> -> vector<8x8xf32>
    %cst_220 = arith.constant 0.353553385 : f32
    %518 = vector.broadcast %cst_220 : f32 to vector<8x8xf32>
    %519 = arith.mulf %517, %518 : vector<8x8xf32>
    %cst_221 = arith.constant dense<0xFF800000> : vector<8xf32>
    %520 = vector.multi_reduction <maximumf>, %519, %cst_221 [1] : vector<8x8xf32> to vector<8xf32>
    %521 = vector.shape_cast %520 : vector<8xf32> to vector<8x1xf32>
    %522 = vector.broadcast %521 : vector<8x1xf32> to vector<8x8xf32>
    %523 = arith.subf %519, %522 : vector<8x8xf32>
    %524 = math.exp %523 : vector<8x8xf32>
    %cst_222 = arith.constant dense<0.000000e+00> : vector<8xf32>
    %525 = vector.multi_reduction <add>, %524, %cst_222 [1] : vector<8x8xf32> to vector<8xf32>
    %526 = vector.shape_cast %525 : vector<8xf32> to vector<8x1xf32>
    %527 = tpu.reciprocal %526 {approx = true} : vector<8x1xf32> -> vector<8x1xf32>
    %528 = vector.broadcast %527 : vector<8x1xf32> to vector<8x8xf32>
    %529 = arith.mulf %524, %528 : vector<8x8xf32>
    %530 = vector.extract_strided_slice %459 {offsets = [0, 24], sizes = [8, 8], strides = [1, 1]} : vector<8x32xf32> to vector<8x8xf32>
    %cst_223 = arith.constant dense<0.000000e+00> : vector<8x8xf32>
    %531 = tpu.matmul %529, %530, %cst_223 {dimension_numbers = #tpu.dot_dimension_numbers<[1], [0], [0], [1], [0, 0, 1, 1], [], []>} : vector<8x8xf32>, vector<8x8xf32>, vector<8x8xf32> -> vector<8x8xf32>
    %532 = tpu.concatenate %480, %497, %514, %531 in 1 : vector<8x8xf32>, vector<8x8xf32>, vector<8x8xf32>, vector<8x8xf32> -> vector<8x32xf32>
    %cst_224 = arith.constant dense<0.000000e+00> : vector<8x32xf32>
    %533 = tpu.matmul %532, %461, %cst_224 {dimension_numbers = #tpu.dot_dimension_numbers<[1], [0], [0], [1], [0, 0, 1, 1], [], []>} : vector<8x32xf32>, vector<32x32xf32>, vector<8x32xf32> -> vector<8x32xf32>
    %534 = vector.broadcast %463 : vector<1x32xf32> to vector<8x32xf32>
    %535 = arith.addf %533, %534 : vector<8x32xf32>
    %536 = arith.addf %443, %535 : vector<8x32xf32>
    %537 = vector.extract_strided_slice %328 {offsets = [2, 0], sizes = [1, 32], strides = [1, 1]} : vector<6x32xf32> to vector<1x32xf32>
    %538 = vector.extract_strided_slice %328 {offsets = [3, 0], sizes = [1, 32], strides = [1, 1]} : vector<6x32xf32> to vector<1x32xf32>
    %cst_225 = arith.constant dense<0.000000e+00> : vector<8xf32>
    %539 = vector.multi_reduction <add>, %536, %cst_225 [1] : vector<8x32xf32> to vector<8xf32>
    %540 = vector.shape_cast %539 : vector<8xf32> to vector<8x1xf32>
    %cst_226 = arith.constant 3.200000e+01 : f32
    %541 = vector.broadcast %cst_226 : f32 to vector<8x1xf32>
    %542 = arith.divf %540, %541 : vector<8x1xf32>
    %543 = arith.mulf %536, %536 : vector<8x32xf32>
    %cst_227 = arith.constant dense<0.000000e+00> : vector<8xf32>
    %544 = vector.multi_reduction <add>, %543, %cst_227 [1] : vector<8x32xf32> to vector<8xf32>
    %545 = vector.shape_cast %544 : vector<8xf32> to vector<8x1xf32>
    %cst_228 = arith.constant 3.200000e+01 : f32
    %546 = vector.broadcast %cst_228 : f32 to vector<8x1xf32>
    %547 = arith.divf %545, %546 : vector<8x1xf32>
    %548 = arith.mulf %542, %542 : vector<8x1xf32>
    %549 = arith.subf %547, %548 : vector<8x1xf32>
    %550 = vector.broadcast %542 : vector<8x1xf32> to vector<8x32xf32>
    %551 = arith.subf %536, %550 : vector<8x32xf32>
    %cst_229 = arith.constant 9.99999974E-6 : f32
    %552 = vector.broadcast %cst_229 : f32 to vector<8x1xf32>
    %553 = arith.addf %549, %552 : vector<8x1xf32>
    %554 = math.rsqrt %553 : vector<8x1xf32>
    %555 = vector.broadcast %554 : vector<8x1xf32> to vector<8x32xf32>
    %556 = arith.mulf %551, %555 : vector<8x32xf32>
    %557 = vector.broadcast %537 : vector<1x32xf32> to vector<8x32xf32>
    %558 = arith.mulf %556, %557 : vector<8x32xf32>
    %559 = vector.broadcast %538 : vector<1x32xf32> to vector<8x32xf32>
    %560 = arith.addf %558, %559 : vector<8x32xf32>
    %c0_230 = arith.constant 0 : index
    %c0_231 = arith.constant 0 : index
    %c0_232 = arith.constant 0 : index
    %561 = vector.load %arg28[%c0_230, %c0_231, %c0_232] : memref<2x32x64xf32, #tpu.memory_space<vmem>>, vector<1x32x64xf32>
    %562 = vector.shape_cast %561 : vector<1x32x64xf32> to vector<32x64xf32>
    %cst_233 = arith.constant dense<0.000000e+00> : vector<8x64xf32>
    %563 = tpu.matmul %560, %562, %cst_233 {dimension_numbers = #tpu.dot_dimension_numbers<[1], [0], [0], [1], [0, 0, 1, 1], [], []>} : vector<8x32xf32>, vector<32x64xf32>, vector<8x64xf32> -> vector<8x64xf32>
    %c0_234 = arith.constant 0 : index
    %c0_235 = arith.constant 0 : index
    %c0_236 = arith.constant 0 : index
    %564 = vector.load %arg29[%c0_234, %c0_235, %c0_236] : memref<2x1x64xf32, #tpu.memory_space<vmem>>, vector<1x1x64xf32>
    %565 = vector.shape_cast %564 : vector<1x1x64xf32> to vector<1x64xf32>
    %566 = vector.broadcast %565 : vector<1x64xf32> to vector<8x64xf32>
    %567 = arith.addf %563, %566 : vector<8x64xf32>
    %cst_237 = arith.constant 0.000000e+00 : f32
    %568 = vector.broadcast %cst_237 : f32 to vector<8x64xf32>
    %569 = arith.maximumf %567, %568 : vector<8x64xf32>
    %c0_238 = arith.constant 0 : index
    %c0_239 = arith.constant 0 : index
    %c0_240 = arith.constant 0 : index
    %570 = vector.load %arg30[%c0_238, %c0_239, %c0_240] : memref<2x64x32xf32, #tpu.memory_space<vmem>>, vector<1x64x32xf32>
    %571 = vector.shape_cast %570 : vector<1x64x32xf32> to vector<64x32xf32>
    %cst_241 = arith.constant dense<0.000000e+00> : vector<8x32xf32>
    %572 = tpu.matmul %569, %571, %cst_241 {dimension_numbers = #tpu.dot_dimension_numbers<[1], [0], [0], [1], [0, 0, 1, 1], [], []>} : vector<8x64xf32>, vector<64x32xf32>, vector<8x32xf32> -> vector<8x32xf32>
    %c0_242 = arith.constant 0 : index
    %c0_243 = arith.constant 0 : index
    %c0_244 = arith.constant 0 : index
    %573 = vector.load %arg31[%c0_242, %c0_243, %c0_244] : memref<2x1x32xf32, #tpu.memory_space<vmem>>, vector<1x1x32xf32>
    %574 = vector.shape_cast %573 : vector<1x1x32xf32> to vector<1x32xf32>
    %575 = vector.broadcast %574 : vector<1x32xf32> to vector<8x32xf32>
    %576 = arith.addf %572, %575 : vector<8x32xf32>
    %577 = arith.addf %560, %576 : vector<8x32xf32>
    %578 = vector.extract_strided_slice %328 {offsets = [4, 0], sizes = [1, 32], strides = [1, 1]} : vector<6x32xf32> to vector<1x32xf32>
    %579 = vector.extract_strided_slice %328 {offsets = [5, 0], sizes = [1, 32], strides = [1, 1]} : vector<6x32xf32> to vector<1x32xf32>
    %cst_245 = arith.constant dense<0.000000e+00> : vector<8xf32>
    %580 = vector.multi_reduction <add>, %577, %cst_245 [1] : vector<8x32xf32> to vector<8xf32>
    %581 = vector.shape_cast %580 : vector<8xf32> to vector<8x1xf32>
    %cst_246 = arith.constant 3.200000e+01 : f32
    %582 = vector.broadcast %cst_246 : f32 to vector<8x1xf32>
    %583 = arith.divf %581, %582 : vector<8x1xf32>
    %584 = arith.mulf %577, %577 : vector<8x32xf32>
    %cst_247 = arith.constant dense<0.000000e+00> : vector<8xf32>
    %585 = vector.multi_reduction <add>, %584, %cst_247 [1] : vector<8x32xf32> to vector<8xf32>
    %586 = vector.shape_cast %585 : vector<8xf32> to vector<8x1xf32>
    %cst_248 = arith.constant 3.200000e+01 : f32
    %587 = vector.broadcast %cst_248 : f32 to vector<8x1xf32>
    %588 = arith.divf %586, %587 : vector<8x1xf32>
    %589 = arith.mulf %583, %583 : vector<8x1xf32>
    %590 = arith.subf %588, %589 : vector<8x1xf32>
    %591 = vector.broadcast %583 : vector<8x1xf32> to vector<8x32xf32>
    %592 = arith.subf %577, %591 : vector<8x32xf32>
    %cst_249 = arith.constant 9.99999974E-6 : f32
    %593 = vector.broadcast %cst_249 : f32 to vector<8x1xf32>
    %594 = arith.addf %590, %593 : vector<8x1xf32>
    %595 = math.rsqrt %594 : vector<8x1xf32>
    %596 = vector.broadcast %595 : vector<8x1xf32> to vector<8x32xf32>
    %597 = arith.mulf %592, %596 : vector<8x32xf32>
    %598 = vector.broadcast %578 : vector<1x32xf32> to vector<8x32xf32>
    %599 = arith.mulf %597, %598 : vector<8x32xf32>
    %600 = vector.broadcast %579 : vector<1x32xf32> to vector<8x32xf32>
    %601 = arith.addf %599, %600 : vector<8x32xf32>
    %c1_250 = arith.constant 1 : index
    %c0_251 = arith.constant 0 : index
    %c0_252 = arith.constant 0 : index
    %602 = vector.load %arg32[%c1_250, %c0_251, %c0_252] : memref<2x6x32xf32, #tpu.memory_space<vmem>>, vector<1x6x32xf32>
    %603 = vector.shape_cast %602 : vector<1x6x32xf32> to vector<6x32xf32>
    %c1_253 = arith.constant 1 : index
    %c0_254 = arith.constant 0 : index
    %c0_255 = arith.constant 0 : index
    %604 = vector.load %arg18[%c1_253, %c0_254, %c0_255] : memref<2x32x96xf32, #tpu.memory_space<vmem>>, vector<1x32x96xf32>
    %605 = vector.shape_cast %604 : vector<1x32x96xf32> to vector<32x96xf32>
    %cst_256 = arith.constant dense<0.000000e+00> : vector<8x96xf32>
    %606 = tpu.matmul %601, %605, %cst_256 {dimension_numbers = #tpu.dot_dimension_numbers<[1], [0], [0], [1], [0, 0, 1, 1], [], []>} : vector<8x32xf32>, vector<32x96xf32>, vector<8x96xf32> -> vector<8x96xf32>
    %c1_257 = arith.constant 1 : index
    %c0_258 = arith.constant 0 : index
    %c0_259 = arith.constant 0 : index
    %607 = vector.load %arg19[%c1_257, %c0_258, %c0_259] : memref<2x1x96xf32, #tpu.memory_space<vmem>>, vector<1x1x96xf32>
    %608 = vector.shape_cast %607 : vector<1x1x96xf32> to vector<1x96xf32>
    %609 = vector.broadcast %608 : vector<1x96xf32> to vector<8x96xf32>
    %610 = arith.addf %606, %609 : vector<8x96xf32>
    %611 = vector.extract_strided_slice %610 {offsets = [0, 0], sizes = [8, 32], strides = [1, 1]} : vector<8x96xf32> to vector<8x32xf32>
    %612 = vector.extract_strided_slice %610 {offsets = [0, 32], sizes = [8, 32], strides = [1, 1]} : vector<8x96xf32> to vector<8x32xf32>
    %613 = vector.extract_strided_slice %610 {offsets = [0, 64], sizes = [8, 32], strides = [1, 1]} : vector<8x96xf32> to vector<8x32xf32>
    %c1_260 = arith.constant 1 : index
    %c0_261 = arith.constant 0 : index
    %c0_262 = arith.constant 0 : index
    %614 = vector.load %arg20[%c1_260, %c0_261, %c0_262] : memref<2x32x32xf32, #tpu.memory_space<vmem>>, vector<1x32x32xf32>
    %615 = vector.shape_cast %614 : vector<1x32x32xf32> to vector<32x32xf32>
    %c1_263 = arith.constant 1 : index
    %c0_264 = arith.constant 0 : index
    %c0_265 = arith.constant 0 : index
    %616 = vector.load %arg21[%c1_263, %c0_264, %c0_265] : memref<2x1x32xf32, #tpu.memory_space<vmem>>, vector<1x1x32xf32>
    %617 = vector.shape_cast %616 : vector<1x1x32xf32> to vector<1x32xf32>
    %618 = vector.extract_strided_slice %611 {offsets = [0, 0], sizes = [8, 8], strides = [1, 1]} : vector<8x32xf32> to vector<8x8xf32>
    %619 = vector.extract_strided_slice %612 {offsets = [0, 0], sizes = [8, 8], strides = [1, 1]} : vector<8x32xf32> to vector<8x8xf32>
    %cst_266 = arith.constant dense<0.000000e+00> : vector<8x8xf32>
    %620 = tpu.matmul %618, %619, %cst_266 {dimension_numbers = #tpu.dot_dimension_numbers<[1], [1], [0], [0], [0, 0, 1, 0], [], []>} : vector<8x8xf32>, vector<8x8xf32>, vector<8x8xf32> -> vector<8x8xf32>
    %cst_267 = arith.constant 0.353553385 : f32
    %621 = vector.broadcast %cst_267 : f32 to vector<8x8xf32>
    %622 = arith.mulf %620, %621 : vector<8x8xf32>
    %623 = arith.addf %622, %326 : vector<8x8xf32>
    %cst_268 = arith.constant dense<0xFF800000> : vector<8xf32>
    %624 = vector.multi_reduction <maximumf>, %623, %cst_268 [1] : vector<8x8xf32> to vector<8xf32>
    %625 = vector.shape_cast %624 : vector<8xf32> to vector<8x1xf32>
    %626 = vector.broadcast %625 : vector<8x1xf32> to vector<8x8xf32>
    %627 = arith.subf %623, %626 : vector<8x8xf32>
    %628 = math.exp %627 : vector<8x8xf32>
    %cst_269 = arith.constant dense<0.000000e+00> : vector<8xf32>
    %629 = vector.multi_reduction <add>, %628, %cst_269 [1] : vector<8x8xf32> to vector<8xf32>
    %630 = vector.shape_cast %629 : vector<8xf32> to vector<8x1xf32>
    %631 = tpu.reciprocal %630 {approx = true} : vector<8x1xf32> -> vector<8x1xf32>
    %632 = vector.broadcast %631 : vector<8x1xf32> to vector<8x8xf32>
    %633 = arith.mulf %628, %632 : vector<8x8xf32>
    %634 = vector.extract_strided_slice %613 {offsets = [0, 0], sizes = [8, 8], strides = [1, 1]} : vector<8x32xf32> to vector<8x8xf32>
    %cst_270 = arith.constant dense<0.000000e+00> : vector<8x8xf32>
    %635 = tpu.matmul %633, %634, %cst_270 {dimension_numbers = #tpu.dot_dimension_numbers<[1], [0], [0], [1], [0, 0, 1, 1], [], []>} : vector<8x8xf32>, vector<8x8xf32>, vector<8x8xf32> -> vector<8x8xf32>
    %636 = vector.extract_strided_slice %611 {offsets = [0, 8], sizes = [8, 8], strides = [1, 1]} : vector<8x32xf32> to vector<8x8xf32>
    %637 = vector.extract_strided_slice %612 {offsets = [0, 8], sizes = [8, 8], strides = [1, 1]} : vector<8x32xf32> to vector<8x8xf32>
    %cst_271 = arith.constant dense<0.000000e+00> : vector<8x8xf32>
    %638 = tpu.matmul %636, %637, %cst_271 {dimension_numbers = #tpu.dot_dimension_numbers<[1], [1], [0], [0], [0, 0, 1, 0], [], []>} : vector<8x8xf32>, vector<8x8xf32>, vector<8x8xf32> -> vector<8x8xf32>
    %cst_272 = arith.constant 0.353553385 : f32
    %639 = vector.broadcast %cst_272 : f32 to vector<8x8xf32>
    %640 = arith.mulf %638, %639 : vector<8x8xf32>
    %641 = arith.addf %640, %326 : vector<8x8xf32>
    %cst_273 = arith.constant dense<0xFF800000> : vector<8xf32>
    %642 = vector.multi_reduction <maximumf>, %641, %cst_273 [1] : vector<8x8xf32> to vector<8xf32>
    %643 = vector.shape_cast %642 : vector<8xf32> to vector<8x1xf32>
    %644 = vector.broadcast %643 : vector<8x1xf32> to vector<8x8xf32>
    %645 = arith.subf %641, %644 : vector<8x8xf32>
    %646 = math.exp %645 : vector<8x8xf32>
    %cst_274 = arith.constant dense<0.000000e+00> : vector<8xf32>
    %647 = vector.multi_reduction <add>, %646, %cst_274 [1] : vector<8x8xf32> to vector<8xf32>
    %648 = vector.shape_cast %647 : vector<8xf32> to vector<8x1xf32>
    %649 = tpu.reciprocal %648 {approx = true} : vector<8x1xf32> -> vector<8x1xf32>
    %650 = vector.broadcast %649 : vector<8x1xf32> to vector<8x8xf32>
    %651 = arith.mulf %646, %650 : vector<8x8xf32>
    %652 = vector.extract_strided_slice %613 {offsets = [0, 8], sizes = [8, 8], strides = [1, 1]} : vector<8x32xf32> to vector<8x8xf32>
    %cst_275 = arith.constant dense<0.000000e+00> : vector<8x8xf32>
    %653 = tpu.matmul %651, %652, %cst_275 {dimension_numbers = #tpu.dot_dimension_numbers<[1], [0], [0], [1], [0, 0, 1, 1], [], []>} : vector<8x8xf32>, vector<8x8xf32>, vector<8x8xf32> -> vector<8x8xf32>
    %654 = vector.extract_strided_slice %611 {offsets = [0, 16], sizes = [8, 8], strides = [1, 1]} : vector<8x32xf32> to vector<8x8xf32>
    %655 = vector.extract_strided_slice %612 {offsets = [0, 16], sizes = [8, 8], strides = [1, 1]} : vector<8x32xf32> to vector<8x8xf32>
    %cst_276 = arith.constant dense<0.000000e+00> : vector<8x8xf32>
    %656 = tpu.matmul %654, %655, %cst_276 {dimension_numbers = #tpu.dot_dimension_numbers<[1], [1], [0], [0], [0, 0, 1, 0], [], []>} : vector<8x8xf32>, vector<8x8xf32>, vector<8x8xf32> -> vector<8x8xf32>
    %cst_277 = arith.constant 0.353553385 : f32
    %657 = vector.broadcast %cst_277 : f32 to vector<8x8xf32>
    %658 = arith.mulf %656, %657 : vector<8x8xf32>
    %659 = arith.addf %658, %326 : vector<8x8xf32>
    %cst_278 = arith.constant dense<0xFF800000> : vector<8xf32>
    %660 = vector.multi_reduction <maximumf>, %659, %cst_278 [1] : vector<8x8xf32> to vector<8xf32>
    %661 = vector.shape_cast %660 : vector<8xf32> to vector<8x1xf32>
    %662 = vector.broadcast %661 : vector<8x1xf32> to vector<8x8xf32>
    %663 = arith.subf %659, %662 : vector<8x8xf32>
    %664 = math.exp %663 : vector<8x8xf32>
    %cst_279 = arith.constant dense<0.000000e+00> : vector<8xf32>
    %665 = vector.multi_reduction <add>, %664, %cst_279 [1] : vector<8x8xf32> to vector<8xf32>
    %666 = vector.shape_cast %665 : vector<8xf32> to vector<8x1xf32>
    %667 = tpu.reciprocal %666 {approx = true} : vector<8x1xf32> -> vector<8x1xf32>
    %668 = vector.broadcast %667 : vector<8x1xf32> to vector<8x8xf32>
    %669 = arith.mulf %664, %668 : vector<8x8xf32>
    %670 = vector.extract_strided_slice %613 {offsets = [0, 16], sizes = [8, 8], strides = [1, 1]} : vector<8x32xf32> to vector<8x8xf32>
    %cst_280 = arith.constant dense<0.000000e+00> : vector<8x8xf32>
    %671 = tpu.matmul %669, %670, %cst_280 {dimension_numbers = #tpu.dot_dimension_numbers<[1], [0], [0], [1], [0, 0, 1, 1], [], []>} : vector<8x8xf32>, vector<8x8xf32>, vector<8x8xf32> -> vector<8x8xf32>
    %672 = vector.extract_strided_slice %611 {offsets = [0, 24], sizes = [8, 8], strides = [1, 1]} : vector<8x32xf32> to vector<8x8xf32>
    %673 = vector.extract_strided_slice %612 {offsets = [0, 24], sizes = [8, 8], strides = [1, 1]} : vector<8x32xf32> to vector<8x8xf32>
    %cst_281 = arith.constant dense<0.000000e+00> : vector<8x8xf32>
    %674 = tpu.matmul %672, %673, %cst_281 {dimension_numbers = #tpu.dot_dimension_numbers<[1], [1], [0], [0], [0, 0, 1, 0], [], []>} : vector<8x8xf32>, vector<8x8xf32>, vector<8x8xf32> -> vector<8x8xf32>
    %cst_282 = arith.constant 0.353553385 : f32
    %675 = vector.broadcast %cst_282 : f32 to vector<8x8xf32>
    %676 = arith.mulf %674, %675 : vector<8x8xf32>
    %677 = arith.addf %676, %326 : vector<8x8xf32>
    %cst_283 = arith.constant dense<0xFF800000> : vector<8xf32>
    %678 = vector.multi_reduction <maximumf>, %677, %cst_283 [1] : vector<8x8xf32> to vector<8xf32>
    %679 = vector.shape_cast %678 : vector<8xf32> to vector<8x1xf32>
    %680 = vector.broadcast %679 : vector<8x1xf32> to vector<8x8xf32>
    %681 = arith.subf %677, %680 : vector<8x8xf32>
    %682 = math.exp %681 : vector<8x8xf32>
    %cst_284 = arith.constant dense<0.000000e+00> : vector<8xf32>
    %683 = vector.multi_reduction <add>, %682, %cst_284 [1] : vector<8x8xf32> to vector<8xf32>
    %684 = vector.shape_cast %683 : vector<8xf32> to vector<8x1xf32>
    %685 = tpu.reciprocal %684 {approx = true} : vector<8x1xf32> -> vector<8x1xf32>
    %686 = vector.broadcast %685 : vector<8x1xf32> to vector<8x8xf32>
    %687 = arith.mulf %682, %686 : vector<8x8xf32>
    %688 = vector.extract_strided_slice %613 {offsets = [0, 24], sizes = [8, 8], strides = [1, 1]} : vector<8x32xf32> to vector<8x8xf32>
    %cst_285 = arith.constant dense<0.000000e+00> : vector<8x8xf32>
    %689 = tpu.matmul %687, %688, %cst_285 {dimension_numbers = #tpu.dot_dimension_numbers<[1], [0], [0], [1], [0, 0, 1, 1], [], []>} : vector<8x8xf32>, vector<8x8xf32>, vector<8x8xf32> -> vector<8x8xf32>
    %690 = tpu.concatenate %635, %653, %671, %689 in 1 : vector<8x8xf32>, vector<8x8xf32>, vector<8x8xf32>, vector<8x8xf32> -> vector<8x32xf32>
    %cst_286 = arith.constant dense<0.000000e+00> : vector<8x32xf32>
    %691 = tpu.matmul %690, %615, %cst_286 {dimension_numbers = #tpu.dot_dimension_numbers<[1], [0], [0], [1], [0, 0, 1, 1], [], []>} : vector<8x32xf32>, vector<32x32xf32>, vector<8x32xf32> -> vector<8x32xf32>
    %692 = vector.broadcast %617 : vector<1x32xf32> to vector<8x32xf32>
    %693 = arith.addf %691, %692 : vector<8x32xf32>
    %694 = arith.addf %601, %693 : vector<8x32xf32>
    %695 = vector.extract_strided_slice %603 {offsets = [0, 0], sizes = [1, 32], strides = [1, 1]} : vector<6x32xf32> to vector<1x32xf32>
    %696 = vector.extract_strided_slice %603 {offsets = [1, 0], sizes = [1, 32], strides = [1, 1]} : vector<6x32xf32> to vector<1x32xf32>
    %cst_287 = arith.constant dense<0.000000e+00> : vector<8xf32>
    %697 = vector.multi_reduction <add>, %694, %cst_287 [1] : vector<8x32xf32> to vector<8xf32>
    %698 = vector.shape_cast %697 : vector<8xf32> to vector<8x1xf32>
    %cst_288 = arith.constant 3.200000e+01 : f32
    %699 = vector.broadcast %cst_288 : f32 to vector<8x1xf32>
    %700 = arith.divf %698, %699 : vector<8x1xf32>
    %701 = arith.mulf %694, %694 : vector<8x32xf32>
    %cst_289 = arith.constant dense<0.000000e+00> : vector<8xf32>
    %702 = vector.multi_reduction <add>, %701, %cst_289 [1] : vector<8x32xf32> to vector<8xf32>
    %703 = vector.shape_cast %702 : vector<8xf32> to vector<8x1xf32>
    %cst_290 = arith.constant 3.200000e+01 : f32
    %704 = vector.broadcast %cst_290 : f32 to vector<8x1xf32>
    %705 = arith.divf %703, %704 : vector<8x1xf32>
    %706 = arith.mulf %700, %700 : vector<8x1xf32>
    %707 = arith.subf %705, %706 : vector<8x1xf32>
    %708 = vector.broadcast %700 : vector<8x1xf32> to vector<8x32xf32>
    %709 = arith.subf %694, %708 : vector<8x32xf32>
    %cst_291 = arith.constant 9.99999974E-6 : f32
    %710 = vector.broadcast %cst_291 : f32 to vector<8x1xf32>
    %711 = arith.addf %707, %710 : vector<8x1xf32>
    %712 = math.rsqrt %711 : vector<8x1xf32>
    %713 = vector.broadcast %712 : vector<8x1xf32> to vector<8x32xf32>
    %714 = arith.mulf %709, %713 : vector<8x32xf32>
    %715 = vector.broadcast %695 : vector<1x32xf32> to vector<8x32xf32>
    %716 = arith.mulf %714, %715 : vector<8x32xf32>
    %717 = vector.broadcast %696 : vector<1x32xf32> to vector<8x32xf32>
    %718 = arith.addf %716, %717 : vector<8x32xf32>
    %c1_292 = arith.constant 1 : index
    %c0_293 = arith.constant 0 : index
    %c0_294 = arith.constant 0 : index
    %719 = vector.load %arg22[%c1_292, %c0_293, %c0_294] : memref<2x32x32xf32, #tpu.memory_space<vmem>>, vector<1x32x32xf32>
    %720 = vector.shape_cast %719 : vector<1x32x32xf32> to vector<32x32xf32>
    %cst_295 = arith.constant dense<0.000000e+00> : vector<8x32xf32>
    %721 = tpu.matmul %718, %720, %cst_295 {dimension_numbers = #tpu.dot_dimension_numbers<[1], [0], [0], [1], [0, 0, 1, 1], [], []>} : vector<8x32xf32>, vector<32x32xf32>, vector<8x32xf32> -> vector<8x32xf32>
    %c1_296 = arith.constant 1 : index
    %c0_297 = arith.constant 0 : index
    %c0_298 = arith.constant 0 : index
    %722 = vector.load %arg23[%c1_296, %c0_297, %c0_298] : memref<2x1x32xf32, #tpu.memory_space<vmem>>, vector<1x1x32xf32>
    %723 = vector.shape_cast %722 : vector<1x1x32xf32> to vector<1x32xf32>
    %724 = vector.broadcast %723 : vector<1x32xf32> to vector<8x32xf32>
    %725 = arith.addf %721, %724 : vector<8x32xf32>
    %c1_299 = arith.constant 1 : index
    %c0_300 = arith.constant 0 : index
    %c0_301 = arith.constant 0 : index
    %726 = vector.load %arg24[%c1_299, %c0_300, %c0_301] : memref<2x32x64xf32, #tpu.memory_space<vmem>>, vector<1x32x64xf32>
    %727 = vector.shape_cast %726 : vector<1x32x64xf32> to vector<32x64xf32>
    %cst_302 = arith.constant dense<0.000000e+00> : vector<8x64xf32>
    %728 = tpu.matmul %325, %727, %cst_302 {dimension_numbers = #tpu.dot_dimension_numbers<[1], [0], [0], [1], [0, 0, 1, 1], [], []>} : vector<8x32xf32>, vector<32x64xf32>, vector<8x64xf32> -> vector<8x64xf32>
    %c1_303 = arith.constant 1 : index
    %c0_304 = arith.constant 0 : index
    %c0_305 = arith.constant 0 : index
    %729 = vector.load %arg25[%c1_303, %c0_304, %c0_305] : memref<2x1x64xf32, #tpu.memory_space<vmem>>, vector<1x1x64xf32>
    %730 = vector.shape_cast %729 : vector<1x1x64xf32> to vector<1x64xf32>
    %731 = vector.broadcast %730 : vector<1x64xf32> to vector<8x64xf32>
    %732 = arith.addf %728, %731 : vector<8x64xf32>
    %733 = vector.extract_strided_slice %732 {offsets = [0, 0], sizes = [8, 32], strides = [1, 1]} : vector<8x64xf32> to vector<8x32xf32>
    %734 = vector.extract_strided_slice %732 {offsets = [0, 32], sizes = [8, 32], strides = [1, 1]} : vector<8x64xf32> to vector<8x32xf32>
    %c1_306 = arith.constant 1 : index
    %c0_307 = arith.constant 0 : index
    %c0_308 = arith.constant 0 : index
    %735 = vector.load %arg26[%c1_306, %c0_307, %c0_308] : memref<2x32x32xf32, #tpu.memory_space<vmem>>, vector<1x32x32xf32>
    %736 = vector.shape_cast %735 : vector<1x32x32xf32> to vector<32x32xf32>
    %c1_309 = arith.constant 1 : index
    %c0_310 = arith.constant 0 : index
    %c0_311 = arith.constant 0 : index
    %737 = vector.load %arg27[%c1_309, %c0_310, %c0_311] : memref<2x1x32xf32, #tpu.memory_space<vmem>>, vector<1x1x32xf32>
    %738 = vector.shape_cast %737 : vector<1x1x32xf32> to vector<1x32xf32>
    %739 = vector.extract_strided_slice %725 {offsets = [0, 0], sizes = [8, 8], strides = [1, 1]} : vector<8x32xf32> to vector<8x8xf32>
    %740 = vector.extract_strided_slice %733 {offsets = [0, 0], sizes = [8, 8], strides = [1, 1]} : vector<8x32xf32> to vector<8x8xf32>
    %cst_312 = arith.constant dense<0.000000e+00> : vector<8x8xf32>
    %741 = tpu.matmul %739, %740, %cst_312 {dimension_numbers = #tpu.dot_dimension_numbers<[1], [1], [0], [0], [0, 0, 1, 0], [], []>} : vector<8x8xf32>, vector<8x8xf32>, vector<8x8xf32> -> vector<8x8xf32>
    %cst_313 = arith.constant 0.353553385 : f32
    %742 = vector.broadcast %cst_313 : f32 to vector<8x8xf32>
    %743 = arith.mulf %741, %742 : vector<8x8xf32>
    %cst_314 = arith.constant dense<0xFF800000> : vector<8xf32>
    %744 = vector.multi_reduction <maximumf>, %743, %cst_314 [1] : vector<8x8xf32> to vector<8xf32>
    %745 = vector.shape_cast %744 : vector<8xf32> to vector<8x1xf32>
    %746 = vector.broadcast %745 : vector<8x1xf32> to vector<8x8xf32>
    %747 = arith.subf %743, %746 : vector<8x8xf32>
    %748 = math.exp %747 : vector<8x8xf32>
    %cst_315 = arith.constant dense<0.000000e+00> : vector<8xf32>
    %749 = vector.multi_reduction <add>, %748, %cst_315 [1] : vector<8x8xf32> to vector<8xf32>
    %750 = vector.shape_cast %749 : vector<8xf32> to vector<8x1xf32>
    %751 = tpu.reciprocal %750 {approx = true} : vector<8x1xf32> -> vector<8x1xf32>
    %752 = vector.broadcast %751 : vector<8x1xf32> to vector<8x8xf32>
    %753 = arith.mulf %748, %752 : vector<8x8xf32>
    %754 = vector.extract_strided_slice %734 {offsets = [0, 0], sizes = [8, 8], strides = [1, 1]} : vector<8x32xf32> to vector<8x8xf32>
    %cst_316 = arith.constant dense<0.000000e+00> : vector<8x8xf32>
    %755 = tpu.matmul %753, %754, %cst_316 {dimension_numbers = #tpu.dot_dimension_numbers<[1], [0], [0], [1], [0, 0, 1, 1], [], []>} : vector<8x8xf32>, vector<8x8xf32>, vector<8x8xf32> -> vector<8x8xf32>
    %756 = vector.extract_strided_slice %725 {offsets = [0, 8], sizes = [8, 8], strides = [1, 1]} : vector<8x32xf32> to vector<8x8xf32>
    %757 = vector.extract_strided_slice %733 {offsets = [0, 8], sizes = [8, 8], strides = [1, 1]} : vector<8x32xf32> to vector<8x8xf32>
    %cst_317 = arith.constant dense<0.000000e+00> : vector<8x8xf32>
    %758 = tpu.matmul %756, %757, %cst_317 {dimension_numbers = #tpu.dot_dimension_numbers<[1], [1], [0], [0], [0, 0, 1, 0], [], []>} : vector<8x8xf32>, vector<8x8xf32>, vector<8x8xf32> -> vector<8x8xf32>
    %cst_318 = arith.constant 0.353553385 : f32
    %759 = vector.broadcast %cst_318 : f32 to vector<8x8xf32>
    %760 = arith.mulf %758, %759 : vector<8x8xf32>
    %cst_319 = arith.constant dense<0xFF800000> : vector<8xf32>
    %761 = vector.multi_reduction <maximumf>, %760, %cst_319 [1] : vector<8x8xf32> to vector<8xf32>
    %762 = vector.shape_cast %761 : vector<8xf32> to vector<8x1xf32>
    %763 = vector.broadcast %762 : vector<8x1xf32> to vector<8x8xf32>
    %764 = arith.subf %760, %763 : vector<8x8xf32>
    %765 = math.exp %764 : vector<8x8xf32>
    %cst_320 = arith.constant dense<0.000000e+00> : vector<8xf32>
    %766 = vector.multi_reduction <add>, %765, %cst_320 [1] : vector<8x8xf32> to vector<8xf32>
    %767 = vector.shape_cast %766 : vector<8xf32> to vector<8x1xf32>
    %768 = tpu.reciprocal %767 {approx = true} : vector<8x1xf32> -> vector<8x1xf32>
    %769 = vector.broadcast %768 : vector<8x1xf32> to vector<8x8xf32>
    %770 = arith.mulf %765, %769 : vector<8x8xf32>
    %771 = vector.extract_strided_slice %734 {offsets = [0, 8], sizes = [8, 8], strides = [1, 1]} : vector<8x32xf32> to vector<8x8xf32>
    %cst_321 = arith.constant dense<0.000000e+00> : vector<8x8xf32>
    %772 = tpu.matmul %770, %771, %cst_321 {dimension_numbers = #tpu.dot_dimension_numbers<[1], [0], [0], [1], [0, 0, 1, 1], [], []>} : vector<8x8xf32>, vector<8x8xf32>, vector<8x8xf32> -> vector<8x8xf32>
    %773 = vector.extract_strided_slice %725 {offsets = [0, 16], sizes = [8, 8], strides = [1, 1]} : vector<8x32xf32> to vector<8x8xf32>
    %774 = vector.extract_strided_slice %733 {offsets = [0, 16], sizes = [8, 8], strides = [1, 1]} : vector<8x32xf32> to vector<8x8xf32>
    %cst_322 = arith.constant dense<0.000000e+00> : vector<8x8xf32>
    %775 = tpu.matmul %773, %774, %cst_322 {dimension_numbers = #tpu.dot_dimension_numbers<[1], [1], [0], [0], [0, 0, 1, 0], [], []>} : vector<8x8xf32>, vector<8x8xf32>, vector<8x8xf32> -> vector<8x8xf32>
    %cst_323 = arith.constant 0.353553385 : f32
    %776 = vector.broadcast %cst_323 : f32 to vector<8x8xf32>
    %777 = arith.mulf %775, %776 : vector<8x8xf32>
    %cst_324 = arith.constant dense<0xFF800000> : vector<8xf32>
    %778 = vector.multi_reduction <maximumf>, %777, %cst_324 [1] : vector<8x8xf32> to vector<8xf32>
    %779 = vector.shape_cast %778 : vector<8xf32> to vector<8x1xf32>
    %780 = vector.broadcast %779 : vector<8x1xf32> to vector<8x8xf32>
    %781 = arith.subf %777, %780 : vector<8x8xf32>
    %782 = math.exp %781 : vector<8x8xf32>
    %cst_325 = arith.constant dense<0.000000e+00> : vector<8xf32>
    %783 = vector.multi_reduction <add>, %782, %cst_325 [1] : vector<8x8xf32> to vector<8xf32>
    %784 = vector.shape_cast %783 : vector<8xf32> to vector<8x1xf32>
    %785 = tpu.reciprocal %784 {approx = true} : vector<8x1xf32> -> vector<8x1xf32>
    %786 = vector.broadcast %785 : vector<8x1xf32> to vector<8x8xf32>
    %787 = arith.mulf %782, %786 : vector<8x8xf32>
    %788 = vector.extract_strided_slice %734 {offsets = [0, 16], sizes = [8, 8], strides = [1, 1]} : vector<8x32xf32> to vector<8x8xf32>
    %cst_326 = arith.constant dense<0.000000e+00> : vector<8x8xf32>
    %789 = tpu.matmul %787, %788, %cst_326 {dimension_numbers = #tpu.dot_dimension_numbers<[1], [0], [0], [1], [0, 0, 1, 1], [], []>} : vector<8x8xf32>, vector<8x8xf32>, vector<8x8xf32> -> vector<8x8xf32>
    %790 = vector.extract_strided_slice %725 {offsets = [0, 24], sizes = [8, 8], strides = [1, 1]} : vector<8x32xf32> to vector<8x8xf32>
    %791 = vector.extract_strided_slice %733 {offsets = [0, 24], sizes = [8, 8], strides = [1, 1]} : vector<8x32xf32> to vector<8x8xf32>
    %cst_327 = arith.constant dense<0.000000e+00> : vector<8x8xf32>
    %792 = tpu.matmul %790, %791, %cst_327 {dimension_numbers = #tpu.dot_dimension_numbers<[1], [1], [0], [0], [0, 0, 1, 0], [], []>} : vector<8x8xf32>, vector<8x8xf32>, vector<8x8xf32> -> vector<8x8xf32>
    %cst_328 = arith.constant 0.353553385 : f32
    %793 = vector.broadcast %cst_328 : f32 to vector<8x8xf32>
    %794 = arith.mulf %792, %793 : vector<8x8xf32>
    %cst_329 = arith.constant dense<0xFF800000> : vector<8xf32>
    %795 = vector.multi_reduction <maximumf>, %794, %cst_329 [1] : vector<8x8xf32> to vector<8xf32>
    %796 = vector.shape_cast %795 : vector<8xf32> to vector<8x1xf32>
    %797 = vector.broadcast %796 : vector<8x1xf32> to vector<8x8xf32>
    %798 = arith.subf %794, %797 : vector<8x8xf32>
    %799 = math.exp %798 : vector<8x8xf32>
    %cst_330 = arith.constant dense<0.000000e+00> : vector<8xf32>
    %800 = vector.multi_reduction <add>, %799, %cst_330 [1] : vector<8x8xf32> to vector<8xf32>
    %801 = vector.shape_cast %800 : vector<8xf32> to vector<8x1xf32>
    %802 = tpu.reciprocal %801 {approx = true} : vector<8x1xf32> -> vector<8x1xf32>
    %803 = vector.broadcast %802 : vector<8x1xf32> to vector<8x8xf32>
    %804 = arith.mulf %799, %803 : vector<8x8xf32>
    %805 = vector.extract_strided_slice %734 {offsets = [0, 24], sizes = [8, 8], strides = [1, 1]} : vector<8x32xf32> to vector<8x8xf32>
    %cst_331 = arith.constant dense<0.000000e+00> : vector<8x8xf32>
    %806 = tpu.matmul %804, %805, %cst_331 {dimension_numbers = #tpu.dot_dimension_numbers<[1], [0], [0], [1], [0, 0, 1, 1], [], []>} : vector<8x8xf32>, vector<8x8xf32>, vector<8x8xf32> -> vector<8x8xf32>
    %807 = tpu.concatenate %755, %772, %789, %806 in 1 : vector<8x8xf32>, vector<8x8xf32>, vector<8x8xf32>, vector<8x8xf32> -> vector<8x32xf32>
    %cst_332 = arith.constant dense<0.000000e+00> : vector<8x32xf32>
    %808 = tpu.matmul %807, %736, %cst_332 {dimension_numbers = #tpu.dot_dimension_numbers<[1], [0], [0], [1], [0, 0, 1, 1], [], []>} : vector<8x32xf32>, vector<32x32xf32>, vector<8x32xf32> -> vector<8x32xf32>
    %809 = vector.broadcast %738 : vector<1x32xf32> to vector<8x32xf32>
    %810 = arith.addf %808, %809 : vector<8x32xf32>
    %811 = arith.addf %718, %810 : vector<8x32xf32>
    %812 = vector.extract_strided_slice %603 {offsets = [2, 0], sizes = [1, 32], strides = [1, 1]} : vector<6x32xf32> to vector<1x32xf32>
    %813 = vector.extract_strided_slice %603 {offsets = [3, 0], sizes = [1, 32], strides = [1, 1]} : vector<6x32xf32> to vector<1x32xf32>
    %cst_333 = arith.constant dense<0.000000e+00> : vector<8xf32>
    %814 = vector.multi_reduction <add>, %811, %cst_333 [1] : vector<8x32xf32> to vector<8xf32>
    %815 = vector.shape_cast %814 : vector<8xf32> to vector<8x1xf32>
    %cst_334 = arith.constant 3.200000e+01 : f32
    %816 = vector.broadcast %cst_334 : f32 to vector<8x1xf32>
    %817 = arith.divf %815, %816 : vector<8x1xf32>
    %818 = arith.mulf %811, %811 : vector<8x32xf32>
    %cst_335 = arith.constant dense<0.000000e+00> : vector<8xf32>
    %819 = vector.multi_reduction <add>, %818, %cst_335 [1] : vector<8x32xf32> to vector<8xf32>
    %820 = vector.shape_cast %819 : vector<8xf32> to vector<8x1xf32>
    %cst_336 = arith.constant 3.200000e+01 : f32
    %821 = vector.broadcast %cst_336 : f32 to vector<8x1xf32>
    %822 = arith.divf %820, %821 : vector<8x1xf32>
    %823 = arith.mulf %817, %817 : vector<8x1xf32>
    %824 = arith.subf %822, %823 : vector<8x1xf32>
    %825 = vector.broadcast %817 : vector<8x1xf32> to vector<8x32xf32>
    %826 = arith.subf %811, %825 : vector<8x32xf32>
    %cst_337 = arith.constant 9.99999974E-6 : f32
    %827 = vector.broadcast %cst_337 : f32 to vector<8x1xf32>
    %828 = arith.addf %824, %827 : vector<8x1xf32>
    %829 = math.rsqrt %828 : vector<8x1xf32>
    %830 = vector.broadcast %829 : vector<8x1xf32> to vector<8x32xf32>
    %831 = arith.mulf %826, %830 : vector<8x32xf32>
    %832 = vector.broadcast %812 : vector<1x32xf32> to vector<8x32xf32>
    %833 = arith.mulf %831, %832 : vector<8x32xf32>
    %834 = vector.broadcast %813 : vector<1x32xf32> to vector<8x32xf32>
    %835 = arith.addf %833, %834 : vector<8x32xf32>
    %c1_338 = arith.constant 1 : index
    %c0_339 = arith.constant 0 : index
    %c0_340 = arith.constant 0 : index
    %836 = vector.load %arg28[%c1_338, %c0_339, %c0_340] : memref<2x32x64xf32, #tpu.memory_space<vmem>>, vector<1x32x64xf32>
    %837 = vector.shape_cast %836 : vector<1x32x64xf32> to vector<32x64xf32>
    %cst_341 = arith.constant dense<0.000000e+00> : vector<8x64xf32>
    %838 = tpu.matmul %835, %837, %cst_341 {dimension_numbers = #tpu.dot_dimension_numbers<[1], [0], [0], [1], [0, 0, 1, 1], [], []>} : vector<8x32xf32>, vector<32x64xf32>, vector<8x64xf32> -> vector<8x64xf32>
    %c1_342 = arith.constant 1 : index
    %c0_343 = arith.constant 0 : index
    %c0_344 = arith.constant 0 : index
    %839 = vector.load %arg29[%c1_342, %c0_343, %c0_344] : memref<2x1x64xf32, #tpu.memory_space<vmem>>, vector<1x1x64xf32>
    %840 = vector.shape_cast %839 : vector<1x1x64xf32> to vector<1x64xf32>
    %841 = vector.broadcast %840 : vector<1x64xf32> to vector<8x64xf32>
    %842 = arith.addf %838, %841 : vector<8x64xf32>
    %cst_345 = arith.constant 0.000000e+00 : f32
    %843 = vector.broadcast %cst_345 : f32 to vector<8x64xf32>
    %844 = arith.maximumf %842, %843 : vector<8x64xf32>
    %c1_346 = arith.constant 1 : index
    %c0_347 = arith.constant 0 : index
    %c0_348 = arith.constant 0 : index
    %845 = vector.load %arg30[%c1_346, %c0_347, %c0_348] : memref<2x64x32xf32, #tpu.memory_space<vmem>>, vector<1x64x32xf32>
    %846 = vector.shape_cast %845 : vector<1x64x32xf32> to vector<64x32xf32>
    %cst_349 = arith.constant dense<0.000000e+00> : vector<8x32xf32>
    %847 = tpu.matmul %844, %846, %cst_349 {dimension_numbers = #tpu.dot_dimension_numbers<[1], [0], [0], [1], [0, 0, 1, 1], [], []>} : vector<8x64xf32>, vector<64x32xf32>, vector<8x32xf32> -> vector<8x32xf32>
    %c1_350 = arith.constant 1 : index
    %c0_351 = arith.constant 0 : index
    %c0_352 = arith.constant 0 : index
    %848 = vector.load %arg31[%c1_350, %c0_351, %c0_352] : memref<2x1x32xf32, #tpu.memory_space<vmem>>, vector<1x1x32xf32>
    %849 = vector.shape_cast %848 : vector<1x1x32xf32> to vector<1x32xf32>
    %850 = vector.broadcast %849 : vector<1x32xf32> to vector<8x32xf32>
    %851 = arith.addf %847, %850 : vector<8x32xf32>
    %852 = arith.addf %835, %851 : vector<8x32xf32>
    %853 = vector.extract_strided_slice %603 {offsets = [4, 0], sizes = [1, 32], strides = [1, 1]} : vector<6x32xf32> to vector<1x32xf32>
    %854 = vector.extract_strided_slice %603 {offsets = [5, 0], sizes = [1, 32], strides = [1, 1]} : vector<6x32xf32> to vector<1x32xf32>
    %cst_353 = arith.constant dense<0.000000e+00> : vector<8xf32>
    %855 = vector.multi_reduction <add>, %852, %cst_353 [1] : vector<8x32xf32> to vector<8xf32>
    %856 = vector.shape_cast %855 : vector<8xf32> to vector<8x1xf32>
    %cst_354 = arith.constant 3.200000e+01 : f32
    %857 = vector.broadcast %cst_354 : f32 to vector<8x1xf32>
    %858 = arith.divf %856, %857 : vector<8x1xf32>
    %859 = arith.mulf %852, %852 : vector<8x32xf32>
    %cst_355 = arith.constant dense<0.000000e+00> : vector<8xf32>
    %860 = vector.multi_reduction <add>, %859, %cst_355 [1] : vector<8x32xf32> to vector<8xf32>
    %861 = vector.shape_cast %860 : vector<8xf32> to vector<8x1xf32>
    %cst_356 = arith.constant 3.200000e+01 : f32
    %862 = vector.broadcast %cst_356 : f32 to vector<8x1xf32>
    %863 = arith.divf %861, %862 : vector<8x1xf32>
    %864 = arith.mulf %858, %858 : vector<8x1xf32>
    %865 = arith.subf %863, %864 : vector<8x1xf32>
    %866 = vector.broadcast %858 : vector<8x1xf32> to vector<8x32xf32>
    %867 = arith.subf %852, %866 : vector<8x32xf32>
    %cst_357 = arith.constant 9.99999974E-6 : f32
    %868 = vector.broadcast %cst_357 : f32 to vector<8x1xf32>
    %869 = arith.addf %865, %868 : vector<8x1xf32>
    %870 = math.rsqrt %869 : vector<8x1xf32>
    %871 = vector.broadcast %870 : vector<8x1xf32> to vector<8x32xf32>
    %872 = arith.mulf %867, %871 : vector<8x32xf32>
    %873 = vector.broadcast %853 : vector<1x32xf32> to vector<8x32xf32>
    %874 = arith.mulf %872, %873 : vector<8x32xf32>
    %875 = vector.broadcast %854 : vector<1x32xf32> to vector<8x32xf32>
    %876 = arith.addf %874, %875 : vector<8x32xf32>
    %c0_358 = arith.constant 0 : index
    %c0_359 = arith.constant 0 : index
    %877 = vector.load %arg33[%c0_358, %c0_359] : memref<32x16xf32, #tpu.memory_space<vmem>>, vector<32x16xf32>
    %cst_360 = arith.constant dense<0.000000e+00> : vector<8x16xf32>
    %878 = tpu.matmul %876, %877, %cst_360 {dimension_numbers = #tpu.dot_dimension_numbers<[1], [0], [0], [1], [0, 0, 1, 1], [], []>} : vector<8x32xf32>, vector<32x16xf32>, vector<8x16xf32> -> vector<8x16xf32>
    %c0_361 = arith.constant 0 : index
    %c0_362 = arith.constant 0 : index
    %879 = vector.load %arg34[%c0_361, %c0_362] : memref<1x16xf32, #tpu.memory_space<vmem>>, vector<1x16xf32>
    %880 = vector.broadcast %879 : vector<1x16xf32> to vector<8x16xf32>
    %881 = arith.addf %878, %880 : vector<8x16xf32>
    %882 = tpu.iota {dimensions = array<i32: 0>} : vector<8x16xi32>
    %c0_i32 = arith.constant 0 : i32
    %883 = vector.broadcast %c0_i32 : i32 to vector<8x16xi32>
    %884 = arith.cmpi eq, %882, %883 : vector<8x16xi32>
    %c7_i32 = arith.constant 7 : i32
    %885 = vector.broadcast %c7_i32 : i32 to vector<8x16xi32>
    %886 = arith.cmpi eq, %882, %885 : vector<8x16xi32>
    %c0_363 = arith.constant 0 : index
    %c0_364 = arith.constant 0 : index
    %887 = vector.load %arg36[%c0_363, %c0_364] : memref<1x16xf32, #tpu.memory_space<vmem>>, vector<1x16xf32>
    %c1_i32 = arith.constant 1 : i32
    %888 = tpu.dynamic_rotate %881 by %c1_i32 dim 0 : vector<8x16xf32>, i32 -> vector<8x16xf32>
    %cst_365 = arith.constant 0.000000e+00 : f32
    %889 = vector.broadcast %cst_365 : f32 to vector<8x16xf32>
    %890 = arith.select %884, %889, %888 : vector<8x16xi1>, vector<8x16xf32>
    %c7_i32_366 = arith.constant 7 : i32
    %891 = tpu.dynamic_rotate %881 by %c7_i32_366 dim 0 : vector<8x16xf32>, i32 -> vector<8x16xf32>
    %cst_367 = arith.constant 0.000000e+00 : f32
    %892 = vector.broadcast %cst_367 : f32 to vector<8x16xf32>
    %893 = arith.select %886, %892, %891 : vector<8x16xi1>, vector<8x16xf32>
    %c0_368 = arith.constant 0 : index
    %c0_369 = arith.constant 0 : index
    %c0_370 = arith.constant 0 : index
    %894 = vector.load %arg35[%c0_368, %c0_369, %c0_370] : memref<3x16x16xf32, #tpu.memory_space<vmem>>, vector<1x16x16xf32>
    %895 = vector.shape_cast %894 : vector<1x16x16xf32> to vector<16x16xf32>
    %cst_371 = arith.constant dense<0.000000e+00> : vector<8x16xf32>
    %896 = tpu.matmul %890, %895, %cst_371 {dimension_numbers = #tpu.dot_dimension_numbers<[1], [0], [0], [1], [0, 0, 1, 1], [], []>} : vector<8x16xf32>, vector<16x16xf32>, vector<8x16xf32> -> vector<8x16xf32>
    %c1_372 = arith.constant 1 : index
    %c0_373 = arith.constant 0 : index
    %c0_374 = arith.constant 0 : index
    %897 = vector.load %arg35[%c1_372, %c0_373, %c0_374] : memref<3x16x16xf32, #tpu.memory_space<vmem>>, vector<1x16x16xf32>
    %898 = vector.shape_cast %897 : vector<1x16x16xf32> to vector<16x16xf32>
    %cst_375 = arith.constant dense<0.000000e+00> : vector<8x16xf32>
    %899 = tpu.matmul %881, %898, %cst_375 {dimension_numbers = #tpu.dot_dimension_numbers<[1], [0], [0], [1], [0, 0, 1, 1], [], []>} : vector<8x16xf32>, vector<16x16xf32>, vector<8x16xf32> -> vector<8x16xf32>
    %900 = arith.addf %896, %899 : vector<8x16xf32>
    %c2 = arith.constant 2 : index
    %c0_376 = arith.constant 0 : index
    %c0_377 = arith.constant 0 : index
    %901 = vector.load %arg35[%c2, %c0_376, %c0_377] : memref<3x16x16xf32, #tpu.memory_space<vmem>>, vector<1x16x16xf32>
    %902 = vector.shape_cast %901 : vector<1x16x16xf32> to vector<16x16xf32>
    %cst_378 = arith.constant dense<0.000000e+00> : vector<8x16xf32>
    %903 = tpu.matmul %893, %902, %cst_378 {dimension_numbers = #tpu.dot_dimension_numbers<[1], [0], [0], [1], [0, 0, 1, 1], [], []>} : vector<8x16xf32>, vector<16x16xf32>, vector<8x16xf32> -> vector<8x16xf32>
    %904 = arith.addf %900, %903 : vector<8x16xf32>
    %905 = vector.broadcast %887 : vector<1x16xf32> to vector<8x16xf32>
    %906 = arith.addf %904, %905 : vector<8x16xf32>
    %cst_379 = arith.constant 0.000000e+00 : f32
    %907 = vector.broadcast %cst_379 : f32 to vector<8x16xf32>
    %908 = arith.maximumf %906, %907 : vector<8x16xf32>
    %c0_380 = arith.constant 0 : index
    %c0_381 = arith.constant 0 : index
    %909 = vector.load %arg38[%c0_380, %c0_381] : memref<1x16xf32, #tpu.memory_space<vmem>>, vector<1x16xf32>
    %c1_i32_382 = arith.constant 1 : i32
    %910 = tpu.dynamic_rotate %908 by %c1_i32_382 dim 0 : vector<8x16xf32>, i32 -> vector<8x16xf32>
    %cst_383 = arith.constant 0.000000e+00 : f32
    %911 = vector.broadcast %cst_383 : f32 to vector<8x16xf32>
    %912 = arith.select %884, %911, %910 : vector<8x16xi1>, vector<8x16xf32>
    %c7_i32_384 = arith.constant 7 : i32
    %913 = tpu.dynamic_rotate %908 by %c7_i32_384 dim 0 : vector<8x16xf32>, i32 -> vector<8x16xf32>
    %cst_385 = arith.constant 0.000000e+00 : f32
    %914 = vector.broadcast %cst_385 : f32 to vector<8x16xf32>
    %915 = arith.select %886, %914, %913 : vector<8x16xi1>, vector<8x16xf32>
    %c0_386 = arith.constant 0 : index
    %c0_387 = arith.constant 0 : index
    %c0_388 = arith.constant 0 : index
    %916 = vector.load %arg37[%c0_386, %c0_387, %c0_388] : memref<3x16x16xf32, #tpu.memory_space<vmem>>, vector<1x16x16xf32>
    %917 = vector.shape_cast %916 : vector<1x16x16xf32> to vector<16x16xf32>
    %cst_389 = arith.constant dense<0.000000e+00> : vector<8x16xf32>
    %918 = tpu.matmul %912, %917, %cst_389 {dimension_numbers = #tpu.dot_dimension_numbers<[1], [0], [0], [1], [0, 0, 1, 1], [], []>} : vector<8x16xf32>, vector<16x16xf32>, vector<8x16xf32> -> vector<8x16xf32>
    %c1_390 = arith.constant 1 : index
    %c0_391 = arith.constant 0 : index
    %c0_392 = arith.constant 0 : index
    %919 = vector.load %arg37[%c1_390, %c0_391, %c0_392] : memref<3x16x16xf32, #tpu.memory_space<vmem>>, vector<1x16x16xf32>
    %920 = vector.shape_cast %919 : vector<1x16x16xf32> to vector<16x16xf32>
    %cst_393 = arith.constant dense<0.000000e+00> : vector<8x16xf32>
    %921 = tpu.matmul %908, %920, %cst_393 {dimension_numbers = #tpu.dot_dimension_numbers<[1], [0], [0], [1], [0, 0, 1, 1], [], []>} : vector<8x16xf32>, vector<16x16xf32>, vector<8x16xf32> -> vector<8x16xf32>
    %922 = arith.addf %918, %921 : vector<8x16xf32>
    %c2_394 = arith.constant 2 : index
    %c0_395 = arith.constant 0 : index
    %c0_396 = arith.constant 0 : index
    %923 = vector.load %arg37[%c2_394, %c0_395, %c0_396] : memref<3x16x16xf32, #tpu.memory_space<vmem>>, vector<1x16x16xf32>
    %924 = vector.shape_cast %923 : vector<1x16x16xf32> to vector<16x16xf32>
    %cst_397 = arith.constant dense<0.000000e+00> : vector<8x16xf32>
    %925 = tpu.matmul %915, %924, %cst_397 {dimension_numbers = #tpu.dot_dimension_numbers<[1], [0], [0], [1], [0, 0, 1, 1], [], []>} : vector<8x16xf32>, vector<16x16xf32>, vector<8x16xf32> -> vector<8x16xf32>
    %926 = arith.addf %922, %925 : vector<8x16xf32>
    %927 = vector.broadcast %909 : vector<1x16xf32> to vector<8x16xf32>
    %928 = arith.addf %926, %927 : vector<8x16xf32>
    %c0_398 = arith.constant 0 : index
    %c0_399 = arith.constant 0 : index
    %c0_400 = arith.constant 0 : index
    %929 = vector.load %arg39[%c0_398, %c0_399, %c0_400] : memref<1x8x16xf32, #tpu.memory_space<vmem>>, vector<1x8x16xf32>
    %930 = vector.shape_cast %929 : vector<1x8x16xf32> to vector<8x16xf32>
    %931 = vector.shape_cast %928 : vector<8x16xf32> to vector<1x8x16xf32>
    tpu.vector_store %arg39[%c0_398, %c0_399, %c0_400], %931 {strides = array<i32>} : memref<1x8x16xf32, #tpu.memory_space<vmem>>, vector<1x8x16xf32>,
    return
  }
  func.func @transform_0(%arg0: i32) -> (i32, i32, i32) {
    %c0_i32 = arith.constant 0 : i32
    %c0_i32_0 = arith.constant 0 : i32
    %c0_i32_1 = arith.constant 0 : i32
    return %arg0, %c0_i32, %c0_i32_0 : i32, i32, i32
  }
  func.func @transform_1(%arg0: i32) -> (i32, i32, i32) {
    %c0_i32 = arith.constant 0 : i32
    %c0_i32_0 = arith.constant 0 : i32
    %c0_i32_1 = arith.constant 0 : i32
    return %arg0, %c0_i32, %c0_i32_0 : i32, i32, i32
  }
  func.func @transform_2(%arg0: i32) -> (i32, i32) {
    %c0_i32 = arith.constant 0 : i32
    %c0_i32_0 = arith.constant 0 : i32
    %c0_i32_1 = arith.constant 0 : i32
    return %c0_i32, %c0_i32_0 : i32, i32
  }
  func.func @transform_3(%arg0: i32) -> (i32, i32) {
    %c0_i32 = arith.constant 0 : i32
    %c0_i32_0 = arith.constant 0 : i32
    %c0_i32_1 = arith.constant 0 : i32
    return %c0_i32, %c0_i32_0 : i32, i32
  }
  func.func @transform_4(%arg0: i32) -> (i32, i32) {
    %c0_i32 = arith.constant 0 : i32
    %c0_i32_0 = arith.constant 0 : i32
    %c0_i32_1 = arith.constant 0 : i32
    return %c0_i32, %c0_i32_0 : i32, i32
  }
  func.func @transform_5(%arg0: i32) -> (i32, i32) {
    %c0_i32 = arith.constant 0 : i32
    %c0_i32_0 = arith.constant 0 : i32
    %c0_i32_1 = arith.constant 0 : i32
    return %c0_i32, %c0_i32_0 : i32, i32
  }
  func.func @transform_6(%arg0: i32) -> (i32, i32) {
    %c0_i32 = arith.constant 0 : i32
    %c0_i32_0 = arith.constant 0 : i32
    %c0_i32_1 = arith.constant 0 : i32
    return %c0_i32, %c0_i32_0 : i32, i32
  }
  func.func @transform_7(%arg0: i32) -> (i32, i32) {
    %c0_i32 = arith.constant 0 : i32
    %c0_i32_0 = arith.constant 0 : i32
    %c0_i32_1 = arith.constant 0 : i32
    return %c0_i32, %c0_i32_0 : i32, i32
  }
  func.func @transform_8(%arg0: i32) -> (i32, i32, i32) {
    %c0_i32 = arith.constant 0 : i32
    %c0_i32_0 = arith.constant 0 : i32
    %c0_i32_1 = arith.constant 0 : i32
    %c0_i32_2 = arith.constant 0 : i32
    return %c0_i32, %c0_i32_0, %c0_i32_1 : i32, i32, i32
  }
  func.func @transform_9(%arg0: i32) -> (i32, i32, i32) {
    %c0_i32 = arith.constant 0 : i32
    %c0_i32_0 = arith.constant 0 : i32
    %c0_i32_1 = arith.constant 0 : i32
    %c0_i32_2 = arith.constant 0 : i32
    return %c0_i32, %c0_i32_0, %c0_i32_1 : i32, i32, i32
  }
  func.func @transform_10(%arg0: i32) -> (i32, i32, i32) {
    %c0_i32 = arith.constant 0 : i32
    %c0_i32_0 = arith.constant 0 : i32
    %c0_i32_1 = arith.constant 0 : i32
    %c0_i32_2 = arith.constant 0 : i32
    return %c0_i32, %c0_i32_0, %c0_i32_1 : i32, i32, i32
  }
  func.func @transform_11(%arg0: i32) -> (i32, i32, i32) {
    %c0_i32 = arith.constant 0 : i32
    %c0_i32_0 = arith.constant 0 : i32
    %c0_i32_1 = arith.constant 0 : i32
    %c0_i32_2 = arith.constant 0 : i32
    return %c0_i32, %c0_i32_0, %c0_i32_1 : i32, i32, i32
  }
  func.func @transform_12(%arg0: i32) -> (i32, i32, i32) {
    %c0_i32 = arith.constant 0 : i32
    %c0_i32_0 = arith.constant 0 : i32
    %c0_i32_1 = arith.constant 0 : i32
    %c0_i32_2 = arith.constant 0 : i32
    return %c0_i32, %c0_i32_0, %c0_i32_1 : i32, i32, i32
  }
  func.func @transform_13(%arg0: i32) -> (i32, i32, i32) {
    %c0_i32 = arith.constant 0 : i32
    %c0_i32_0 = arith.constant 0 : i32
    %c0_i32_1 = arith.constant 0 : i32
    %c0_i32_2 = arith.constant 0 : i32
    return %c0_i32, %c0_i32_0, %c0_i32_1 : i32, i32, i32
  }
  func.func @transform_14(%arg0: i32) -> (i32, i32, i32) {
    %c0_i32 = arith.constant 0 : i32
    %c0_i32_0 = arith.constant 0 : i32
    %c0_i32_1 = arith.constant 0 : i32
    %c0_i32_2 = arith.constant 0 : i32
    return %c0_i32, %c0_i32_0, %c0_i32_1 : i32, i32, i32
  }
  func.func @transform_15(%arg0: i32) -> (i32, i32, i32) {
    %c0_i32 = arith.constant 0 : i32
    %c0_i32_0 = arith.constant 0 : i32
    %c0_i32_1 = arith.constant 0 : i32
    %c0_i32_2 = arith.constant 0 : i32
    return %c0_i32, %c0_i32_0, %c0_i32_1 : i32, i32, i32
  }
  func.func @transform_16(%arg0: i32) -> (i32, i32, i32) {
    %c0_i32 = arith.constant 0 : i32
    %c0_i32_0 = arith.constant 0 : i32
    %c0_i32_1 = arith.constant 0 : i32
    %c0_i32_2 = arith.constant 0 : i32
    return %c0_i32, %c0_i32_0, %c0_i32_1 : i32, i32, i32
  }
  func.func @transform_17(%arg0: i32) -> (i32, i32, i32) {
    %c0_i32 = arith.constant 0 : i32
    %c0_i32_0 = arith.constant 0 : i32
    %c0_i32_1 = arith.constant 0 : i32
    %c0_i32_2 = arith.constant 0 : i32
    return %c0_i32, %c0_i32_0, %c0_i32_1 : i32, i32, i32
  }
  func.func @transform_18(%arg0: i32) -> (i32, i32, i32) {
    %c0_i32 = arith.constant 0 : i32
    %c0_i32_0 = arith.constant 0 : i32
    %c0_i32_1 = arith.constant 0 : i32
    %c0_i32_2 = arith.constant 0 : i32
    return %c0_i32, %c0_i32_0, %c0_i32_1 : i32, i32, i32
  }
  func.func @transform_19(%arg0: i32) -> (i32, i32, i32) {
    %c0_i32 = arith.constant 0 : i32
    %c0_i32_0 = arith.constant 0 : i32
    %c0_i32_1 = arith.constant 0 : i32
    %c0_i32_2 = arith.constant 0 : i32
    return %c0_i32, %c0_i32_0, %c0_i32_1 : i32, i32, i32
  }
  func.func @transform_20(%arg0: i32) -> (i32, i32, i32) {
    %c0_i32 = arith.constant 0 : i32
    %c0_i32_0 = arith.constant 0 : i32
    %c0_i32_1 = arith.constant 0 : i32
    %c0_i32_2 = arith.constant 0 : i32
    return %c0_i32, %c0_i32_0, %c0_i32_1 : i32, i32, i32
  }
  func.func @transform_21(%arg0: i32) -> (i32, i32, i32) {
    %c0_i32 = arith.constant 0 : i32
    %c0_i32_0 = arith.constant 0 : i32
    %c0_i32_1 = arith.constant 0 : i32
    %c0_i32_2 = arith.constant 0 : i32
    return %c0_i32, %c0_i32_0, %c0_i32_1 : i32, i32, i32
  }
  func.func @transform_22(%arg0: i32) -> (i32, i32, i32) {
    %c0_i32 = arith.constant 0 : i32
    %c0_i32_0 = arith.constant 0 : i32
    %c0_i32_1 = arith.constant 0 : i32
    %c0_i32_2 = arith.constant 0 : i32
    return %c0_i32, %c0_i32_0, %c0_i32_1 : i32, i32, i32
  }
  func.func @transform_23(%arg0: i32) -> (i32, i32, i32) {
    %c0_i32 = arith.constant 0 : i32
    %c0_i32_0 = arith.constant 0 : i32
    %c0_i32_1 = arith.constant 0 : i32
    %c0_i32_2 = arith.constant 0 : i32
    return %c0_i32, %c0_i32_0, %c0_i32_1 : i32, i32, i32
  }
  func.func @transform_24(%arg0: i32) -> (i32, i32, i32) {
    %c0_i32 = arith.constant 0 : i32
    %c0_i32_0 = arith.constant 0 : i32
    %c0_i32_1 = arith.constant 0 : i32
    %c0_i32_2 = arith.constant 0 : i32
    return %c0_i32, %c0_i32_0, %c0_i32_1 : i32, i32, i32
  }
  func.func @transform_25(%arg0: i32) -> (i32, i32, i32) {
    %c0_i32 = arith.constant 0 : i32
    %c0_i32_0 = arith.constant 0 : i32
    %c0_i32_1 = arith.constant 0 : i32
    %c0_i32_2 = arith.constant 0 : i32
    return %c0_i32, %c0_i32_0, %c0_i32_1 : i32, i32, i32
  }
  func.func @transform_26(%arg0: i32) -> (i32, i32, i32) {
    %c0_i32 = arith.constant 0 : i32
    %c0_i32_0 = arith.constant 0 : i32
    %c0_i32_1 = arith.constant 0 : i32
    %c0_i32_2 = arith.constant 0 : i32
    return %c0_i32, %c0_i32_0, %c0_i32_1 : i32, i32, i32
  }
  func.func @transform_27(%arg0: i32) -> (i32, i32, i32) {
    %c0_i32 = arith.constant 0 : i32
    %c0_i32_0 = arith.constant 0 : i32
    %c0_i32_1 = arith.constant 0 : i32
    %c0_i32_2 = arith.constant 0 : i32
    return %c0_i32, %c0_i32_0, %c0_i32_1 : i32, i32, i32
  }
  func.func @transform_28(%arg0: i32) -> (i32, i32, i32) {
    %c0_i32 = arith.constant 0 : i32
    %c0_i32_0 = arith.constant 0 : i32
    %c0_i32_1 = arith.constant 0 : i32
    %c0_i32_2 = arith.constant 0 : i32
    return %c0_i32, %c0_i32_0, %c0_i32_1 : i32, i32, i32
  }
  func.func @transform_29(%arg0: i32) -> (i32, i32, i32) {
    %c0_i32 = arith.constant 0 : i32
    %c0_i32_0 = arith.constant 0 : i32
    %c0_i32_1 = arith.constant 0 : i32
    %c0_i32_2 = arith.constant 0 : i32
    return %c0_i32, %c0_i32_0, %c0_i32_1 : i32, i32, i32
  }
  func.func @transform_30(%arg0: i32) -> (i32, i32, i32) {
    %c0_i32 = arith.constant 0 : i32
    %c0_i32_0 = arith.constant 0 : i32
    %c0_i32_1 = arith.constant 0 : i32
    %c0_i32_2 = arith.constant 0 : i32
    return %c0_i32, %c0_i32_0, %c0_i32_1 : i32, i32, i32
  }
  func.func @transform_31(%arg0: i32) -> (i32, i32, i32) {
    %c0_i32 = arith.constant 0 : i32
    %c0_i32_0 = arith.constant 0 : i32
    %c0_i32_1 = arith.constant 0 : i32
    %c0_i32_2 = arith.constant 0 : i32
    return %c0_i32, %c0_i32_0, %c0_i32_1 : i32, i32, i32
  }
  func.func @transform_32(%arg0: i32) -> (i32, i32) {
    %c0_i32 = arith.constant 0 : i32
    %c0_i32_0 = arith.constant 0 : i32
    %c0_i32_1 = arith.constant 0 : i32
    return %c0_i32, %c0_i32_0 : i32, i32
  }
  func.func @transform_33(%arg0: i32) -> (i32, i32) {
    %c0_i32 = arith.constant 0 : i32
    %c0_i32_0 = arith.constant 0 : i32
    %c0_i32_1 = arith.constant 0 : i32
    return %c0_i32, %c0_i32_0 : i32, i32
  }
  func.func @transform_34(%arg0: i32) -> (i32, i32, i32) {
    %c0_i32 = arith.constant 0 : i32
    %c0_i32_0 = arith.constant 0 : i32
    %c0_i32_1 = arith.constant 0 : i32
    %c0_i32_2 = arith.constant 0 : i32
    return %c0_i32, %c0_i32_0, %c0_i32_1 : i32, i32, i32
  }
  func.func @transform_35(%arg0: i32) -> (i32, i32) {
    %c0_i32 = arith.constant 0 : i32
    %c0_i32_0 = arith.constant 0 : i32
    %c0_i32_1 = arith.constant 0 : i32
    return %c0_i32, %c0_i32_0 : i32, i32
  }
  func.func @transform_36(%arg0: i32) -> (i32, i32, i32) {
    %c0_i32 = arith.constant 0 : i32
    %c0_i32_0 = arith.constant 0 : i32
    %c0_i32_1 = arith.constant 0 : i32
    %c0_i32_2 = arith.constant 0 : i32
    return %c0_i32, %c0_i32_0, %c0_i32_1 : i32, i32, i32
  }
  func.func @transform_37(%arg0: i32) -> (i32, i32) {
    %c0_i32 = arith.constant 0 : i32
    %c0_i32_0 = arith.constant 0 : i32
    %c0_i32_1 = arith.constant 0 : i32
    return %c0_i32, %c0_i32_0 : i32, i32
  }
  func.func @transform_38(%arg0: i32) -> (i32, i32, i32) {
    %c0_i32 = arith.constant 0 : i32
    %c0_i32_0 = arith.constant 0 : i32
    %c0_i32_1 = arith.constant 0 : i32
    return %arg0, %c0_i32, %c0_i32_0 : i32, i32, i32
  }
}

</mosaic_0001>

<bundles_post_ra>
// kernel: transformer_generator_forward.1
= control target key start
LH: loop header
LB: loop body
LE: loop exit
PB: predicated region body
PF: predicated region fallthrough
CT: control target
= control target key end

     0   :  { %s11001_s6 = smov 1   ;;  %s11002_s10 = smov 2   ;;  %s12486_s0 = inlined_call_operand.smem [shape: u32[39], index: -1, kind: input, shape index: {}] }
   0x1   :  { %s11091_s5 = sld [smem:[%s12486_s0]]   ;;  %s11003_s14 = smov 3  }
   0x2   :  { %s11096_s9 = sld [smem:[%s12486_s0 + %s11001_s6]]   ;;  %s11004_s18 = smov 4  }
   0x3   :  { %s11101_s13 = sld [smem:[%s12486_s0 + %s11002_s10]]   ;;  %s11005_s22 = smov 5  }
   0x4   :  { %s11106_s17 = sld [smem:[%s12486_s0 + %s11003_s14]]   ;;  %s11006_s26 = smov 6  }
   0x5   :  { %s11111_s21 = sld [smem:[%s12486_s0 + %s11004_s18]]   ;;  %s11007_s30 = smov 7  }
   0x6   :  { %s11116_s25 = sld [smem:[%s12486_s0 + %s11005_s22]]   ;;  %s11008_s4 = smov 8  }
   0x7   :  { %12545 = sst [smem:[#allocation48_spill]] %s11091_s5  ;;  %s11009_s10 = smov 9  }
   0x8   :  { %12546 = sst [smem:[#allocation49_spill]] %s11096_s9  ;;  %s11010_s15 = smov 10  }
   0x9   :  { %12547 = sst [smem:[#allocation50_spill]] %s11101_s13  ;;  %s11011_s20 = smov 11  }
   0xa   :  { %12548 = sst [smem:[#allocation51_spill]] %s11106_s17  ;;  %s11013_s1 = smov 13  }
   0xb   :  { %12549 = sst [smem:[#allocation52_spill]] %s11111_s21  ;;  %s11014_s7 = smov 14  }
   0xc   :  { %12550 = sst [smem:[#allocation53_spill]] %s11116_s25  ;;  %s11016_s22 = smov 16  }
   0xd   :  { %s11121_s29 = sld [smem:[%s12486_s0 + %s11006_s26]]   ;;  %s11012_s26 = smov 12  }
   0xe   :  { %s11126_s3 = sld [smem:[%s12486_s0 + %s11007_s30]]   ;;  %s11017_s28 = smov 17  }
   0xf   :  { %s11131_s8 = sld [smem:[%s12486_s0 + %s11008_s4]]  }
  0x10   :  { %s11136_s14 = sld [smem:[%s12486_s0 + %s11009_s10]]  }
  0x11   :  { %s11141_s19 = sld [smem:[%s12486_s0 + %s11010_s15]]   ;;  %s11015_s15 = smov 15  }
  0x12   :  { %s11146_s24 = sld [smem:[%s12486_s0 + %s11011_s20]]  }
  0x13   :  { %12551 = sst [smem:[#allocation54_spill]] %s11121_s29 }
  0x14   :  { %12552 = sst [smem:[#allocation55_spill]] %s11126_s3 }
  0x15   :  { %12553 = sst [smem:[#allocation56_spill]] %s11131_s8 }
  0x16   :  { %12554 = sst [smem:[#allocation57_spill]] %s11136_s14 }
  0x17   :  { %12555 = sst [smem:[#allocation58_spill]] %s11141_s19 }
  0x18   :  { %12556 = sst [smem:[#allocation59_spill]] %s11146_s24 }
  0x19   :  { %s11151_s30 = sld [smem:[%s12486_s0 + %s11012_s26]]  }
  0x1a   :  { %s11156_s6 = sld [smem:[%s12486_s0 + %s11013_s1]]  }
  0x1b   :  { %s11161_s12 = sld [smem:[%s12486_s0 + %s11014_s7]]   ;;  %s11018_s7 = smov 18  }
  0x1c   :  { %s11166_s20 = sld [smem:[%s12486_s0 + %s11015_s15]]   ;;  %s11019_s15 = smov 19  }
  0x1d   :  { %s11171_s27 = sld [smem:[%s12486_s0 + %s11016_s22]]   ;;  %s11020_s22 = smov 20  }
  0x1e   :  { %s11176_s4 = sld [smem:[%s12486_s0 + %s11017_s28]]   ;;  %s11021_s28 = smov 21  }
  0x1f   :  { %12557 = sst [smem:[#allocation60_spill]] %s11151_s30 }
  0x20   :  { %12558 = sst [smem:[#allocation61_spill]] %s11156_s6 }
  0x21   :  { %12559 = sst [smem:[#allocation62_spill]] %s11161_s12 }
  0x22   :  { %12560 = sst [smem:[#allocation63_spill]] %s11166_s20 }
  0x23   :  { %s11181_s25 = sld [smem:[%s12486_s0 + %s11018_s7]]   ;;  %s11022_s7 = smov 22  }
  0x24   :  { %12561 = sst [smem:[#allocation64_spill]] %s11176_s4 }
  0x25   :  { %s11186_s12 = sld [smem:[%s12486_s0 + %s11019_s15]]   ;;  %s11023_s15 = smov 23  }
  0x26   :  { %s11191_s30 = sld [smem:[%s12486_s0 + %s11020_s22]]   ;;  %s11024_s22 = smov 24  }
  0x27   :  { %s11196_s4 = sld [smem:[%s12486_s0 + %s11021_s28]]   ;;  %s11025_s28 = smov 25  }
  0x28   :  { %s11201_s19 = sld [smem:[%s12486_s0 + %s11022_s7]]   ;;  %s11026_s7 = smov 26  }
  0x29   :  { %s11211_s14 = sld [smem:[%s12486_s0 + %s11024_s22]]   ;;  %s11028_s22 = smov 28  }
  0x2a   :  { %s11221_s9 = sld [smem:[%s12486_s0 + %s11026_s7]]   ;;  %s11030_s7 = smov 30  }
  0x2b   :  { %12562 = sst [smem:[#allocation65_spill]] %s11186_s12 }
  0x2c   :  { %s11206_s12 = sld [smem:[%s12486_s0 + %s11023_s15]]   ;;  %s11027_s15 = smov 27  }
  0x2d   :  { %12563 = sst [smem:[#allocation66_spill]] %s11196_s4 }
  0x2e   :  { %12564 = sst [smem:[#allocation67_spill]] %s11201_s19 }
  0x2f   :  { %12566 = sst [smem:[#allocation69_spill]] %s11211_s14 }
  0x30   :  { %s11216_s4 = sld [smem:[%s12486_s0 + %s11025_s28]]   ;;  %s11029_s28 = smov 29  }
  0x31   :  { %12568 = sst [smem:[#allocation71_spill]] %s11221_s9 }
  0x32   :  { %12565 = sst [smem:[#allocation68_spill]] %s11206_s12 }
  0x33   :  { %s11226_s12 = sld [smem:[%s12486_s0 + %s11027_s15]]   ;;  %s11031_s15 = smov 31  }
  0x34   :  { %s11231_s8 = sld [smem:[%s12486_s0 + %s11028_s22]]   ;;  %s11032_s22 = smov 32  }
  0x35   :  { %s11236_s21 = sld [smem:[%s12486_s0 + %s11029_s28]]   ;;  %s11033_s28 = smov 33  }
  0x36   :  { %12567 = sst [smem:[#allocation70_spill]] %s11216_s4 }
  0x37   :  { %s11241_s17 = sld [smem:[%s12486_s0 + %s11030_s7]]   ;;  %s11034_s7 = smov 34  }
  0x38   :  { %s11246_s5 = sld [smem:[%s12486_s0 + %s11031_s15]]   ;;  %s11035_s15 = smov 35  }
  0x39   :  { %12569 = sst [smem:[#allocation72_spill]] %s11226_s12 }
  0x3a   :  { %12570 = sst [smem:[#allocation73_spill]] %s11231_s8 }
  0x3b   :  { %12571 = sst [smem:[#allocation74_spill]] %s11236_s21 }
  0x3c   :  { %s11251_s8 = sld [smem:[%s12486_s0 + %s11032_s22]]   ;;  %s11036_s22 = smov 36  }
  0x3d   :  { %12572 = sst [smem:[#allocation75_spill]] %s11241_s17 }
  0x3e   :  { %12573 = sst [smem:[#allocation76_spill]] %s11246_s5 }
  0x3f   :  { %s11256_s21 = sld [smem:[%s12486_s0 + %s11033_s28]]   ;;  %s11037_s28 = smov 37  }
  0x40   :  { %s11261_s9 = sld [smem:[%s12486_s0 + %s11034_s7]]   ;;  %s11038_s7 = smov 38  }
  0x41   :  { %s11266_s5 = sld [smem:[%s12486_s0 + %s11035_s15]]  }
  0x42   :  { %12574 = sst [smem:[#allocation77_spill]] %s11251_s8 }
  0x43   :  { %s11271_s8 = sld [smem:[%s12486_s0 + %s11036_s22]]  }
  0x44   :  { %s11281_s14 = sld [smem:[%s12486_s0 + %s11038_s7]]  }
  0x45   :  { %12575 = sst [smem:[#allocation78_spill]] %s11256_s21 }
  0x46   :  { %12576 = sst [smem:[#allocation79_spill]] %s11261_s9 }
  0x47   :  { %12577 = sst [smem:[#allocation80_spill]] %s11266_s5 }
  0x48   :  { %s11276_s21 = sld [smem:[%s12486_s0 + %s11037_s28]]  }
  0x49   :  { %12578 = sst [smem:[#allocation81_spill]] %s11271_s8 }
  0x4e   :  { %12579 = sst [smem:[#allocation82_spill]] %s11276_s21 }
  0x4f   :  { %82 = vsyncpa [#allocation3], 0 }
  0x50   :  { %83 = vsyncpa [#allocation6], 0 }
  0x51   :  { %84 = vsyncpa [#allocation9], 0 }
  0x52   :  { %85 = vsyncpa [#allocation12], 0 }
  0x53   :  { %86 = vsyncpa [#allocation15], 0 }
  0x54   :  { %87 = vsyncpa [#allocation18], 0 }
  0x55   :  { %88 = vsyncpa [#allocation21], 0 }
  0x56   :  { %89 = vsyncpa [#allocation24], 0 }
  0x57   :  { %90 = vsyncpa [#allocation27], 0 }
  0x58   :  { %91 = vsyncpa [#allocation30], 0 }
  0x59   :  { %92 = vsyncpa [#allocation33], 0 }
  0x5a   :  { %93 = vsyncpa [#allocation4], 0 }
  0x5b   :  { %95 = vsyncpa [#allocation4 + $0x1], 0  ;;  %s11283_s15 = smov 0   ;;  %s11285_s16 = smov 0  }
  0x5c   :  { %s11287_s18 = smov 0   ;;  %s11289_s0 = smov 0  }
  0x5d LB: > { %12580 = sst [smem:[#allocation83_spill]] %s10987_s15  ;;  %s11304_s22 = sadd.s32 4294967295, %s10999_s0   ;;  %s10999_s0 = sphi %s11289_s0, %s12672_s0   ;;  %s10995_s18 = sphi %s11287_s18, %s12677_s18   ;;  %s10991_s16 = sphi %s11285_s16, %s12676_s16   ;;  %s10987_s15 = sphi %s11283_s15, %s12675_s15  }
  0x5e   : > { %12581 = sst [smem:[#allocation84_spill]] %s10995_s18  ;;  %s8845_s23 = sadd.s32 4294967294, %s10999_s0  }
  0x5f   : > { %12582 = sst [smem:[#allocation85_spill]] %s10999_s0  ;;  %s11308_s26 = sadd.s32 1, %s10999_s0  }
  0x60   : > { %12583 = sst [smem:[#allocation86_spill]] %s11308_s26  ;;  %s916_s28 = sadd.s32 1, %s10995_s18 }
  0x61   : > { %s913_s1 = ssub.s32 %s10999_s0, %s11308_s26  ;;  %p926_p0 = scmp.ne.s32.totalorder %s10995_s18, %s10991_s16 }
  0x62   : > { %p914_p1 = scmp.eq.s32.totalorder %s913_s1, 0  ;;  %p927_p2 = scmp.eq.s32.totalorder %s11304_s22, 1 }
  0x63   : > { %p932_p3 = scmp.ne.s32.totalorder %s10991_s16, %s10987_s15  ;;  %p933_p4 = scmp.eq.s32.totalorder %s8845_s23, 1 }
  0x64   : > { %s11319_s2 = scalar_select %p914_p1, %s10995_s18, %s916_s28  }
  0x65   : > { %p11321_p5 = por %p927_p2, %p926_p0  ;;  %p11325_p6 = por %p933_p4, %p932_p3 }
  0x66   : > { %12584 = sst [smem:[#allocation87_spill]] %s11319_s2  ;;  %p8846_p7 = scmp.ge.s32.totalorder %s10999_s0, 1 }
  0x67   : > { %s12585_s7 = scalar_select %p11321_p5, 1, 0 }
  0x68   : > { %s12586_s10 = scalar_select %p11325_p6, 1, 0 }
  0x69   : > { %p940_p8 = scmp.lt.s32.totalorder %s10999_s0, 3  ;;  %p12506_p9 = scmp.eq.s32.totalorder %s11304_s22, 0 }
  0x6a   : > { %12587 = sst [smem:[#allocation88_spill]] %s12586_s10  ;;  %s11039_s1 = smov [#allocation5]  }
  0x6b   : > { %p11332_p10 = pnand %p8846_p7, %p940_p8  ;;  %s975_s23 = sshll.u32 %s11039_s1, 4  ;;  %s976_s23 = int_to_ptr.vmem [resolvable:$true] %s975_s23 }
  0x6c   : > { %s11040_s28 = smov [#allocation8]   ;;  %s11041_s26 = smov [#allocation11]  }
  0x6d   : > { %s12588_s11 = scalar_select %p11332_p10, 1, 0 }
  0x6e   : > { %p10007_p11 = pneg %p11332_p10  ;;  %s1005_s2 = sshll.u32 %s11040_s28, 4  ;;  %s1006_s2 = int_to_ptr.vmem [resolvable:$true] %s1005_s2 }
  0x6f   : > { %s1037_s10 = sshll.u32 %s11041_s26, 4  ;;  %s10360_s1 = scalar_lea.vmem %s976_s23, 128  ;;  %s1038_s10 = int_to_ptr.vmem [resolvable:$true] %s1037_s10 }
  0x70   : > { %p11340_p12 = pnand %p12506_p9, %p10007_p11  ;;  %p10361_p0 = scmp.ne.s32.totalorder %s976_s23, %s10360_s1 }
  0x71   : > { %p10368_p3 = scmp.lt.s32.totalorder %s976_s23, %s976_s23  ;;  %p10369_p4 = scmp.lt.s32.totalorder %s10360_s1, %s10360_s1 }
  0x72   : > { %p11346_p13 = pneg %p11340_p12 }
  0x73   : > { %p10370_p7 = por %p10369_p4, %p10368_p3 }
  0x74   : > { %p10363_p1 = pnand %p10361_p0, %p11346_p13 }
  0x76   : > { %p10364_p2 = pneg %p10363_p1 }
  0x78   : > { %p10371_p8 = pnand %p10370_p7, %p10364_p2 }
  0x7a   : > { %10374 = shalt.err (!%p10371_p8)
}
  0x7b   : > { %s12591_s29 = sld [smem:[#allocation54_spill]]  ;;  %s10386_s26 = scalar_lea.vmem %s1006_s2, 32 }
  0x7c   : > { %p10387_p11 = scmp.ne.s32.totalorder %s1006_s2, %s10386_s26  ;;  %p10394_p5 = scmp.lt.s32.totalorder %s1006_s2, %s1006_s2 }
  0x7d   : > { %p10395_p10 = scmp.lt.s32.totalorder %s10386_s26, %s10386_s26 }
  0x7e   : > { %p10389_p9 = pnand %p10387_p11, %p11346_p13 }
  0x7f   : > { %p10396_p0 = por %p10395_p10, %p10394_p5 }
  0x80   : > { %p10390_p6 = pneg %p10389_p9 }
  0x81   : > { %10013 = dma.hbm_to_vmem [thread:$0]  (!%p11340_p12), %s12591_s29, 128, %s976_s23, [#allocation6]  }
  0x82   : > { %p10397_p1 = pnand %p10396_p0, %p10390_p6 }
  0x84   : > { %10400 = shalt.err (!%p10397_p1)
}
  0x85   : > { %s12510_s28 = smov 16   ;;  %s12592_s24 = sld [smem:[#allocation59_spill]] }
  0x86   : > { %s12512_s1 = smov 1   ;;  %s10412_s23 = scalar_lea.vmem %s1038_s10, 32 }
  0x87   : > { %p10413_p2 = scmp.ne.s32.totalorder %s1038_s10, %s10412_s23  ;;  %p10420_p4 = scmp.lt.s32.totalorder %s1038_s10, %s1038_s10 }
  0x88   : > { %p10421_p5 = scmp.lt.s32.totalorder %s10412_s23, %s10412_s23 }
  0x89   : > { %p10415_p9 = pnand %p10413_p2, %p11346_p13 }
  0x8a   : > { %p10422_p6 = por %p10421_p5, %p10420_p4 }
  0x8b   : > { %10019 = dma.hbm_to_vmem [thread:$0]  (!%p11340_p12), %s12592_s24, 32, %s1006_s2, [#allocation9], %s12510_s28, %s12510_s28, %s12512_s1  }
  0x8c   : > { %p10416_p3 = pneg %p10415_p9 }
  0x8e   : > { %p10423_p10 = pnand %p10422_p6, %p10416_p3 }
  0x90   : > { %10426 = shalt.err (!%p10423_p10)
}
  0x91   : > { %s12593_s20 = sld [smem:[#allocation63_spill]]  ;;  %s11044_s2 = smov [#allocation14]  }
  0x92   : > { %s1066_s26 = sshll.u32 %s11044_s2, 4  ;;  %s11045_s24 = smov [#allocation17]   ;;  %s1067_s26 = int_to_ptr.vmem [resolvable:$true] %s1066_s26 }
  0x93   : > { %s1098_s29 = sshll.u32 %s11045_s24, 4  ;;  %s10438_s0 = scalar_lea.vmem %s1067_s26, 32  ;;  %s1099_s29 = int_to_ptr.vmem [resolvable:$true] %s1098_s29 }
  0x94   : > { %p10439_p7 = scmp.ne.s32.totalorder %s1067_s26, %s10438_s0  ;;  %p10446_p0 = scmp.lt.s32.totalorder %s1067_s26, %s1067_s26 }
  0x95   : > { %p10447_p1 = scmp.lt.s32.totalorder %s10438_s0, %s10438_s0 }
  0x96   : > { %p10441_p8 = pnand %p10439_p7, %p11346_p13 }
  0x97   : > { %10025 = dma.hbm_to_vmem [thread:$0]  (!%p11340_p12), %s12593_s20, 32, %s1038_s10, [#allocation12], %s12510_s28, %s12510_s28, %s12512_s1  }
  0x98   : > { %p10442_p11 = pneg %p10441_p8  ;;  %p10448_p2 = por %p10447_p1, %p10446_p0 }
  0x9a   : > { %p10449_p9 = pnand %p10448_p2, %p10442_p11 }
  0x9c   : > { %10452 = shalt.err (!%p10449_p9)
}
  0x9d   : > { %10031 = dma.hbm_to_vmem [thread:$0]  (!%p11340_p12), %s11181_s25, 32, %s1067_s26, [#allocation15], %s12510_s28, %s12510_s28, %s12512_s1  }
  0x9e   : > { %s10464_s24 = scalar_lea.vmem %s1099_s29, 32  ;;  %p10472_p6 = scmp.lt.s32.totalorder %s1099_s29, %s1099_s29 }
  0x9f   : > { %p10465_p3 = scmp.ne.s32.totalorder %s1099_s29, %s10464_s24  ;;  %p10473_p10 = scmp.lt.s32.totalorder %s10464_s24, %s10464_s24 }
  0xa1   : > { %p10467_p4 = pnand %p10465_p3, %p11346_p13  ;;  %p10474_p7 = por %p10473_p10, %p10472_p6 }
  0xa3   : > { %p10468_p5 = pneg %p10467_p4 }
  0xa5   : > { %p10475_p8 = pnand %p10474_p7, %p10468_p5 }
  0xa7   : > { %10478 = shalt.err (!%p10475_p8)
}
  0xa8   : > { %s12594_s19 = sld [smem:[#allocation67_spill]]  ;;  %s11046_s0 = smov [#allocation20]  }
  0xa9   : > { %s1127_s10 = sshll.u32 %s11046_s0, 4  ;;  %s11047_s23 = smov [#allocation23]   ;;  %s1128_s10 = int_to_ptr.vmem [resolvable:$true] %s1127_s10 }
  0xaa   : > { %s1153_s2 = sshll.u32 %s11047_s23, 4  ;;  %s10490_s26 = scalar_lea.vmem %s1128_s10, 1024  ;;  %s1154_s2 = int_to_ptr.vmem [resolvable:$true] %s1153_s2 }
  0xab   : > { %p10491_p11 = scmp.ne.s32.totalorder %s1128_s10, %s10490_s26  ;;  %p10498_p2 = scmp.lt.s32.totalorder %s1128_s10, %s1128_s10 }
  0xac   : > { %p10499_p9 = scmp.lt.s32.totalorder %s10490_s26, %s10490_s26 }
  0xad   : > { %p10493_p0 = pnand %p10491_p11, %p11346_p13 }
  0xae   : > { %10037 = dma.hbm_to_vmem [thread:$0]  (!%p11340_p12), %s12594_s19, 32, %s1099_s29, [#allocation18], %s12510_s28, %s12510_s28, %s12512_s1  }
  0xaf   : > { %p10494_p1 = pneg %p10493_p0  ;;  %p10500_p3 = por %p10499_p9, %p10498_p2 }
  0xb1   : > { %p10501_p4 = pnand %p10500_p3, %p10494_p1 }
  0xb3   : > { %10504 = shalt.err (!%p10501_p4)
}
  0xb4   : > { %s11048_s24 = smov 128   ;;  %s12595_s4 = sld [smem:[#allocation70_spill]] }
  0xb5   : > { %s11049_s29 = smov 8   ;;  %s10516_s0 = scalar_lea.vmem %s1154_s2, 1024 }
  0xb6   : > { %p10517_p5 = scmp.ne.s32.totalorder %s1154_s2, %s10516_s0  ;;  %p10524_p7 = scmp.lt.s32.totalorder %s1154_s2, %s1154_s2 }
  0xb7   : > { %p10525_p8 = scmp.lt.s32.totalorder %s10516_s0, %s10516_s0 }
  0xb8   : > { %p10519_p6 = pnand %p10517_p5, %p11346_p13 }
  0xb9   : > { %p10526_p11 = por %p10525_p8, %p10524_p7 }
  0xba   : > { %10043 = dma.hbm_to_vmem [thread:$0]  (!%p11340_p12), %s12595_s4, 1024, %s1128_s10, [#allocation21], %s11048_s24, %s11048_s24, %s11049_s29  }
  0xbb   : > { %p10520_p10 = pneg %p10519_p6 }
  0xbd   : > { %p10527_p0 = pnand %p10526_p11, %p10520_p10 }
  0xbf   : > { %10530 = shalt.err (!%p10527_p0)
}
  0xc0   : > { %s12596_s12 = sld [smem:[#allocation72_spill]]  ;;  %s11050_s10 = smov [#allocation26]  }
  0xc1   : > { %s1182_s23 = sshll.u32 %s11050_s10, 4  ;;  %s11051_s26 = smov [#allocation29]   ;;  %s1183_s23 = int_to_ptr.vmem [resolvable:$true] %s1182_s23 }
  0xc2   : > { %s1212_s28 = sshll.u32 %s11051_s26, 4  ;;  %s10542_s1 = scalar_lea.vmem %s1183_s23, 32  ;;  %s1213_s28 = int_to_ptr.vmem [resolvable:$true] %s1212_s28 }
  0xc3   : > { %p10543_p1 = scmp.ne.s32.totalorder %s1183_s23, %s10542_s1  ;;  %p10550_p3 = scmp.lt.s32.totalorder %s1183_s23, %s1183_s23 }
  0xc4   : > { %p10551_p4 = scmp.lt.s32.totalorder %s10542_s1, %s10542_s1 }
  0xc5   : > { %p10545_p2 = pnand %p10543_p1, %p11346_p13 }
  0xc6   : > { %10049 = dma.hbm_to_vmem [thread:$0]  (!%p11340_p12), %s12596_s12, 1024, %s1154_s2, [#allocation24], %s11048_s24, %s11048_s24, %s11049_s29  }
  0xc7   : > { %p10546_p9 = pneg %p10545_p2  ;;  %p10552_p5 = por %p10551_p4, %p10550_p3 }
  0xc9   : > { %p10553_p6 = pnand %p10552_p5, %p10546_p9 }
  0xcb   : > { %10556 = shalt.err (!%p10553_p6)
}
  0xcc   : > { %s12597_s0 = smov 1   ;;  %s12598_s4 = smov 16  }
  0xcd   : > { %s12599_s17 = sld [smem:[#allocation75_spill]]  ;;  %s10568_s2 = scalar_lea.vmem %s1213_s28, 768 }
  0xce   : > { %p10569_p10 = scmp.ne.s32.totalorder %s1213_s28, %s10568_s2  ;;  %p10576_p11 = scmp.lt.s32.totalorder %s1213_s28, %s1213_s28 }
  0xcf   : > { %p10577_p0 = scmp.lt.s32.totalorder %s10568_s2, %s10568_s2 }
  0xd0   : > { %p10571_p7 = pnand %p10569_p10, %p11346_p13 }
  0xd1   : > { %p10578_p1 = por %p10577_p0, %p10576_p11 }
  0xd2   : > { %p10572_p8 = pneg %p10571_p7 }
  0xd3   : > { %10055 = dma.hbm_to_vmem [thread:$0]  (!%p11340_p12), %s12599_s17, 32, %s1183_s23, [#allocation27], %s12598_s4, %s12598_s4, %s12597_s0  }
  0xd4   : > { %p10579_p2 = pnand %p10578_p1, %p10572_p8 }
  0xd6   : > { %10582 = shalt.err (!%p10579_p2)
}
  0xd7   : > { %s12600_s9 = sld [smem:[#allocation79_spill]]  ;;  %s11052_s1 = smov [#allocation32]  }
  0xd8   : > { %s1236_s10 = sshll.u32 %s11052_s1, 4  ;;  %s11053_s23 = smov [#allocation2]   ;;  %s1237_s10 = int_to_ptr.vmem [resolvable:$true] %s1236_s10 }
  0xd9   : > { %s952_s26 = sshll.u32 %s11053_s23, 4  ;;  %s10594_s12 = scalar_lea.vmem %s1237_s10, 768  ;;  %s953_s26 = int_to_ptr.vmem [resolvable:$true] %s952_s26 }
  0xda   : > { %p10595_p9 = scmp.ne.s32.totalorder %s1237_s10, %s10594_s12  ;;  %p10602_p5 = scmp.lt.s32.totalorder %s1237_s10, %s1237_s10 }
  0xdb   : > { %p10603_p6 = scmp.lt.s32.totalorder %s10594_s12, %s10594_s12 }
  0xdc   : > { %p10597_p3 = pnand %p10595_p9, %p11346_p13 }
  0xdd   : > { %10061 = dma.hbm_to_vmem [thread:$0]  (!%p11340_p12), %s12600_s9, 768, %s1213_s28, [#allocation30], %s11048_s24, %s11048_s24, %s11049_s29  }
  0xde   : > { %p10598_p4 = pneg %p10597_p3  ;;  %p10604_p10 = por %p10603_p6, %p10602_p5 }
  0xe0   : > { %p10605_p7 = pnand %p10604_p10, %p10598_p4 }
  0xe2   : > { %10608 = shalt.err (!%p10605_p7)
}
  0xe3   : > { %s12601_s8 = sld [smem:[#allocation81_spill]]  ;;  %s10620_s28 = scalar_lea.vmem %s953_s26, 256 }
  0xe4   : > { %p10621_p8 = scmp.ne.s32.totalorder %s953_s26, %s10620_s28  ;;  %p10628_p1 = scmp.lt.s32.totalorder %s953_s26, %s953_s26 }
  0xe5   : > { %p10629_p2 = scmp.lt.s32.totalorder %s10620_s28, %s10620_s28 }
  0xe6   : > { %p10623_p11 = pnand %p10621_p8, %p11346_p13 }
  0xe7   : > { %p10630_p9 = por %p10629_p2, %p10628_p1 }
  0xe8   : > { %p10624_p0 = pneg %p10623_p11 }
  0xe9   : > { %10067 = dma.hbm_to_vmem [thread:$0]  (!%p11340_p12), %s12601_s8, 768, %s1237_s10, [#allocation33], %s11048_s24, %s11048_s24, %s11049_s29  }
  0xea   : > { %p10631_p3 = pnand %p10630_p9, %p10624_p0 }
  0xec   : > { %10634 = shalt.err (!%p10631_p3)
}
  0xed   : > { %s12602_s13 = sld [smem:[#allocation50_spill]]  ;;  %s11054_s12 = smov [#allocation7]  }
  0xee   : > { %s986_s2 = sshll.u32 %s11054_s12, 4  ;;  %s11055_s1 = smov [#allocation10]   ;;  %s987_s2 = int_to_ptr.vmem [resolvable:$true] %s986_s2 }
  0xef   : > { %s1021_s10 = sshll.u32 %s11055_s1, 4  ;;  %s10646_s23 = scalar_lea.vmem %s987_s2, 128  ;;  %s1022_s10 = int_to_ptr.vmem [resolvable:$true] %s1021_s10 }
  0xf0   : > { %p10647_p4 = scmp.ne.s32.totalorder %s987_s2, %s10646_s23  ;;  %p10654_p10 = scmp.lt.s32.totalorder %s987_s2, %s987_s2 }
  0xf1   : > { %p10655_p7 = scmp.lt.s32.totalorder %s10646_s23, %s10646_s23 }
  0xf2   : > { %p10649_p5 = pnand %p10647_p4, %p11346_p13 }
  0xf3   : > { %10010 = dma.hbm_to_vmem [thread:$0]  (!%p11340_p12), %s12602_s13, 256, %s953_s26, [#allocation3], %s11048_s24, %s11048_s24, %s11049_s29  }
  0xf4   : > { %p10650_p6 = pneg %p10649_p5  ;;  %p10656_p8 = por %p10655_p7, %p10654_p10 }
  0xf6   : > { %p10657_p11 = pnand %p10656_p8, %p10650_p6 }
  0xf8   : > { %10660 = shalt.err (!%p10657_p11)
}
  0xf9   : > { %s12603_s3 = sld [smem:[#allocation55_spill]]  ;;  %s10672_s24 = scalar_lea.vmem %s1022_s10, 32 }
  0xfa   : > { %p10673_p0 = scmp.ne.s32.totalorder %s1022_s10, %s10672_s24  ;;  %p10680_p9 = scmp.lt.s32.totalorder %s1022_s10, %s1022_s10 }
  0xfb   : > { %p10681_p3 = scmp.lt.s32.totalorder %s10672_s24, %s10672_s24 }
  0xfc   : > { %p10675_p1 = pnand %p10673_p0, %p11346_p13 }
  0xfd   : > { %p10682_p4 = por %p10681_p3, %p10680_p9 }
  0xfe   : > { %p10676_p2 = pneg %p10675_p1 }
  0xff   : > { %10016 = dma.hbm_to_vmem [thread:$0]  (!%p11340_p12), %s12603_s3, 128, %s987_s2, [#allocation6]  }
 0x100   : > { %p10683_p5 = pnand %p10682_p4, %p10676_p2 }
 0x102   : > { %10686 = shalt.err (!%p10683_p5)
}
 0x103   : > { %s12604_s6 = sld [smem:[#allocation61_spill]]  ;;  %s11056_s29 = smov [#allocation13]  }
 0x104   : > { %s1050_s26 = sshll.u32 %s11056_s29, 4  ;;  %s1051_s26 = int_to_ptr.vmem [resolvable:$true] %s1050_s26 }
 0x105   : > { %s10698_s28 = scalar_lea.vmem %s1051_s26, 128  ;;  %p10706_p8 = scmp.lt.s32.totalorder %s1051_s26, %s1051_s26 }
 0x106   : > { %p10699_p6 = scmp.ne.s32.totalorder %s1051_s26, %s10698_s28  ;;  %p10707_p11 = scmp.lt.s32.totalorder %s10698_s28, %s10698_s28 }
 0x108   : > { %p10701_p10 = pnand %p10699_p6, %p11346_p13  ;;  %p10708_p0 = por %p10707_p11, %p10706_p8 }
 0x109   : > { %10022 = dma.hbm_to_vmem [thread:$0]  (!%p11340_p12), %s12604_s6, 32, %s1022_s10, [#allocation9], %s12598_s4, %s12598_s4, %s12597_s0  }
 0x10a   : > { %p10702_p7 = pneg %p10701_p10 }
 0x10c   : > { %p10709_p1 = pnand %p10708_p0, %p10702_p7 }
 0x10e   : > { %10712 = shalt.err (!%p10709_p1)
}
 0x10f   : > { %s11057_s12 = smov 64   ;;  %s11058_s2 = smov 4  }
 0x110   : > { %10028 = dma.hbm_to_vmem [thread:$0]  (!%p11340_p12), %s11171_s27, 128, %s1051_s26, [#allocation12], %s11057_s12, %s11057_s12, %s11058_s2  }
 0x111   : > { %s11059_s1 = smov [#allocation16]   ;;  %s11060_s23 = smov [#allocation19]  }
 0x112   : > { %s1082_s10 = sshll.u32 %s11059_s1, 4  ;;  %s1114_s24 = sshll.u32 %s11060_s23, 4  ;;  %s1083_s10 = int_to_ptr.vmem [resolvable:$true] %s1082_s10  ;;  %s1115_s24 = int_to_ptr.vmem [resolvable:$true] %s1114_s24 }
 0x113   : > { %s10724_s29 = scalar_lea.vmem %s1083_s10, 32  ;;  %p10732_p4 = scmp.lt.s32.totalorder %s1083_s10, %s1083_s10 }
 0x114   : > { %p10725_p2 = scmp.ne.s32.totalorder %s1083_s10, %s10724_s29  ;;  %p10733_p5 = scmp.lt.s32.totalorder %s10724_s29, %s10724_s29 }
 0x116   : > { %p10727_p9 = pnand %p10725_p2, %p11346_p13  ;;  %p10734_p6 = por %p10733_p5, %p10732_p4 }
 0x118   : > { %p10728_p3 = pneg %p10727_p9 }
 0x11a   : > { %p10735_p10 = pnand %p10734_p6, %p10728_p3 }
 0x11c   : > { %10738 = shalt.err (!%p10735_p10)
}
 0x11d   : > { %10034 = dma.hbm_to_vmem [thread:$0]  (!%p11340_p12), %s11191_s30, 32, %s1083_s10, [#allocation15], %s12598_s4, %s12598_s4, %s12597_s0  }
 0x11e   : > { %s10750_s26 = scalar_lea.vmem %s1115_s24, 32  ;;  %p10758_p0 = scmp.lt.s32.totalorder %s1115_s24, %s1115_s24 }
 0x11f   : > { %p10751_p7 = scmp.ne.s32.totalorder %s1115_s24, %s10750_s26  ;;  %p10759_p1 = scmp.lt.s32.totalorder %s10750_s26, %s10750_s26 }
 0x121   : > { %p10753_p8 = pnand %p10751_p7, %p11346_p13  ;;  %p10760_p2 = por %p10759_p1, %p10758_p0 }
 0x123   : > { %p10754_p11 = pneg %p10753_p8 }
 0x125   : > { %p10761_p9 = pnand %p10760_p2, %p10754_p11 }
 0x127   : > { %10764 = shalt.err (!%p10761_p9)
}
 0x128   : > { %s12605_s28 = sld [smem:[#allocation69_spill]]  ;;  %s11061_s12 = smov [#allocation22]  }
 0x129   : > { %s1140_s2 = sshll.u32 %s11061_s12, 4  ;;  %s11062_s1 = smov [#allocation25]   ;;  %s1141_s2 = int_to_ptr.vmem [resolvable:$true] %s1140_s2 }
 0x12a   : > { %s1166_s10 = sshll.u32 %s11062_s1, 4  ;;  %s10776_s23 = scalar_lea.vmem %s1141_s2, 32  ;;  %s1167_s10 = int_to_ptr.vmem [resolvable:$true] %s1166_s10 }
 0x12b   : > { %p10777_p3 = scmp.ne.s32.totalorder %s1141_s2, %s10776_s23  ;;  %p10784_p6 = scmp.lt.s32.totalorder %s1141_s2, %s1141_s2 }
 0x12c   : > { %p10785_p10 = scmp.lt.s32.totalorder %s10776_s23, %s10776_s23 }
 0x12d   : > { %p10779_p4 = pnand %p10777_p3, %p11346_p13 }
 0x12e   : > { %10040 = dma.hbm_to_vmem [thread:$0]  (!%p11340_p12), %s12605_s28, 32, %s1115_s24, [#allocation18], %s12598_s4, %s12598_s4, %s12597_s0  }
 0x12f   : > { %p10780_p5 = pneg %p10779_p4  ;;  %p10786_p7 = por %p10785_p10, %p10784_p6 }
 0x131   : > { %p10787_p8 = pnand %p10786_p7, %p10780_p5 }
 0x133   : > { %10790 = shalt.err (!%p10787_p8)
}
 0x134   : > { %s12606_s24 = sld [smem:[#allocation71_spill]]  ;;  %s10802_s29 = scalar_lea.vmem %s1167_s10, 32 }
 0x135   : > { %p10803_p11 = scmp.ne.s32.totalorder %s1167_s10, %s10802_s29  ;;  %p10810_p2 = scmp.lt.s32.totalorder %s1167_s10, %s1167_s10 }
 0x136   : > { %p10811_p9 = scmp.lt.s32.totalorder %s10802_s29, %s10802_s29 }
 0x137   : > { %p10805_p0 = pnand %p10803_p11, %p11346_p13 }
 0x138   : > { %p10812_p3 = por %p10811_p9, %p10810_p2 }
 0x139   : > { %p10806_p1 = pneg %p10805_p0 }
 0x13a   : > { %10046 = dma.hbm_to_vmem [thread:$0]  (!%p11340_p12), %s12606_s24, 32, %s1141_s2, [#allocation21], %s12598_s4, %s12598_s4, %s12597_s0  }
 0x13b   : > { %p10813_p4 = pnand %p10812_p3, %p10806_p1 }
 0x13d   : > { %10816 = shalt.err (!%p10813_p4)
}
 0x13e   : > { %s12607_s26 = sld [smem:[#allocation73_spill]]  ;;  %s11063_s28 = smov [#allocation28]  }
 0x13f   : > { %s1202_s12 = sshll.u32 %s11063_s28, 4  ;;  %s11064_s2 = smov [#allocation31]   ;;  %s1203_s12 = int_to_ptr.vmem [resolvable:$true] %s1202_s12 }
 0x140   : > { %s1226_s1 = sshll.u32 %s11064_s2, 4  ;;  %s10828_s23 = scalar_lea.vmem %s1203_s12, 16  ;;  %s1227_s1 = int_to_ptr.vmem [resolvable:$true] %s1226_s1 }
 0x141   : > { %p10829_p5 = scmp.ne.s32.totalorder %s1203_s12, %s10828_s23  ;;  %s10835_s24 = scalar_lea.vmem %s1203_s12, 32 }
 0x142   : > { %p10836_p7 = scmp.lt.s32.totalorder %s1203_s12, %s1203_s12  ;;  %p10837_p8 = scmp.lt.s32.totalorder %s10835_s24, %s10828_s23 }
 0x143   : > { %p10831_p6 = pnand %p10829_p5, %p11346_p13 }
 0x144   : > { %10052 = dma.hbm_to_vmem [thread:$0]  (!%p11340_p12), %s12607_s26, 32, %s1167_s10, [#allocation24], %s12598_s4, %s12598_s4, %s12597_s0  }
 0x145   : > { %p10832_p10 = pneg %p10831_p6  ;;  %p10838_p11 = por %p10837_p8, %p10836_p7 }
 0x147   : > { %p10839_p0 = pnand %p10838_p11, %p10832_p10 }
 0x149   : > { %10842 = shalt.err (!%p10839_p0)
}
 0x14a   : > { %s12608_s4 = sld [smem:[#allocation78_spill]]  ;;  %s10854_s0 = scalar_lea.vmem %s1227_s1, 16 }
 0x14b   : > { %p10855_p1 = scmp.ne.s32.totalorder %s1227_s1, %s10854_s0  ;;  %s10861_s10 = scalar_lea.vmem %s1227_s1, 32 }
 0x14c   : > { %p10862_p3 = scmp.lt.s32.totalorder %s1227_s1, %s1227_s1  ;;  %p10863_p4 = scmp.lt.s32.totalorder %s10861_s10, %s10854_s0 }
 0x14d   : > { %p10857_p2 = pnand %p10855_p1, %p11346_p13 }
 0x14e   : > { %p10864_p5 = por %p10863_p4, %p10862_p3 }
 0x14f   : > { %p10858_p9 = pneg %p10857_p2 }
 0x150   : > { %10058 = dma.hbm_to_vmem [thread:$0]  (!%p11340_p12), %s12608_s4, 16, %s1203_s12, [#allocation27]  }
 0x151   : > { %p10865_p6 = pnand %p10864_p5, %p10858_p9 }
 0x153   : > { %10868 = shalt.err (!%p10865_p6)
}
 0x154   : > { %s12609_s5 = sld [smem:[#allocation80_spill]]  ;;  %s11065_s29 = smov [#allocation34]  }
 0x155   : > { %s1250_s26 = sshll.u32 %s11065_s29, 4  ;;  %s1251_s26 = int_to_ptr.vmem [resolvable:$true] %s1250_s26 }
 0x156   : > { %s10880_s28 = scalar_lea.vmem %s1251_s26, 16  ;;  %s10887_s12 = scalar_lea.vmem %s1251_s26, 32 }
 0x157   : > { %p10881_p10 = scmp.ne.s32.totalorder %s1251_s26, %s10880_s28  ;;  %p10888_p11 = scmp.lt.s32.totalorder %s1251_s26, %s1251_s26 }
 0x158   : > { %p10889_p0 = scmp.lt.s32.totalorder %s10887_s12, %s10880_s28 }
 0x159   : > { %p10883_p7 = pnand %p10881_p10, %p11346_p13 }
 0x15a   : > { %10064 = dma.hbm_to_vmem [thread:$0]  (!%p11340_p12), %s12609_s5, 16, %s1227_s1, [#allocation30]  }
 0x15b   : > { %p10884_p8 = pneg %p10883_p7  ;;  %p10890_p1 = por %p10889_p0, %p10888_p11 }
 0x15d   : > { %p10891_p2 = pnand %p10890_p1, %p10884_p8 }
 0x15f   : > { %10894 = shalt.err (!%p10891_p2)
}
 0x160   : > { %s12610_s21 = sld [smem:[#allocation82_spill]]  ;;  %p12611_p9 = scmp.ne.s32.totalorder %s12588_s11, 0 }
 0x161   : > { %p12612_p3 = scmp.eq.s32.totalorder (!%p12611_p9), %s11304_s22, 0 }
 0x162   : > { %1278 = sbr.rel (%p12611_p9) target bundleno = 12262 (0x2fe6), region = 172 }
 0x166   : > { %10070 = dma.hbm_to_vmem [thread:$0]  (!%p11340_p12), %s12610_s21, 16, %s1251_s26, [#allocation33]  }
 0x167   : > { %10938 = dma.done.wait (%p12612_p3), [#allocation3], 256   ;;  %p12613_p4 = pmov %p12612_p3 }
 0x168   : > { %p12614_p13 = pmov %p12612_p3 }
 0x169   : > { %10940 = vsyncadd (%p12613_p4), [#allocation3], 4294967040 }
 0x16a   : > { %10942 = dma.done.wait (%p12614_p13), [#allocation6], 256   ;;  %p12615_p5 = pmov %p12612_p3 }
 0x16b   : > { %p12616_p6 = pmov %p12612_p3 }
 0x16c   : > { %10944 = vsyncadd (%p12615_p5), [#allocation6], 4294967040 }
 0x16d   : > { %10946 = dma.done.wait (%p12616_p6), [#allocation9], 64   ;;  %p12617_p12 = pmov %p12612_p3 }
 0x16e   : > { %p12618_p10 = pmov %p12612_p3 }
 0x16f   : > { %10948 = vsyncadd (%p12617_p12), [#allocation9], 4294967232 }
 0x170   : > { %10950 = dma.done.wait (%p12618_p10), [#allocation12], 160   ;;  %p12619_p7 = pmov %p12612_p3 }
 0x171   : > { %p12620_p8 = pmov %p12612_p3 }
 0x172   : > { %10952 = vsyncadd (%p12619_p7), [#allocation12], 4294967136 }
 0x173   : > { %10954 = dma.done.wait (%p12620_p8), [#allocation15], 64   ;;  %p12621_p11 = pmov %p12612_p3 }
 0x174   : > { %p12622_p0 = pmov %p12612_p3 }
 0x175   : > { %10956 = vsyncadd (%p12621_p11), [#allocation15], 4294967232 }
 0x176   : > { %10958 = dma.done.wait (%p12622_p0), [#allocation18], 64   ;;  %p12623_p1 = pmov %p12622_p0 }
 0x177   : > { %p12624_p2 = pmov %p12622_p0 }
 0x178   : > { %10960 = vsyncadd (%p12623_p1), [#allocation18], 4294967232 }
 0x179   : > { %10962 = dma.done.wait (%p12624_p2), [#allocation21], 1056   ;;  %p12625_p9 = pmov %p12622_p0 }
 0x17a   : > { %p12626_p3 = pmov %p12622_p0 }
 0x17b   : > { %10964 = vsyncadd (%p12625_p9), [#allocation21], 4294966240 }
 0x17c   : > { %10966 = dma.done.wait (%p12626_p3), [#allocation24], 1056   ;;  %p12627_p4 = pmov %p12622_p0 }
 0x17d   : > { %p12628_p13 = pmov %p12622_p0 }
 0x17e   : > { %10968 = vsyncadd (%p12627_p4), [#allocation24], 4294966240 }
 0x17f   : > { %10970 = dma.done.wait (%p12628_p13), [#allocation27], 48   ;;  %p12629_p5 = pmov %p12622_p0 }
 0x180   : > { %p12630_p6 = pmov %p12622_p0 }
 0x181   : > { %10972 = vsyncadd (%p12629_p5), [#allocation27], 4294967248 }
 0x182   : > { %10974 = dma.done.wait (%p12630_p6), [#allocation30], 784   ;;  %p12631_p12 = pmov %p12622_p0 }
 0x183   : > { %p12632_p10 = pmov %p12622_p0 }
 0x184   : > { %10976 = vsyncadd (%p12631_p12), [#allocation30], 4294966512 }
 0x185   : > { %10978 = dma.done.wait (%p12632_p10), [#allocation33], 784   ;;  %p12633_p7 = pmov %p12622_p0 }
 0x186   : > { %s12634_s15 = sld [smem:[#allocation48_spill]]  ;;  %p1456_p8 = scmp.lt.s32.totalorder %s11304_s22, 1  ;;  %vm1476_vm0 = vcmask 130048   ;;  %v1466_v0 = vld [vmem:[#allocation2 + $0x8] sm:$0xff]  ;;  %v1465_v1 = vld [vmem:[#allocation2] sm:$0xff]  ;;  %v11066_v4 = vmov 0.0  }
 0x187   : > { %10980 = vsyncadd (%p12633_p7), [#allocation33], 4294966512  ;;  %9333 = vmatprep.subr.mxu0 %v1466_v0  ;;  %s12635_s1 = sld [smem:[#allocation51_spill]]  ;;  %9340 = vmatprep.subr.mxu1 %v11066_v4  ;;  %vm11067_vm1 = vmmov 0   ;;  %vm1567_vm2 = vcmask 1043456   ;;  %v1562_v14 = vld [vmem:[#allocation5] sm:$0xff] }
 0x188   : > { %s11548_s18 = scalar_select %p1456_p8, %s11304_s22, 1  ;;  %9334 = vmatpush3.msra.mxu0 %v1466_v0  ;;  %9344 = vmatprep.mubr.msk.f32.mxu1 %vm11067_vm1, %v11066_v4  ;;  %vm1563_vm3 = vcmask 97280   ;;  %vm1729_vm4 = vcmask 261120   ;;  %vm1811_vm5 = vcmask 64512   ;;  %vm2486_vm6 = vcmask 195584  }
 0x189   : > { %s12636_s23 = sld [smem:[#allocation52_spill]]  ;;  %9335 = vmatprep.subr.mxu0 %v1465_v1  ;;  %s12534_s28 = smov 120   ;;  %vm2694_vm7 = vcmask 523264  }
 0x18a   : > { %s9077_s11 = sshll.u32 %s11548_s18, 4  ;;  %9336 = vmatpush3.msra.mxu0 %v1465_v1  ;;  %s12637_s24 = sld [smem:[#allocation56_spill]] }
 0x18b   : > { %9347 = vmatprep.subr.mxu0 %v11066_v4  ;;  %s12638_s4 = sld [smem:[#allocation49_spill]]  ;;  %s8894_s29 = sshll.u32 %s11548_s18, 3 }
 0x18c   : > { %s1460_s2 = scalar_lea.vmem %s12634_s15, %s9077_s11  ;;  %s12639_s0 = sld [smem:[#allocation57_spill]] }
 0x18d   : > { %v1468_v2 = vld [vmem:[%s1460_s2] sm:$0xff]  ;;  %v1469_v3 = vld [vmem:[%s1460_s2 + $0x8] sm:$0xf]  ;;  %s12538_s12 = smov 96   ;;  %s12536_s15 = smov 80  }
 0x18e   : > { %9337 = vmatprep.mubr.msk.f32.mxu0 %vm1476_vm0, %v1468_v2  ;;  %v8895_v5 = vld [vmem:[%s12635_s1] ss:$0 sm:$0xff]  ;;  %s12540_s18 = smov 88   ;;  %s12524_s11 = smov 72  }
 0x18f   : > { %9338 = vmatmul.mubr.msk.f32.vlgmr.msra.gmra.mxu0 %vm1476_vm0, %v1469_v3  ;;  %v1559_v7 = vld [vmem:[%s12636_s23 + $0x8] sm:$0xf]  ;;  %v1558_v10 = vld [vmem:[%s12636_s23] sm:$0xff]  ;;  %s12532_s2 = smov 112   ;;  %s12652_s3 = smov 24  }
 0x190   : > { %9348 = vmatpush3.msra.mxu0 %v1466_v0  ;;  %9351 = vmatprep.mubr.msk.f32.mxu0 %vm11067_vm1, %v11066_v4  ;;  %v1721_v15 = vld [vmem:[%s12637_s24 + $0x18] sm:$0xff]  ;;  %v1720_v16 = vld [vmem:[%s12637_s24 + $0x10] sm:$0xff]  ;;  %v1719_v17 = vld [vmem:[%s12637_s24 + $0x8] sm:$0xff]  ;;  %s12653_s5 = sld [smem:[#allocation64_spill]]  ;;  %s12657_s8 = smov 80  }
 0x191   : > { %9349 = vmatprep.subr.mxu0 %v11066_v4  ;;  %v1718_v18 = vld [vmem:[%s12637_s24] sm:$0xff]  ;;  %s1464_s26 = scalar_lea.vmem %s12638_s4, %s8894_s29  ;;  %s12530_s4 = smov 104  }
 0x192   : > { %9350 = vmatpush3.msra.mxu0 %v1465_v1  ;;  %s12640_s10 = smov %s12639_s0  ;;  %v1641_v21 = vld [vmem:[%s1464_s26] sm:$0xff]  ;;  %s12520_s29 = smov 64  }
 0x193   : > { %9365 = vmatprep.subr.mxu0 %v11066_v4  ;;  %9352 = vmatmul.mubr.msk.f32.vlgmr.msra.gmra.mxu0 %vm1476_vm0, %v1641_v21  ;;  %v8901_v22 = vld [vmem:[%s12639_s0] ss:$0 sm:$0xff]  ;;  %s12514_s0 = smov 56   ;;  %s12518_s26 = smov 48  }
 0x194   : > { %9367 = vmatprep.mubr.msk.f32.mxu0 %vm11067_vm1, %v11066_v4  ;;  %s12654_s6 = sld [smem:[#allocation53_spill]]  ;;  %s12658_s9 = smov 120  }
 0x195   : > { %s12661_s13 = sld [smem:[#allocation65_spill]]  ;;  %p12667_p0 = scmp.ne.s32.totalorder %s12585_s7, 0 }
 0x196   : > { %s12662_s17 = sld [smem:[#allocation68_spill]] }
 0x197   : > { %s12663_s19 = sld [smem:[#allocation66_spill]] }
 0x198   : > { %s12664_s20 = sld [smem:[#allocation76_spill]] }
 0x199   : > { %s12665_s21 = sld [smem:[#allocation74_spill]] }
 0x24f   : > { %v9339_v6 = vpop.f32.mrf.mxu0 }
 0x250   : > { %v1555_v8 = vadd.f32 %v9339_v6, %v8895_v5 }
 0x251   : > { %v1549_v9 = vpop.f32.mrf.mxu0 }
 0x252   : > { %v1561_v11 = vadd.f32 %v1559_v7, %v1555_v8  ;;  %v1550_v12 = vadd.f32 %v8895_v5, %v1549_v9 }
 0x253   : > { %v11605_v26 = vpop.f32.mrf.mxu0 }
 0x254   : > { %v1560_v13 = vadd.f32 %v1558_v10, %v1550_v12  ;;  %9341 = vmatpush3.msk.msra.mxu1 %vm1567_vm2, %v1561_v11 }
 0x255   : > { %9342 = vmatprep.subr.mxu1 %v11066_v4  ;;  %v9353_v27 = vpop.f32.mrf.mxu0 }
 0x256   : > { %9343 = vmatpush3.msra.mxu1 %v1560_v13 }
 0x257   : > { %9345 = vmatmul.mubr.msk.f32.vlgmr.msra.gmra.mxu1 %vm1563_vm3, %v1562_v14  ;;  %9354 = vmatprep.subr.mxu1 %v11066_v4 }
 0x258   : > { %9355 = vmatpush3.msra.mxu1 %v1721_v15  ;;  %9362 = vmatprep.mubr.msk.f32.mxu1 %vm11067_vm1, %v11066_v4 }
 0x259   : > { %9356 = vmatprep.subr.mxu1 %v11066_v4 }
 0x25a   : > { %9357 = vmatpush3.msra.mxu1 %v1720_v16 }
 0x25b   : > { %9358 = vmatprep.subr.mxu1 %v11066_v4 }
 0x25c   : > { %9359 = vmatpush3.msra.mxu1 %v1719_v17 }
 0x25d   : > { %9360 = vmatprep.subr.mxu1 %v11066_v4 }
 0x25e   : > { %9361 = vmatpush3.msra.mxu1 %v1718_v18 }
 0x25f   : > { %9375 = vmatprep.subr.mxu1 %v11066_v4 }
 0x317   : > { %v11577_v19 = vpop.f32.mrf.mxu1 }
 0x318   : > { %9363 = vmatmul.mubr.msk.f32.vlgmr.msra.gmra.mxu1 %vm1729_vm4, %v11577_v19 }
 0x319   : > { %v9346_v20 = vpop.f32.mrf.mxu1  ;;  %9377 = vmatprep.mubr.msk.f32.mxu1 %vm11067_vm1, %v11066_v4 }
 0x3d8   : > { %v1799_v23 = vpop.f32.mrf.mxu1 }
 0x3d9   : > { %v11589_v24 = vadd.f32 %v8901_v22, %v1799_v23 }
 0x3da   : > { %v9364_v25 = vpop.f32.mrf.mxu1 }
 0x3db   : > { %1974 = vrot.lane.b32.xlu1 %v11589_v24, %s12534_s28  ;;  %1809 = vrot.lane.b32.xlu0 %v11589_v24, %s12538_s12 }
 0x3df   : > { %2142 = vrot.lane.b32.xlu1 %v11589_v24, %s12536_s15  ;;  %1976 = vrot.lane.b32.xlu0 %v11589_v24, %s12540_s18 }
 0x3e3   : > { %2308 = vrot.lane.b32.xlu1 %v11589_v24, %s12524_s11  ;;  %2140 = vrot.lane.b32.xlu0 %v11589_v24, %s12532_s2  ;;  %s12643_s11 = sld [smem:[#allocation60_spill]] }
 0x3e7   : > { %2306 = vrot.lane.b32.xlu0 %v11589_v24, %s12530_s4 }
 0x44d   : > { %v1975_v28 = vpop.permute.xlu1 %1974  ;;  %v1810_v29 = vpop.permute.xlu0 %1809 }
 0x44e   : > { %9366 = vmatpush3.xpose.msk.msra.mxu0 %vm1811_vm5, %v1810_v29 }
 0x44f   : > { %9370 = vmatprep.subr.mxu0 %v11066_v4 }
 0x451   : > { %9368 = vmatmul.mubr.msk.f32.vlgmr.msra.gmra.mxu0 %vm1811_vm5, %v11589_v24  ;;  %v1977_v30 = vpop.permute.xlu0 %1976  ;;  %v2143_v31 = vpop.permute.xlu1 %2142 }
 0x452   : > { %9376 = vmatpush3.xpose.msk.msra.mxu1 %vm1811_vm5, %v1977_v30  ;;  %9372 = vmatprep.mubr.msk.f32.mxu0 %vm11067_vm1, %v11066_v4 }
 0x453   : > { %9385 = vmatprep.subr.mxu1 %v11066_v4 }
 0x455   : > { %9378 = vmatmul.mubr.msk.f32.vlgmr.msra.gmra.mxu1 %vm1811_vm5, %v1975_v28  ;;  %v2141_v32 = vpop.permute.xlu0 %2140  ;;  %v2309_v33 = vpop.permute.xlu1 %2308 }
 0x456   : > { %9386 = vmatpush3.xpose.msk.msra.mxu1 %vm1811_vm5, %v2143_v31  ;;  %9387 = vmatprep.mubr.msk.f32.mxu1 %vm11067_vm1, %v11066_v4 }
 0x457   : > { %9395 = vmatprep.subr.mxu1 %v11066_v4 }
 0x459   : > { %9388 = vmatmul.mubr.msk.f32.vlgmr.msra.gmra.mxu1 %vm1811_vm5, %v2141_v32  ;;  %v2307_v34 = vpop.permute.xlu0 %2306 }
 0x45a   : > { %9396 = vmatpush3.xpose.msk.msra.mxu1 %vm1811_vm5, %v2309_v33  ;;  %9397 = vmatprep.mubr.msk.f32.mxu1 %vm11067_vm1, %v11066_v4 }
 0x45b   : > { %9405 = vmatprep.subr.mxu1 %v11066_v4 }
 0x45d   : > { %9398 = vmatmul.mubr.msk.f32.vlgmr.msra.gmra.mxu1 %vm1811_vm5, %v2307_v34 }
 0x45e   : > { %9413 = vmatprep.mubr.msk.f32.mxu1 %vm11067_vm1, %v11066_v4 }
 0x511   : > { %v1882_v35 = vpop.f32.mrf.mxu0 }
 0x512   : > { %v1886_v36 = vmul.f32 0.35355338, %v1882_v35 }
 0x513   : > { %v9369_v37 = vpop.f32.mrf.mxu0 }
 0x514   : > { %v1887_v38 = vsel %vm1811_vm5, %v1886_v36, -inf }
 0x515   : > { %1888 = vmax.xlane.f32.xlu1 %v1887_v38  ;;  %v2048_v39 = vpop.f32.mrf.mxu1 }
 0x516   : > { %v2052_v40 = vmul.f32 0.35355338, %v2048_v39 }
 0x517   : > { %v9379_v41 = vpop.f32.mrf.mxu1 }
 0x518   : > { %v2053_v42 = vsel %vm1811_vm5, %v2052_v40, -inf }
 0x519   : > { %2054 = vmax.xlane.f32.xlu0 %v2053_v42  ;;  %v2214_v43 = vpop.f32.mrf.mxu1 }
 0x51a   : > { %v2218_v44 = vmul.f32 0.35355338, %v2214_v43 }
 0x51b   : > { %v9389_v45 = vpop.f32.mrf.mxu1 }
 0x51c   : > { %v2219_v46 = vsel %vm1811_vm5, %v2218_v44, -inf }
 0x51d   : > { %2220 = vmax.xlane.f32.xlu0 %v2219_v46  ;;  %v2380_v47 = vpop.f32.mrf.mxu1 }
 0x51e   : > { %v2384_v48 = vmul.f32 0.35355338, %v2380_v47 }
 0x51f   : > { %v9399_v49 = vpop.f32.mrf.mxu1 }
 0x520   : > { %v2385_v50 = vsel %vm1811_vm5, %v2384_v48, -inf }
 0x521   : > { %2386 = vmax.xlane.f32.xlu1 %v2385_v50 }
 0x532   : > { %2064 = vrot.lane.b32.xlu1 %v11589_v24, %s12514_s0  ;;  %s12516_s0 = smov 40  }
 0x59e   : > { %v1889_v51 = vpop.xlane.xlu1 %1888 }
 0x59f   : > { %v1890_v52 = vsub.f32 %v1886_v36, %v1889_v51 }
 0x5a1   : > { %v1891_v53 = vmul.f32 1.442695, %v1890_v52  ;;  %v2597_v52 = vld [vmem:[%s12643_s11 + $0x18] sm:$0xff] }
 0x5a2   : > { %v2055_v54 = vpop.xlane.xlu0 %2054 }
 0x5a3   : > { %10231 = vpow2.f32 %v1891_v53  ;;  %v2056_v55 = vsub.f32 %v2052_v40, %v2055_v54  ;;  %v2596_v53 = vld [vmem:[%s12643_s11 + $0x10] sm:$0xff]  ;;  %v2595_v54 = vld [vmem:[%s12643_s11 + $0x8] sm:$0xff] }
 0x5a5   : > { %v2057_v56 = vmul.f32 1.442695, %v2056_v55 }
 0x5a6   : > { %v2221_v2 = vpop.xlane.xlu0 %2220 }
 0x5a7   : > { %10233 = vpow2.f32 %v2057_v56  ;;  %v2222_v3 = vsub.f32 %v2218_v44, %v2221_v2  ;;  %v8915_v44 = vld [vmem:[#allocation8] ss:$0 sm:$0xff] }
 0x5a9   : > { %v2223_v5 = vmul.f32 1.442695, %v2222_v3  ;;  %v2584_v3 = vlaneseq }
 0x5aa   : > { %v2387_v57 = vpop.xlane.xlu1 %2386 }
 0x5ab   : > { %v2388_v58 = vsub.f32 %v2384_v48, %v2387_v57 }
 0x5ad   : > { %v2389_v59 = vmul.f32 1.442695, %v2388_v58 }
 0x5ae   : > { %v2065_v8 = vpop.permute.xlu1 %2064 }
 0x5af   : > { %10235 = vpow2.f32 %v2389_v59 }
 0x5b0   : > { %v10232_v60 = vpop.eup %10231  ;;  %10237 = vpow2.f32 %v2223_v5  ;;  %v11698_v5 = vshrl.u32 %v2584_v3, 7 }
 0x5b1   : > { %v1893_v61 = vsel %vm1811_vm5, %v10232_v60, 0.0 }
 0x5b2   : > { %1894 = vadd.xlane.f32.xlu0 %v1893_v61  ;;  %vm8037_vm8 = vcmp.eq.s32.totalorder %v11698_v5, 7  ;;  %vm8036_vm9 = vcmp.eq.s32.totalorder %v11698_v5, 0 }
 0x5b4   : > { %v10234_v62 = vpop.eup %10233 }
 0x5b5   : > { %v2059_v63 = vsel %vm1811_vm5, %v10234_v62, 0.0 }
 0x5b6   : > { %2060 = vadd.xlane.f32.xlu1 %v2059_v63 }
 0x5bc   : > { %v10236_v0 = vpop.eup %10235 }
 0x5bd   : > { %v2391_v1 = vsel %vm1811_vm5, %v10236_v0, 0.0  ;;  %v10238_v6 = vpop.eup %10237 }
 0x5be   : > { %2392 = vadd.xlane.f32.xlu1 %v2391_v1  ;;  %v2225_v7 = vsel %vm1811_vm5, %v10238_v6, 0.0 }
 0x5c8   : > { %1898 = vrot.lane.b32.xlu0 %v11589_v24, %s12520_s29  ;;  %s12522_s29 = smov 8  }
 0x5cf   : > { %2230 = vrot.lane.b32.xlu1 %v11589_v24, %s12518_s26 }
 0x5e7   : > { %2226 = vadd.xlane.f32.xlu0 %v2225_v7  ;;  %v11703_v7 = vld [vmem:[#allocation13] sm:$0xf] }
 0x5fd   : > { %2396 = vrot.lane.b32.xlu0 %v11589_v24, %s12516_s0  ;;  %s12641_s0 = sld [smem:[#allocation58_spill]] }
 0x603   : > { %s12642_s26 = smov %s12641_s0  ;;  %v1806_v25 = vld [vmem:[%s12641_s0 + $0x18] sm:$0xff]  ;;  %s12528_s0 = smov 16  }
 0x604   : > { %9406 = vmatpush3.msra.mxu1 %v1806_v25  ;;  %v1805_v31 = vld [vmem:[%s12642_s26 + $0x10] sm:$0xff]  ;;  %v1804_v32 = vld [vmem:[%s12642_s26 + $0x8] sm:$0xff]  ;;  %v1803_v33 = vld [vmem:[%s12642_s26] sm:$0xff] }
 0x605   : > { %9407 = vmatprep.subr.mxu1 %v11066_v4  ;;  %v8919_v25 = vld [vmem:[#allocation11] ss:$0 sm:$0xff] }
 0x606   : > { %9408 = vmatpush3.msra.mxu1 %v1805_v31 }
 0x607   : > { %9409 = vmatprep.subr.mxu1 %v11066_v4 }
 0x608   : > { %9410 = vmatpush3.msra.mxu1 %v1804_v32 }
 0x609   : > { %9411 = vmatprep.subr.mxu1 %v11066_v4 }
 0x60a   : > { %9412 = vmatpush3.msra.mxu1 %v1803_v33 }
 0x60b   : > { %9427 = vmatprep.subr.mxu1 %v11066_v4 }
 0x63b   : > { %v1895_v9 = vpop.xlane.xlu0 %1894 }
 0x63c   : > { %10239 = vrcp.f32 %v1895_v9 }
 0x63f   : > { %v1899_v10 = vpop.permute.xlu0 %1898  ;;  %v2061_v11 = vpop.xlane.xlu1 %2060 }
 0x640   : > { %10241 = vrcp.f32 %v2061_v11  ;;  %9371 = vmatpush3.msra.mxu0 %v1899_v10 }
 0x641   : > { %9380 = vmatprep.subr.mxu0 %v11066_v4 }
 0x647   : > { %v2393_v13 = vpop.xlane.xlu1 %2392 }
 0x649   : > { %v10240_v12 = vpop.eup %10239 }
 0x64a   : > { %v1897_v14 = vmul.f32 %v10240_v12, %v10232_v60 }
 0x64b   : > { %v2231_v17 = vpop.permute.xlu1 %2230 }
 0x64c   : > { %9373 = vmatmul.mubr.msk.f32.vlgmr.msra.gmra.mxu0 %vm1811_vm5, %v1897_v14 }
 0x64d   : > { %v10242_v15 = vpop.eup %10241  ;;  %9381 = vmatpush3.msra.mxu0 %v2065_v8  ;;  %9382 = vmatprep.mubr.msk.f32.mxu0 %vm11067_vm1, %v11066_v4  ;;  %v11706_v8 = vsub.s32 1, %v11698_v5 }
 0x64e   : > { %9390 = vmatprep.subr.mxu0 %v11066_v4  ;;  %v2063_v16 = vmul.f32 %v10242_v15, %v10234_v62 }
 0x650   : > { %9383 = vmatmul.mubr.msk.f32.vlgmr.msra.gmra.mxu0 %vm1811_vm5, %v2063_v16 }
 0x651   : > { %9391 = vmatpush3.msra.mxu0 %v2231_v17  ;;  %9392 = vmatprep.mubr.msk.f32.mxu0 %vm11067_vm1, %v11066_v4 }
 0x652   : > { %9400 = vmatprep.subr.mxu0 %v11066_v4 }
 0x670   : > { %v2227_v18 = vpop.xlane.xlu0 %2226 }
 0x671   : > { %10243 = vrcp.f32 %v2227_v18 }
 0x672   : > { %10245 = vrcp.f32 %v2393_v13  ;;  %v2592_v13 = vrot.slane %v11703_v7, %v11706_v8 }
 0x674   : > { %v2397_v23 = vpop.permute.xlu0 %2396 }
 0x67e   : > { %v10244_v20 = vpop.eup %10243 }
 0x67f   : > { %v2229_v21 = vmul.f32 %v10244_v20, %v10238_v6  ;;  %v10246_v22 = vpop.eup %10245  ;;  %v11701_v6 = vsub.s32 0, %v11698_v5  ;;  %v8917_v20 = vld [vmem:[#allocation10] ss:$0 sm:$0xff] }
 0x680   : > { %v2395_v24 = vmul.f32 %v10246_v22, %v10236_v0 }
 0x681   : > { %9393 = vmatmul.mubr.msk.f32.vlgmr.msra.gmra.mxu0 %vm1811_vm5, %v2229_v21  ;;  %v2587_v10 = vrot.slane %v11703_v7, %v11701_v6 }
 0x682   : > { %9401 = vmatpush3.msra.mxu0 %v2397_v23  ;;  %9402 = vmatprep.mubr.msk.f32.mxu0 %vm11067_vm1, %v11066_v4 }
 0x683   : > { %9416 = vmatprep.subr.mxu0 %v11066_v4 }
 0x685   : > { %9403 = vmatmul.mubr.msk.f32.vlgmr.msra.gmra.mxu0 %vm1811_vm5, %v2395_v24 }
 0x686   : > { %9424 = vmatprep.mubr.msk.f32.mxu0 %vm11067_vm1, %v11066_v4  ;;  %9417 = vmatpush3.msra.mxu0 %v2597_v52 }
 0x687   : > { %9418 = vmatprep.subr.mxu0 %v11066_v4 }
 0x688   : > { %9419 = vmatpush3.msra.mxu0 %v2596_v53 }
 0x689   : > { %9420 = vmatprep.subr.mxu0 %v11066_v4 }
 0x68a   : > { %9421 = vmatpush3.msra.mxu0 %v2595_v54  ;;  %v8926_v54 = vld [vmem:[%s12640_s10 + $0x1] ss:$0 sm:$0xff]  ;;  %s12659_s10 = smov 112  }
 0x68b   : > { %9422 = vmatprep.subr.mxu0 %v11066_v4 }
 0x70c   : > { %v1970_v27 = vpop.f32.mrf.mxu0 }
 0x70e   : > { %v9374_v28 = vpop.f32.mrf.mxu0 }
 0x710   : > { %v2136_v29 = vpop.f32.mrf.mxu0 }
 0x711   : > { %2473 = vrot.lane.b32.xlu1 %v2136_v29, %s12522_s29  ;;  %s12526_s29 = smov 24  }
 0x712   : > { %v9384_v30 = vpop.f32.mrf.mxu0 }
 0x741   : > { %v2302_v34 = vpop.f32.mrf.mxu0 }
 0x742   : > { %2477 = vrot.lane.b32.xlu0 %v2302_v34, %s12528_s0  ;;  %v8924_v34 = vld [vmem:[%s12637_s24 + $0x38] sm:$0xff]  ;;  %s12645_s0 = smov 72  }
 0x743   : > { %v9394_v35 = vpop.f32.mrf.mxu0 }
 0x744   : > { %v8923_v35 = vld [vmem:[%s12637_s24 + $0x30] sm:$0xff] }
 0x745   : > { %v2468_v36 = vpop.f32.mrf.mxu0 }
 0x746   : > { %2481 = vrot.lane.b32.xlu1 %v2468_v36, %s12526_s29  ;;  %s12644_s29 = sld [smem:[#allocation62_spill]]  ;;  %v8922_v36 = vld [vmem:[%s12637_s24 + $0x28] sm:$0xff] }
 0x747   : > { %v9404_v37 = vpop.f32.mrf.mxu0 }
 0x748   : > { %v8921_v37 = vld [vmem:[%s12637_s24 + $0x20] sm:$0xff] }
 0x74c   : > { %v2686_v55 = vld [vmem:[%s12644_s29 + $0x38] sm:$0xff]  ;;  %v2685_v56 = vld [vmem:[%s12644_s29 + $0x30] sm:$0xff]  ;;  %v2684_v57 = vld [vmem:[%s12644_s29 + $0x28] sm:$0xff] }
 0x74d   : > { %v2683_v58 = vld [vmem:[%s12644_s29 + $0x20] sm:$0xff]  ;;  %v2682_v59 = vld [vmem:[%s12644_s29 + $0x18] sm:$0xff]  ;;  %v2681_v16 = vld [vmem:[%s12644_s29 + $0x10] sm:$0xff] }
 0x74e   : > { %v2680_v17 = vld [vmem:[%s12644_s29 + $0x8] sm:$0xff]  ;;  %v2679_v18 = vld [vmem:[%s12644_s29] sm:$0xff] }
 0x783   : > { %v2474_v38 = vpop.permute.xlu1 %2473 }
 0x784   : > { %v2484_v40 = vsel %vm1811_vm5, %v1970_v27, %v2474_v38 }
 0x7b4   : > { %v2478_v39 = vpop.permute.xlu0 %2477 }
 0x7b5   : > { %v2485_v41 = vsel %vm1476_vm0, %v2484_v40, %v2478_v39 }
 0x7b8   : > { %v2482_v42 = vpop.permute.xlu1 %2481 }
 0x7b9   : > { %v2487_v43 = vsel %vm2486_vm6, %v2485_v41, %v2482_v42 }
 0x7ba   : > { %9414 = vmatmul.mubr.msk.f32.vlgmr.msra.gmra.mxu1 %vm1729_vm4, %v2487_v43 }
 0x7bb   : > { %9443 = vmatprep.mubr.msk.f32.mxu1 %vm11067_vm1, %v11066_v4  ;;  %9428 = vmatpush3.msra.mxu1 %v2686_v55 }
 0x7bc   : > { %9429 = vmatprep.subr.mxu1 %v11066_v4 }
 0x7bd   : > { %9430 = vmatpush3.msra.mxu1 %v2685_v56 }
 0x7be   : > { %9431 = vmatprep.subr.mxu1 %v11066_v4 }
 0x7bf   : > { %9432 = vmatpush3.msra.mxu1 %v2684_v57 }
 0x7c0   : > { %9433 = vmatprep.subr.mxu1 %v11066_v4 }
 0x7c1   : > { %9434 = vmatpush3.msra.mxu1 %v2683_v58 }
 0x7c2   : > { %9435 = vmatprep.subr.mxu1 %v11066_v4 }
 0x7c3   : > { %9436 = vmatpush3.msra.mxu1 %v2682_v59 }
 0x7c4   : > { %9437 = vmatprep.subr.mxu1 %v11066_v4 }
 0x7c5   : > { %9438 = vmatpush3.msra.mxu1 %v2681_v16 }
 0x7c6   : > { %9439 = vmatprep.subr.mxu1 %v11066_v4 }
 0x7c7   : > { %9440 = vmatpush3.msra.mxu1 %v2680_v17 }
 0x7c8   : > { %9441 = vmatprep.subr.mxu1 %v11066_v4 }
 0x7c9   : > { %9442 = vmatpush3.msra.mxu1 %v2679_v18 }
 0x7ca   : > { %9467 = vmatprep.subr.mxu1 %v11066_v4 }
 0x87a   : > { %v2563_v45 = vpop.f32.mrf.mxu1 }
 0x87b   : > { %v2564_v46 = vadd.f32 %v8915_v44, %v2563_v45  ;;  %v11735_v45 = vsub.s32 2, %v11698_v5 }
 0x87c   : > { %v9415_v47 = vpop.f32.mrf.mxu1 }
 0x87d   : > { %v2567_v48 = vadd.f32 %v2564_v46, %v11577_v19  ;;  %v2594_v19 = vld [vmem:[%s12643_s11] sm:$0xff]  ;;  %v11738_v46 = vsub.s32 3, %v11698_v5 }
 0x87e   : > { %9423 = vmatpush3.msra.mxu0 %v2594_v19 }
 0x87f   : > { %v2568_v49 = vsel %vm1729_vm4, %v2567_v48, 0.0  ;;  %v2573_v50 = vmul.f32 %v2567_v48, %v2567_v48  ;;  %9446 = vmatprep.subr.mxu0 %v11066_v4 }
 0x880   : > { %2569 = vadd.xlane.f32.xlu0 %v2568_v49 }
 0x881   : > { %v2574_v51 = vsel %vm1729_vm4, %v2573_v50, 0.0 }
 0x882   : > { %2575 = vadd.xlane.f32.xlu1 %v2574_v51  ;;  %v2792_v51 = vrot.slane %v11703_v7, %v11738_v46 }
 0x909   : > { %v2570_v60 = vpop.xlane.xlu0 %2569 }
 0x90a   : > { %v2572_v61 = vmul.f32 0.03125, %v2570_v60 }
 0x90b   : > { %v2576_v62 = vpop.xlane.xlu1 %2575 }
 0x90c   : > { %v2578_v63 = vmul.f32 %v2572_v61, %v2572_v61  ;;  %v2577_v0 = vmul.f32 0.03125, %v2576_v62  ;;  %v2580_v9 = vsub.f32 %v2567_v48, %v2572_v61  ;;  %v2787_v48 = vrot.slane %v11703_v7, %v11735_v45 }
 0x90e   : > { %v2579_v1 = vsub.f32 %v2577_v0, %v2578_v63 }
 0x910   : > { %v2581_v2 = vadd.f32 1e-05, %v2579_v1 }
 0x912   : > { %10247 = vrsqrt.f32 %v2581_v2 }
 0x91f   : > { %v10248_v11 = vpop.eup %10247 }
 0x920   : > { %v2583_v12 = vmul.f32 %v10248_v11, %v2580_v9 }
 0x922   : > { %v2588_v14 = vmul.f32 %v2587_v10, %v2583_v12 }
 0x924   : > { %v2593_v15 = vadd.f32 %v2592_v13, %v2588_v14 }
 0x926   : > { %9425 = vmatmul.mubr.msk.f32.vlgmr.msra.gmra.mxu0 %vm1729_vm4, %v2593_v15 }
 0x927   : > { %9454 = vmatprep.mubr.msk.f32.mxu0 %vm11067_vm1, %v11066_v4  ;;  %9447 = vmatpush3.msra.mxu0 %v8924_v34 }
 0x928   : > { %9448 = vmatprep.subr.mxu0 %v11066_v4 }
 0x929   : > { %9449 = vmatpush3.msra.mxu0 %v8923_v35 }
 0x92a   : > { %9450 = vmatprep.subr.mxu0 %v11066_v4 }
 0x92b   : > { %9451 = vmatpush3.msra.mxu0 %v8922_v36 }
 0x92c   : > { %9452 = vmatprep.subr.mxu0 %v11066_v4 }
 0x92d   : > { %9453 = vmatpush3.msra.mxu0 %v8921_v37 }
 0x92e   : > { %9457 = vmatprep.subr.mxu0 %v11066_v4 }
 0x9e6   : > { %v2674_v21 = vpop.f32.mrf.mxu0 }
 0x9e7   : > { %v2675_v22 = vadd.f32 %v8917_v20, %v2674_v21 }
 0x9e8   : > { %v9426_v23 = vpop.f32.mrf.mxu0 }
 0x9e9   : > { %v2678_v24 = vmax.f32 %v2675_v22, 0.0 }
 0x9eb   : > { %9444 = vmatmul.mubr.msk.f32.vlgmr.msra.gmra.mxu1 %vm2694_vm7, %v2678_v24 }
 0x9ec   : > { %9469 = vmatprep.mubr.msk.f32.mxu1 %vm11067_vm1, %v11066_v4 }
 0xaab   : > { %v2764_v27 = vpop.f32.mrf.mxu1 }
 0xaac   : > { %v2765_v28 = vadd.f32 %v8919_v25, %v2764_v27 }
 0xaad   : > { %v9445_v29 = vpop.f32.mrf.mxu1 }
 0xaae   : > { %v2768_v30 = vadd.f32 %v2765_v28, %v2593_v15 }
 0xab0   : > { %v2769_v31 = vsel %vm1729_vm4, %v2768_v30, 0.0  ;;  %v2773_v32 = vmul.f32 %v2768_v30, %v2768_v30 }
 0xab1   : > { %2770 = vadd.xlane.f32.xlu0 %v2769_v31 }
 0xab2   : > { %v2774_v33 = vsel %vm1729_vm4, %v2773_v32, 0.0 }
 0xab5   : > { %2775 = vadd.xlane.f32.xlu0 %v2774_v33 }
 0xb3a   : > { %v2771_v38 = vpop.xlane.xlu0 %2770 }
 0xb3b   : > { %v2772_v39 = vmul.f32 0.03125, %v2771_v38 }
 0xb3d   : > { %v2778_v41 = vmul.f32 %v2772_v39, %v2772_v39  ;;  %v2780_v47 = vsub.f32 %v2768_v30, %v2772_v39 }
 0xb3e   : > { %v2776_v40 = vpop.xlane.xlu0 %2775 }
 0xb3f   : > { %v2777_v42 = vmul.f32 0.03125, %v2776_v40 }
 0xb41   : > { %v2779_v43 = vsub.f32 %v2777_v42, %v2778_v41 }
 0xb43   : > { %v2781_v44 = vadd.f32 1e-05, %v2779_v43 }
 0xb45   : > { %10249 = vrsqrt.f32 %v2781_v44 }
 0xb52   : > { %v10250_v49 = vpop.eup %10249 }
 0xb53   : > { %v2783_v50 = vmul.f32 %v10250_v49, %v2780_v47 }
 0xb55   : > { %v2788_v52 = vmul.f32 %v2787_v48, %v2783_v50 }
 0xb57   : > { %v11744_v53 = vadd.f32 %v2792_v51, %v2788_v52 }
 0xb59   : > { %9455 = vmatmul.mubr.msk.f32.vlgmr.msra.gmra.mxu0 %vm1729_vm4, %v11744_v53 }
 0xb5a   : > { %9459 = vmatprep.mubr.msk.f32.mxu0 %vm11067_vm1, %v11066_v4 }
 0xc19   : > { %v2878_v19 = vpop.f32.mrf.mxu0 }
 0xc1a   : > { %v11751_v55 = vadd.f32 %v8926_v54, %v2878_v19 }
 0xc1b   : > { %v9456_v56 = vpop.f32.mrf.mxu0 }
 0xc1c   : > { %3056 = vrot.lane.b32.xlu0 %v11751_v55, %s12540_s18  ;;  %2890 = vrot.lane.b32.xlu1 %v11751_v55, %s12538_s12  ;;  %s12650_s12 = smov 8   ;;  %s12651_s18 = smov 16  }
 0xc20   : > { %3220 = vrot.lane.b32.xlu0 %v11751_v55, %s12532_s2  ;;  %3054 = vrot.lane.b32.xlu1 %v11751_v55, %s12534_s28  ;;  %s12647_s2 = smov 64   ;;  %s12648_s28 = smov 48  }
 0xc24   : > { %3386 = vrot.lane.b32.xlu0 %v11751_v55, %s12530_s4  ;;  %3222 = vrot.lane.b32.xlu1 %v11751_v55, %s12536_s15  ;;  %s12646_s4 = smov 56   ;;  %s12649_s15 = smov 40  }
 0xc28   : > { %3388 = vrot.lane.b32.xlu1 %v11751_v55, %s12645_s0 }
 0xc8e   : > { %v3057_v57 = vpop.permute.xlu0 %3056  ;;  %v2891_v58 = vpop.permute.xlu1 %2890 }
 0xc8f   : > { %9458 = vmatpush3.xpose.msk.msra.mxu0 %vm1811_vm5, %v2891_v58  ;;  %9468 = vmatpush3.xpose.msk.msra.mxu1 %vm1811_vm5, %v3057_v57 }
 0xc90   : > { %9477 = vmatprep.subr.mxu1 %v11066_v4  ;;  %9462 = vmatprep.subr.mxu0 %v11066_v4 }
 0xc92   : > { %9460 = vmatmul.mubr.msk.f32.vlgmr.msra.gmra.mxu0 %vm1811_vm5, %v11751_v55  ;;  %v3055_v59 = vpop.permute.xlu1 %3054  ;;  %v3221_v61 = vpop.permute.xlu0 %3220 }
 0xc93   : > { %9470 = vmatmul.mubr.msk.f32.vlgmr.msra.gmra.mxu1 %vm1811_vm5, %v3055_v59  ;;  %9464 = vmatprep.mubr.msk.f32.mxu0 %vm11067_vm1, %v11066_v4 }
 0xc94   : > { %9479 = vmatprep.mubr.msk.f32.mxu1 %vm11067_vm1, %v11066_v4 }
 0xc96   : > { %v3223_v60 = vpop.permute.xlu1 %3222  ;;  %v3387_v63 = vpop.permute.xlu0 %3386 }
 0xc97   : > { %9478 = vmatpush3.xpose.msk.msra.mxu1 %vm1811_vm5, %v3223_v60  ;;  %v8931_v60 = vld [vmem:[%s12642_s26 + $0x38] sm:$0xff] }
 0xc98   : > { %9487 = vmatprep.subr.mxu1 %v11066_v4 }
 0xc9a   : > { %9480 = vmatmul.mubr.msk.f32.vlgmr.msra.gmra.mxu1 %vm1811_vm5, %v3221_v61  ;;  %v3389_v62 = vpop.permute.xlu1 %3388 }
 0xc9b   : > { %9488 = vmatpush3.xpose.msk.msra.mxu1 %vm1811_vm5, %v3389_v62  ;;  %9489 = vmatprep.mubr.msk.f32.mxu1 %vm11067_vm1, %v11066_v4 }
 0xc9c   : > { %9497 = vmatprep.subr.mxu1 %v11066_v4 }
 0xc9e   : > { %9490 = vmatmul.mubr.msk.f32.vlgmr.msra.gmra.mxu1 %vm1811_vm5, %v3387_v63 }
 0xc9f   : > { %9505 = vmatprep.mubr.msk.f32.mxu1 %vm11067_vm1, %v11066_v4  ;;  %9498 = vmatpush3.msra.mxu1 %v8931_v60 }
 0xca0   : > { %9499 = vmatprep.subr.mxu1 %v11066_v4 }
 0xd52   : > { %v2962_v0 = vpop.f32.mrf.mxu0 }
 0xd53   : > { %v2966_v1 = vmul.f32 0.35355338, %v2962_v0  ;;  %v3128_v2 = vpop.f32.mrf.mxu1 }
 0xd54   : > { %v3132_v3 = vmul.f32 0.35355338, %v3128_v2  ;;  %v9461_v7 = vpop.f32.mrf.mxu0  ;;  %v8929_v2 = vld [vmem:[%s12642_s26 + $0x28] sm:$0xff] }
 0xd55   : > { %v9471_v9 = vpop.f32.mrf.mxu1  ;;  %v2967_v10 = vsel %vm1811_vm5, %v2966_v1, -inf }
 0xd56   : > { %2968 = vmax.xlane.f32.xlu1 %v2967_v10  ;;  %v3133_v11 = vsel %vm1811_vm5, %v3132_v3, -inf }
 0xd57   : > { %3134 = vmax.xlane.f32.xlu0 %v3133_v11 }
 0xd5a   : > { %v3294_v12 = vpop.f32.mrf.mxu1 }
 0xd5b   : > { %v3298_v13 = vmul.f32 0.35355338, %v3294_v12 }
 0xd5c   : > { %v9481_v14 = vpop.f32.mrf.mxu1 }
 0xd5d   : > { %v3299_v15 = vsel %vm1811_vm5, %v3298_v13, -inf }
 0xd5e   : > { %3300 = vmax.xlane.f32.xlu0 %v3299_v15  ;;  %v3460_v16 = vpop.f32.mrf.mxu1 }
 0xd5f   : > { %v3464_v17 = vmul.f32 0.35355338, %v3460_v16 }
 0xd60   : > { %v9491_v18 = vpop.f32.mrf.mxu1 }
 0xd61   : > { %v3465_v20 = vsel %vm1811_vm5, %v3464_v17, -inf  ;;  %v8944_v18 = vld [vmem:[#allocation8 + $0x1] ss:$0 sm:$0xff] }
 0xd62   : > { %3466 = vmax.xlane.f32.xlu1 %v3465_v20 }
 0xd73   : > { %3144 = vrot.lane.b32.xlu1 %v11751_v55, %s12646_s4 }
 0xddf   : > { %v2969_v21 = vpop.xlane.xlu1 %2968 }
 0xde0   : > { %v2970_v22 = vsub.f32 %v2966_v1, %v2969_v21  ;;  %v3135_v23 = vpop.xlane.xlu0 %3134  ;;  %v8930_v1 = vld [vmem:[%s12642_s26 + $0x30] sm:$0xff] }
 0xde1   : > { %v3136_v24 = vsub.f32 %v3132_v3, %v3135_v23  ;;  %9500 = vmatpush3.msra.mxu1 %v8930_v1  ;;  %v8928_v3 = vld [vmem:[%s12642_s26 + $0x20] sm:$0xff] }
 0xde2   : > { %v2971_v25 = vmul.f32 1.442695, %v2970_v22  ;;  %9501 = vmatprep.subr.mxu1 %v11066_v4 }
 0xde3   : > { %v3137_v27 = vmul.f32 1.442695, %v3136_v24  ;;  %9502 = vmatpush3.msra.mxu1 %v8929_v2 }
 0xde4   : > { %10251 = vpow2.f32 %v2971_v25  ;;  %9503 = vmatprep.subr.mxu1 %v11066_v4 }
 0xde5   : > { %10253 = vpow2.f32 %v3137_v27  ;;  %9504 = vmatpush3.msra.mxu1 %v8928_v3 }
 0xde6   : > { %9519 = vmatprep.subr.mxu1 %v11066_v4 }
 0xde7   : > { %v3301_v37 = vpop.xlane.xlu0 %3300 }
 0xde8   : > { %v3302_v38 = vsub.f32 %v3298_v13, %v3301_v37 }
 0xdea   : > { %v3303_v39 = vmul.f32 1.442695, %v3302_v38 }
 0xdeb   : > { %v3467_v28 = vpop.xlane.xlu1 %3466 }
 0xdec   : > { %v3468_v29 = vsub.f32 %v3464_v17, %v3467_v28  ;;  %v8949_v28 = vld [vmem:[%s12643_s11 + $0x38] sm:$0xff] }
 0xdee   : > { %v3469_v30 = vmul.f32 1.442695, %v3468_v29  ;;  %v8948_v29 = vld [vmem:[%s12643_s11 + $0x30] sm:$0xff] }
 0xdef   : > { %v3145_v42 = vpop.permute.xlu1 %3144 }
 0xdf0   : > { %10255 = vpow2.f32 %v3469_v30  ;;  %v8947_v30 = vld [vmem:[%s12643_s11 + $0x28] sm:$0xff] }
 0xdf1   : > { %v10252_v31 = vpop.eup %10251  ;;  %10257 = vpow2.f32 %v3303_v39 }
 0xdf2   : > { %v10254_v32 = vpop.eup %10253  ;;  %v2973_v33 = vsel %vm1811_vm5, %v10252_v31, 0.0 }
 0xdf3   : > { %2974 = vadd.xlane.f32.xlu0 %v2973_v33  ;;  %v3139_v34 = vsel %vm1811_vm5, %v10254_v32, 0.0  ;;  %v8957_v33 = vld [vmem:[%s12644_s29 + $0x68] sm:$0xff] }
 0xdf4   : > { %3140 = vadd.xlane.f32.xlu1 %v3139_v34  ;;  %v8956_v34 = vld [vmem:[%s12644_s29 + $0x60] sm:$0xff] }
 0xdfd   : > { %v10256_v35 = vpop.eup %10255 }
 0xdfe   : > { %v3471_v36 = vsel %vm1811_vm5, %v10256_v35, 0.0  ;;  %v10258_v40 = vpop.eup %10257 }
 0xdff   : > { %3472 = vadd.xlane.f32.xlu1 %v3471_v36  ;;  %v3305_v41 = vsel %vm1811_vm5, %v10258_v40, 0.0 }
 0xe09   : > { %2978 = vrot.lane.b32.xlu0 %v11751_v55, %s12647_s2 }
 0xe10   : > { %3310 = vrot.lane.b32.xlu1 %v11751_v55, %s12648_s28 }
 0xe28   : > { %3306 = vadd.xlane.f32.xlu0 %v3305_v41 }
 0xe3e   : > { %3476 = vrot.lane.b32.xlu0 %v11751_v55, %s12649_s15 }
 0xe7c   : > { %v2975_v43 = vpop.xlane.xlu0 %2974 }
 0xe7d   : > { %10259 = vrcp.f32 %v2975_v43  ;;  %v3141_v44 = vpop.xlane.xlu1 %3140  ;;  %v11858_v43 = vld [vmem:[#allocation13 + $0x4] sm:$0xf] }
 0xe7e   : > { %10261 = vrcp.f32 %v3141_v44 }
 0xe80   : > { %v2979_v47 = vpop.permute.xlu0 %2978 }
 0xe81   : > { %9463 = vmatpush3.msra.mxu0 %v2979_v47  ;;  %v3665_v47 = vrot.slane %v11858_v43, %v11701_v6 }
 0xe82   : > { %9472 = vmatprep.subr.mxu0 %v11066_v4 }
 0xe88   : > { %v3473_v49 = vpop.xlane.xlu1 %3472 }
 0xe8a   : > { %v10260_v48 = vpop.eup %10259 }
 0xe8b   : > { %v2977_v50 = vmul.f32 %v10260_v48, %v10252_v31  ;;  %v10262_v51 = vpop.eup %10261  ;;  %v8959_v31 = vld [vmem:[%s12644_s29 + $0x78] sm:$0xff] }
 0xe8c   : > { %v3143_v52 = vmul.f32 %v10262_v51, %v10254_v32  ;;  %v3311_v54 = vpop.permute.xlu1 %3310  ;;  %v8958_v32 = vld [vmem:[%s12644_s29 + $0x70] sm:$0xff] }
 0xe8d   : > { %9465 = vmatmul.mubr.msk.f32.vlgmr.msra.gmra.mxu0 %vm1811_vm5, %v2977_v50  ;;  %v3670_v50 = vrot.slane %v11858_v43, %v11706_v8 }
 0xe8e   : > { %9473 = vmatpush3.msra.mxu0 %v3145_v42  ;;  %9474 = vmatprep.mubr.msk.f32.mxu0 %vm11067_vm1, %v11066_v4 }
 0xe8f   : > { %9482 = vmatprep.subr.mxu0 %v11066_v4 }
 0xe91   : > { %9475 = vmatmul.mubr.msk.f32.vlgmr.msra.gmra.mxu0 %vm1811_vm5, %v3143_v52 }
 0xe92   : > { %9483 = vmatpush3.msra.mxu0 %v3311_v54  ;;  %9484 = vmatprep.mubr.msk.f32.mxu0 %vm11067_vm1, %v11066_v4  ;;  %v3880_v54 = vld [vmem:[%s12653_s5 + $0x18] sm:$0xff] }
 0xe93   : > { %9492 = vmatprep.subr.mxu0 %v11066_v4 }
 0xeb1   : > { %v3307_v19 = vpop.xlane.xlu0 %3306 }
 0xeb2   : > { %10263 = vrcp.f32 %v3307_v19  ;;  %v3879_v19 = vld [vmem:[%s12653_s5 + $0x10] sm:$0xff] }
 0xeb3   : > { %10265 = vrcp.f32 %v3473_v49 }
 0xeb5   : > { %v3477_v58 = vpop.permute.xlu0 %3476 }
 0xebf   : > { %v10264_v55 = vpop.eup %10263 }
 0xec0   : > { %v3309_v56 = vmul.f32 %v10264_v55, %v10258_v40  ;;  %v10266_v57 = vpop.eup %10265  ;;  %v10347_v55 = vld [vmem:[%s12635_s1] ss:$0 sm:$0xff]  ;;  %s12656_s1 = smov 96  }
 0xec1   : > { %v3475_v59 = vmul.f32 %v10266_v57, %v10256_v35  ;;  %v8955_v35 = vld [vmem:[%s12644_s29 + $0x58] sm:$0xff]  ;;  %v3878_v57 = vld [vmem:[%s12653_s5 + $0x8] sm:$0xff] }
 0xec2   : > { %9485 = vmatmul.mubr.msk.f32.vlgmr.msra.gmra.mxu0 %vm1811_vm5, %v3309_v56  ;;  %v1712_v56 = vadd.f32 %v10347_v55, %v11605_v26  ;;  %v8954_v26 = vld [vmem:[%s12644_s29 + $0x50] sm:$0xff] }
 0xec3   : > { %9493 = vmatpush3.msra.mxu0 %v3477_v58  ;;  %9494 = vmatprep.mubr.msk.f32.mxu0 %vm11067_vm1, %v11066_v4  ;;  %v1715_v58 = vld [vmem:[%s12654_s6] sm:$0xff]  ;;  %s12655_s6 = smov 88  }
 0xec4   : > { %9508 = vmatprep.subr.mxu0 %v11066_v4  ;;  %v11879_v60 = vadd.f32 %v1715_v58, %v1712_v56 }
 0xec6   : > { %9495 = vmatmul.mubr.msk.f32.vlgmr.msra.gmra.mxu0 %vm1811_vm5, %v3475_v59  ;;  %v3877_v59 = vld [vmem:[%s12653_s5] sm:$0xff] }
 0xec7   : > { %9516 = vmatprep.mubr.msk.f32.mxu0 %vm11067_vm1, %v11066_v4  ;;  %9509 = vmatpush3.msra.mxu0 %v8949_v28 }
 0xec8   : > { %9510 = vmatprep.subr.mxu0 %v11066_v4 }
 0xec9   : > { %9511 = vmatpush3.msra.mxu0 %v8948_v29 }
 0xeca   : > { %9512 = vmatprep.subr.mxu0 %v11066_v4 }
 0xecb   : > { %9513 = vmatpush3.msra.mxu0 %v8947_v30 }
 0xecc   : > { %9514 = vmatprep.subr.mxu0 %v11066_v4 }
 0xf4d   : > { %v3050_v61 = vpop.f32.mrf.mxu0 }
 0xf4f   : > { %v9466_v62 = vpop.f32.mrf.mxu0 }
 0xf50   : > { %v8952_v62 = vld [vmem:[%s12644_s29 + $0x40] sm:$0xff] }
 0xf51   : > { %v3216_v63 = vpop.f32.mrf.mxu0 }
 0xf52   : > { %3553 = vrot.lane.b32.xlu1 %v3216_v63, %s12650_s12  ;;  %v8950_v63 = vld [vmem:[#allocation10 + $0x1] ss:$0 sm:$0xff] }
 0xf53   : > { %v9476_v0 = vpop.f32.mrf.mxu0 }
 0xf82   : > { %v3382_v7 = vpop.f32.mrf.mxu0 }
 0xf83   : > { %3557 = vrot.lane.b32.xlu0 %v3382_v7, %s12651_s18  ;;  %v8962_v7 = vld [vmem:[#allocation14] ss:$0 sm:$0xff] }
 0xf84   : > { %v9486_v9 = vpop.f32.mrf.mxu0 }
 0xf86   : > { %v3548_v10 = vpop.f32.mrf.mxu0 }
 0xf87   : > { %3561 = vrot.lane.b32.xlu1 %v3548_v10, %s12652_s3 }
 0xf88   : > { %v9496_v11 = vpop.f32.mrf.mxu0 }
 0xfc4   : > { %v3554_v12 = vpop.permute.xlu1 %3553 }
 0xfc5   : > { %v3564_v14 = vsel %vm1811_vm5, %v3050_v61, %v3554_v12  ;;  %v8953_v61 = vld [vmem:[%s12644_s29 + $0x48] sm:$0xff] }
 0xff5   : > { %v3558_v13 = vpop.permute.xlu0 %3557 }
 0xff6   : > { %v3565_v15 = vsel %vm1476_vm0, %v3564_v14, %v3558_v13 }
 0xff9   : > { %v3562_v16 = vpop.permute.xlu1 %3561 }
 0xffa   : > { %v3566_v17 = vsel %vm2486_vm6, %v3565_v15, %v3562_v16 }
 0xffb   : > { %9506 = vmatmul.mubr.msk.f32.vlgmr.msra.gmra.mxu1 %vm1729_vm4, %v3566_v17 }
 0xffc   : > { %9535 = vmatprep.mubr.msk.f32.mxu1 %vm11067_vm1, %v11066_v4  ;;  %9520 = vmatpush3.msra.mxu1 %v8959_v31 }
 0xffd   : > { %9521 = vmatprep.subr.mxu1 %v11066_v4 }
 0xffe   : > { %9522 = vmatpush3.msra.mxu1 %v8958_v32 }
 0xfff   : > { %9523 = vmatprep.subr.mxu1 %v11066_v4 }
0x1000   : > { %9524 = vmatpush3.msra.mxu1 %v8957_v33 }
0x1001   : > { %9525 = vmatprep.subr.mxu1 %v11066_v4 }
0x1002   : > { %9526 = vmatpush3.msra.mxu1 %v8956_v34 }
0x1003   : > { %9527 = vmatprep.subr.mxu1 %v11066_v4 }
0x1004   : > { %9528 = vmatpush3.msra.mxu1 %v8955_v35 }
0x1005   : > { %9529 = vmatprep.subr.mxu1 %v11066_v4 }
0x1006   : > { %9530 = vmatpush3.msra.mxu1 %v8954_v26 }
0x1007   : > { %9531 = vmatprep.subr.mxu1 %v11066_v4 }
0x1008   : > { %9532 = vmatpush3.msra.mxu1 %v8953_v61 }
0x1009   : > { %9533 = vmatprep.subr.mxu1 %v11066_v4 }
0x100a   : > { %9534 = vmatpush3.msra.mxu1 %v8952_v62 }
0x100b   : > { %9559 = vmatprep.subr.mxu1 %v11066_v4 }
0x10bb   : > { %v3642_v20 = vpop.f32.mrf.mxu1 }
0x10bc   : > { %v3643_v21 = vadd.f32 %v8944_v18, %v3642_v20 }
0x10bd   : > { %v9507_v22 = vpop.f32.mrf.mxu1 }
0x10be   : > { %v3646_v23 = vadd.f32 %v3643_v21, %v11744_v53  ;;  %v8946_v53 = vld [vmem:[%s12643_s11 + $0x20] sm:$0xff]  ;;  %s12660_s11 = smov 104  }
0x10bf   : > { %9515 = vmatpush3.msra.mxu0 %v8946_v53 }
0x10c0   : > { %v3647_v24 = vsel %vm1729_vm4, %v3646_v23, 0.0  ;;  %v3651_v25 = vmul.f32 %v3646_v23, %v3646_v23  ;;  %9538 = vmatprep.subr.mxu0 %v11066_v4 }
0x10c1   : > { %3648 = vadd.xlane.f32.xlu0 %v3647_v24 }
0x10c2   : > { %v3652_v27 = vsel %vm1729_vm4, %v3651_v25, 0.0 }
0x10c3   : > { %3653 = vadd.xlane.f32.xlu1 %v3652_v27 }
0x114a   : > { %v3649_v36 = vpop.xlane.xlu0 %3648 }
0x114b   : > { %v3650_v37 = vmul.f32 0.03125, %v3649_v36 }
0x114c   : > { %v3654_v38 = vpop.xlane.xlu1 %3653 }
0x114d   : > { %v3656_v39 = vmul.f32 %v3650_v37, %v3650_v37  ;;  %v3655_v40 = vmul.f32 0.03125, %v3654_v38  ;;  %v3658_v44 = vsub.f32 %v3646_v23, %v3650_v37  ;;  %v11935_v23 = vld [vmem:[#allocation7] sm:$0xff] }
0x114f   : > { %v3657_v41 = vsub.f32 %v3655_v40, %v3656_v39 }
0x1151   : > { %v3659_v42 = vadd.f32 1e-05, %v3657_v41 }
0x1153   : > { %10267 = vrsqrt.f32 %v3659_v42 }
0x1160   : > { %v10268_v48 = vpop.eup %10267 }
0x1161   : > { %v3661_v49 = vmul.f32 %v10268_v48, %v3658_v44 }
0x1163   : > { %v3666_v51 = vmul.f32 %v3665_v47, %v3661_v49 }
0x1165   : > { %v11864_v52 = vadd.f32 %v3670_v50, %v3666_v51 }
0x1167   : > { %9517 = vmatmul.mubr.msk.f32.vlgmr.msra.gmra.mxu0 %vm1729_vm4, %v11864_v52 }
0x1168   : > { %9539 = vmatpush3.msra.mxu0 %v3880_v54  ;;  %9546 = vmatprep.mubr.msk.f32.mxu0 %vm11067_vm1, %v11066_v4 }
0x1169   : > { %9540 = vmatprep.subr.mxu0 %v11066_v4 }
0x116a   : > { %9541 = vmatpush3.msra.mxu0 %v3879_v19 }
0x116b   : > { %9542 = vmatprep.subr.mxu0 %v11066_v4 }
0x116c   : > { %9543 = vmatpush3.msra.mxu0 %v3878_v57 }
0x116d   : > { %9544 = vmatprep.subr.mxu0 %v11066_v4 }
0x116e   : > { %9545 = vmatpush3.msra.mxu0 %v3877_v59 }
0x116f   : > { %9547 = vmatmul.mubr.msk.f32.vlgmr.msra.gmra.mxu0 %vm1729_vm4, %v11879_v60  ;;  %9549 = vmatprep.subr.mxu0 %v11066_v4 }
0x1170   : > { %9551 = vmatprep.mubr.msk.f32.mxu0 %vm11067_vm1, %v11066_v4 }
0x1227   : > { %v3754_v0 = vpop.f32.mrf.mxu0 }
0x1228   : > { %v3755_v1 = vadd.f32 %v8950_v63, %v3754_v0 }
0x1229   : > { %v9518_v2 = vpop.f32.mrf.mxu0 }
0x122a   : > { %v3758_v3 = vmax.f32 %v3755_v1, 0.0 }
0x122c   : > { %9536 = vmatmul.mubr.msk.f32.vlgmr.msra.gmra.mxu1 %vm2694_vm7, %v3758_v3 }
0x122d   : > { %9561 = vmatprep.mubr.msk.f32.mxu1 %vm11067_vm1, %v11066_v4 }
0x122f   : > { %v3957_v9 = vpop.f32.mrf.mxu0 }
0x1230   : > { %v11896_v10 = vadd.f32 %v8962_v7, %v3957_v9 }
0x1231   : > { %v9548_v11 = vpop.f32.mrf.mxu0 }
0x1232   : > { %4134 = vrot.lane.b32.xlu1 %v11896_v10, %s12655_s6  ;;  %3967 = vrot.lane.b32.xlu0 %v11896_v10, %s12656_s1 }
0x1236   : > { %4301 = vrot.lane.b32.xlu1 %v11896_v10, %s12657_s8  ;;  %4132 = vrot.lane.b32.xlu0 %v11896_v10, %s12658_s9 }
0x123a   : > { %4468 = vrot.lane.b32.xlu1 %v11896_v10, %s12645_s0  ;;  %4299 = vrot.lane.b32.xlu0 %v11896_v10, %s12659_s10 }
0x123e   : > { %4466 = vrot.lane.b32.xlu0 %v11896_v10, %s12660_s11 }
0x12a4   : > { %v4135_v12 = vpop.permute.xlu1 %4134  ;;  %v3968_v13 = vpop.permute.xlu0 %3967 }
0x12a5   : > { %9550 = vmatpush3.xpose.msk.msra.mxu0 %vm1811_vm5, %v3968_v13  ;;  %9560 = vmatpush3.xpose.msk.msra.mxu1 %vm1811_vm5, %v4135_v12 }
0x12a6   : > { %9569 = vmatprep.subr.mxu1 %v11066_v4  ;;  %9554 = vmatprep.subr.mxu0 %v11066_v4 }
0x12a8   : > { %v4302_v14 = vpop.permute.xlu1 %4301  ;;  %9552 = vmatmul.mubr.msk.f32.vlgmr.msra.gmra.mxu0 %vm1811_vm5, %v11896_v10  ;;  %v4133_v15 = vpop.permute.xlu0 %4132 }
0x12a9   : > { %9562 = vmatmul.mubr.msk.f32.vlgmr.msra.gmra.mxu1 %vm1811_vm5, %v4133_v15  ;;  %9556 = vmatprep.mubr.msk.f32.mxu0 %vm11067_vm1, %v11066_v4 }
0x12aa   : > { %9570 = vmatpush3.xpose.msk.msra.mxu1 %vm1811_vm5, %v4302_v14  ;;  %9571 = vmatprep.mubr.msk.f32.mxu1 %vm11067_vm1, %v11066_v4 }
0x12ab   : > { %9579 = vmatprep.subr.mxu1 %v11066_v4 }
0x12ac   : > { %v4469_v16 = vpop.permute.xlu1 %4468  ;;  %v4300_v17 = vpop.permute.xlu0 %4299 }
0x12ad   : > { %9572 = vmatmul.mubr.msk.f32.vlgmr.msra.gmra.mxu1 %vm1811_vm5, %v4300_v17 }
0x12ae   : > { %9580 = vmatpush3.xpose.msk.msra.mxu1 %vm1811_vm5, %v4469_v16  ;;  %9581 = vmatprep.mubr.msk.f32.mxu1 %vm11067_vm1, %v11066_v4 }
0x12af   : > { %9589 = vmatprep.subr.mxu1 %v11066_v4 }
0x12b0   : > { %v4467_v18 = vpop.permute.xlu0 %4466 }
0x12b1   : > { %9582 = vmatmul.mubr.msk.f32.vlgmr.msra.gmra.mxu1 %vm1811_vm5, %v4467_v18 }
0x12b2   : > { %9597 = vmatprep.mubr.msk.f32.mxu1 %vm11067_vm1, %v11066_v4 }
0x12ec   : > { %v11933_v20 = vpop.f32.mrf.mxu1 }
0x12ee   : > { %v9537_v21 = vpop.f32.mrf.mxu1 }
0x1368   : > { %v4039_v22 = vpop.f32.mrf.mxu0 }
0x1369   : > { %v4043_v24 = vmul.f32 0.35355338, %v4039_v22  ;;  %v4206_v25 = vpop.f32.mrf.mxu1 }
0x136a   : > { %v4210_v27 = vmul.f32 0.35355338, %v4206_v25  ;;  %v9553_v28 = vpop.f32.mrf.mxu0 }
0x136b   : > { %v9563_v29 = vpop.f32.mrf.mxu1  ;;  %v4044_v30 = vadd.f32 %v4043_v24, %v11935_v23 }
0x136c   : > { %v4211_v53 = vadd.f32 %v4210_v27, %v11935_v23  ;;  %v3964_v27 = vld [vmem:[%s12661_s13 + $0x18] sm:$0xff] }
0x136d   : > { %v4373_v31 = vpop.f32.mrf.mxu1  ;;  %v4045_v32 = vsel %vm1811_vm5, %v4044_v30, -inf  ;;  %9590 = vmatpush3.msra.mxu1 %v3964_v27 }
0x136e   : > { %v4377_v33 = vmul.f32 0.35355338, %v4373_v31  ;;  %4046 = vmax.xlane.f32.xlu1 %v4045_v32  ;;  %v4212_v34 = vsel %vm1811_vm5, %v4211_v53, -inf  ;;  %9591 = vmatprep.subr.mxu1 %v11066_v4  ;;  %v3963_v31 = vld [vmem:[%s12661_s13 + $0x10] sm:$0xff]  ;;  %v3962_v32 = vld [vmem:[%s12661_s13 + $0x8] sm:$0xff] }
0x136f   : > { %4213 = vmax.xlane.f32.xlu0 %v4212_v34  ;;  %v9573_v35 = vpop.f32.mrf.mxu1  ;;  %9592 = vmatpush3.msra.mxu1 %v3963_v31 }
0x1370   : > { %v4378_v36 = vadd.f32 %v4377_v33, %v11935_v23  ;;  %9593 = vmatprep.subr.mxu1 %v11066_v4  ;;  %v3961_v33 = vld [vmem:[%s12661_s13] sm:$0xff] }
0x1371   : > { %v4540_v37 = vpop.f32.mrf.mxu1  ;;  %9594 = vmatpush3.msra.mxu1 %v3962_v32 }
0x1372   : > { %v4544_v38 = vmul.f32 0.35355338, %v4540_v37  ;;  %v4379_v39 = vsel %vm1811_vm5, %v4378_v36, -inf  ;;  %9595 = vmatprep.subr.mxu1 %v11066_v4 }
0x1373   : > { %4380 = vmax.xlane.f32.xlu0 %v4379_v39  ;;  %v9583_v40 = vpop.f32.mrf.mxu1  ;;  %9596 = vmatpush3.msra.mxu1 %v3961_v33 }
0x1374   : > { %v4545_v41 = vadd.f32 %v4544_v38, %v11935_v23  ;;  %9611 = vmatprep.subr.mxu1 %v11066_v4  ;;  %v8960_v38 = vld [vmem:[#allocation11 + $0x1] ss:$0 sm:$0xff] }
0x1375   : > { %v3846_v39 = vadd.f32 %v8960_v38, %v11933_v20 }
0x1376   : > { %v4546_v42 = vsel %vm1811_vm5, %v4545_v41, -inf }
0x1377   : > { %4547 = vmax.xlane.f32.xlu1 %v4546_v42  ;;  %v3849_v40 = vadd.f32 %v3846_v39, %v11864_v52  ;;  %v4839_v52 = vld [vmem:[%s12662_s17 + $0x10] sm:$0xff] }
0x1379   : > { %v3854_v42 = vmul.f32 %v3849_v40, %v3849_v40 }
0x1388   : > { %4223 = vrot.lane.b32.xlu1 %v11896_v10, %s12646_s4 }
0x13f7   : > { %v4047_v44 = vpop.xlane.xlu1 %4046 }
0x13f8   : > { %v4048_v47 = vsub.f32 %v4044_v30, %v4047_v44  ;;  %v4214_v48 = vpop.xlane.xlu0 %4213  ;;  %v3855_v44 = vsel %vm1729_vm4, %v3854_v42, 0.0 }
0x13f9   : > { %v4215_v49 = vsub.f32 %v4211_v53, %v4214_v48 }
0x13fa   : > { %v4049_v50 = vmul.f32 1.442695, %v4048_v47 }
0x13fb   : > { %v4216_v51 = vmul.f32 1.442695, %v4215_v49 }
0x13fc   : > { %10269 = vpow2.f32 %v4049_v50  ;;  %v4381_v62 = vpop.xlane.xlu0 %4380 }
0x13fd   : > { %10271 = vpow2.f32 %v4216_v51  ;;  %v4382_v63 = vsub.f32 %v4378_v36, %v4381_v62 }
0x13ff   : > { %v4383_v0 = vmul.f32 1.442695, %v4382_v63 }
0x1400   : > { %v4548_v54 = vpop.xlane.xlu1 %4547 }
0x1401   : > { %v4549_v19 = vsub.f32 %v4545_v41, %v4548_v54  ;;  %v3850_v41 = vsel %vm1729_vm4, %v3849_v40, 0.0  ;;  %v4840_v54 = vld [vmem:[%s12662_s17 + $0x18] sm:$0xff] }
0x1403   : > { %v4550_v55 = vmul.f32 1.442695, %v4549_v19  ;;  %v4838_v19 = vld [vmem:[%s12662_s17 + $0x8] sm:$0xff] }
0x1404   : > { %v4224_v3 = vpop.permute.xlu1 %4223 }
0x1405   : > { %10273 = vpow2.f32 %v4550_v55  ;;  %v4837_v55 = vld [vmem:[%s12662_s17] sm:$0xff] }
0x1406   : > { %10275 = vpow2.f32 %v4383_v0  ;;  %v3868_v0 = vrot.slane %v11858_v43, %v11735_v45 }
0x1409   : > { %v10270_v56 = vpop.eup %10269 }
0x140a   : > { %v10272_v57 = vpop.eup %10271  ;;  %v4051_v58 = vsel %vm1811_vm5, %v10270_v56, 0.0 }
0x140b   : > { %4052 = vadd.xlane.f32.xlu0 %v4051_v58  ;;  %v4218_v59 = vsel %vm1811_vm5, %v10272_v57, 0.0 }
0x140c   : > { %4219 = vadd.xlane.f32.xlu1 %v4218_v59 }
0x1412   : > { %v10274_v26 = vpop.eup %10273 }
0x1413   : > { %v4552_v61 = vsel %vm1811_vm5, %v10274_v26, 0.0  ;;  %v10276_v1 = vpop.eup %10275 }
0x1414   : > { %4553 = vadd.xlane.f32.xlu1 %v4552_v61  ;;  %v4385_v2 = vsel %vm1811_vm5, %v10276_v1, 0.0 }
0x1421   : > { %4056 = vrot.lane.b32.xlu0 %v11896_v10, %s12647_s2 }
0x1425   : > { %4390 = vrot.lane.b32.xlu1 %v11896_v10, %s12648_s28 }
0x1440   : > { %4386 = vadd.xlane.f32.xlu0 %v4385_v2 }
0x1456   : > { %4557 = vrot.lane.b32.xlu0 %v11896_v10, %s12649_s15 }
0x1494   : > { %v4053_v7 = vpop.xlane.xlu0 %4052 }
0x1495   : > { %10277 = vrcp.f32 %v4053_v7  ;;  %v4220_v9 = vpop.xlane.xlu1 %4219 }
0x1496   : > { %10279 = vrcp.f32 %v4220_v9 }
0x1498   : > { %v4057_v11 = vpop.permute.xlu0 %4056 }
0x1499   : > { %9555 = vmatpush3.msra.mxu0 %v4057_v11  ;;  %v8976_v11 = vld [vmem:[#allocation16] ss:$0 sm:$0xff] }
0x149a   : > { %9564 = vmatprep.subr.mxu0 %v11066_v4 }
0x149d   : > { %v4554_v13 = vpop.xlane.xlu1 %4553 }
0x14a1   : > { %v4391_v16 = vpop.permute.xlu1 %4390 }
0x14a2   : > { %v10278_v12 = vpop.eup %10277 }
0x14a3   : > { %v4055_v14 = vmul.f32 %v10278_v12, %v10270_v56  ;;  %v10280_v15 = vpop.eup %10279 }
0x14a4   : > { %v4222_v10 = vmul.f32 %v10280_v15, %v10272_v57 }
0x14a5   : > { %9557 = vmatmul.mubr.msk.f32.vlgmr.msra.gmra.mxu0 %vm1811_vm5, %v4055_v14 }
0x14a6   : > { %9565 = vmatpush3.msra.mxu0 %v4224_v3  ;;  %9566 = vmatprep.mubr.msk.f32.mxu0 %vm11067_vm1, %v11066_v4  ;;  %v3873_v3 = vrot.slane %v11858_v43, %v11738_v46 }
0x14a7   : > { %9574 = vmatprep.subr.mxu0 %v11066_v4 }
0x14a9   : > { %9567 = vmatmul.mubr.msk.f32.vlgmr.msra.gmra.mxu0 %vm1811_vm5, %v4222_v10 }
0x14aa   : > { %9575 = vmatpush3.msra.mxu0 %v4391_v16  ;;  %9576 = vmatprep.mubr.msk.f32.mxu0 %vm11067_vm1, %v11066_v4 }
0x14ab   : > { %9584 = vmatprep.subr.mxu0 %v11066_v4 }
0x14c9   : > { %v4387_v17 = vpop.xlane.xlu0 %4386 }
0x14ca   : > { %10281 = vrcp.f32 %v4387_v17  ;;  %v4756_v17 = vld [vmem:[%s12663_s19 + $0x18] sm:$0xff] }
0x14cb   : > { %10283 = vrcp.f32 %v4554_v13 }
0x14cd   : > { %v4558_v24 = vpop.permute.xlu0 %4557 }
0x14d7   : > { %v10282_v18 = vpop.eup %10281 }
0x14d8   : > { %v4389_v21 = vmul.f32 %v10282_v18, %v10276_v1  ;;  %v10284_v22 = vpop.eup %10283  ;;  %v4755_v18 = vld [vmem:[%s12663_s19 + $0x10] sm:$0xff] }
0x14d9   : > { %v4556_v25 = vmul.f32 %v10284_v22, %v10274_v26  ;;  %v4753_v22 = vld [vmem:[%s12663_s19] sm:$0xff] }
0x14da   : > { %9577 = vmatmul.mubr.msk.f32.vlgmr.msra.gmra.mxu0 %vm1811_vm5, %v4389_v21  ;;  %v4754_v21 = vld [vmem:[%s12663_s19 + $0x8] sm:$0xff] }
0x14db   : > { %9585 = vmatpush3.msra.mxu0 %v4558_v24  ;;  %9586 = vmatprep.mubr.msk.f32.mxu0 %vm11067_vm1, %v11066_v4 }
0x14dc   : > { %9600 = vmatprep.subr.mxu0 %v11066_v4 }
0x14de   : > { %9587 = vmatmul.mubr.msk.f32.vlgmr.msra.gmra.mxu0 %vm1811_vm5, %v4556_v25 }
0x14df   : > { %9608 = vmatprep.mubr.msk.f32.mxu0 %vm11067_vm1, %v11066_v4  ;;  %9601 = vmatpush3.msra.mxu0 %v4756_v17 }
0x14e0   : > { %9602 = vmatprep.subr.mxu0 %v11066_v4 }
0x14e1   : > { %9603 = vmatpush3.msra.mxu0 %v4755_v18 }
0x14e2   : > { %9604 = vmatprep.subr.mxu0 %v11066_v4 }
0x14e3   : > { %9605 = vmatpush3.msra.mxu0 %v4754_v21 }
0x14e4   : > { %9606 = vmatprep.subr.mxu0 %v11066_v4 }
0x14e5   : > { %9607 = vmatpush3.msra.mxu0 %v4753_v22 }
0x14e6   : > { %9622 = vmatprep.subr.mxu0 %v11066_v4 }
0x1565   : > { %v4128_v28 = vpop.f32.mrf.mxu0 }
0x1567   : > { %v9558_v29 = vpop.f32.mrf.mxu0 }
0x1569   : > { %v4295_v30 = vpop.f32.mrf.mxu0 }
0x156a   : > { %4634 = vrot.lane.b32.xlu1 %v4295_v30, %s12650_s12 }
0x156b   : > { %v9568_v53 = vpop.f32.mrf.mxu0 }
0x159a   : > { %v4462_v34 = vpop.f32.mrf.mxu0 }
0x159b   : > { %4638 = vrot.lane.b32.xlu0 %v4462_v34, %s12651_s18  ;;  %v12030_v34 = vld [vmem:[%s12664_s20] sm:$0x3f] }
0x159c   : > { %v9578_v35 = vpop.f32.mrf.mxu0  ;;  %v4751_v39 = vrot.slane %v12030_v34, %v11706_v8 }
0x159e   : > { %v4629_v36 = vpop.f32.mrf.mxu0 }
0x159f   : > { %4642 = vrot.lane.b32.xlu1 %v4629_v36, %s12652_s3  ;;  %v4746_v36 = vrot.slane %v12030_v34, %v11701_v6 }
0x15a0   : > { %v9588_v37 = vpop.f32.mrf.mxu0 }
0x15ba   : > { %3851 = vadd.xlane.f32.xlu0 %v3850_v41 }
0x15c3   : > { %3856 = vadd.xlane.f32.xlu1 %v3855_v44  ;;  %v8978_v44 = vld [vmem:[#allocation17] ss:$0 sm:$0xff] }
0x15dc   : > { %v4635_v47 = vpop.permute.xlu1 %4634 }
0x15dd   : > { %v4645_v49 = vsel %vm1811_vm5, %v4128_v28, %v4635_v47 }
0x160d   : > { %v4639_v48 = vpop.permute.xlu0 %4638 }
0x160e   : > { %v4646_v50 = vsel %vm1476_vm0, %v4645_v49, %v4639_v48 }
0x1611   : > { %v4643_v51 = vpop.permute.xlu1 %4642 }
0x1612   : > { %v4647_v20 = vsel %vm2486_vm6, %v4646_v50, %v4643_v51 }
0x1613   : > { %9598 = vmatmul.mubr.msk.f32.vlgmr.msra.gmra.mxu1 %vm1729_vm4, %v4647_v20 }
0x1614   : > { %9612 = vmatpush3.msra.mxu1 %v4840_v54  ;;  %9619 = vmatprep.mubr.msk.f32.mxu1 %vm11067_vm1, %v11066_v4 }
0x1615   : > { %9613 = vmatprep.subr.mxu1 %v11066_v4 }
0x1616   : > { %9614 = vmatpush3.msra.mxu1 %v4839_v52 }
0x1617   : > { %9615 = vmatprep.subr.mxu1 %v11066_v4 }
0x1618   : > { %9616 = vmatpush3.msra.mxu1 %v4838_v19 }
0x1619   : > { %9617 = vmatprep.subr.mxu1 %v11066_v4 }
0x161a   : > { %9618 = vmatpush3.msra.mxu1 %v4837_v55 }
0x161b   : > { %9632 = vmatprep.subr.mxu1 %v11066_v4 }
0x1643   : > { %v3852_v56 = vpop.xlane.xlu0 %3851 }
0x1644   : > { %v3853_v57 = vmul.f32 0.03125, %v3852_v56 }
0x1646   : > { %v3859_v59 = vmul.f32 %v3853_v57, %v3853_v57  ;;  %v3861_v63 = vsub.f32 %v3849_v40, %v3853_v57 }
0x164c   : > { %v3857_v58 = vpop.xlane.xlu1 %3856 }
0x164d   : > { %v3858_v26 = vmul.f32 0.03125, %v3857_v58 }
0x164f   : > { %v3860_v61 = vsub.f32 %v3858_v26, %v3859_v59 }
0x1651   : > { %v3862_v62 = vadd.f32 1e-05, %v3860_v61 }
0x1653   : > { %10285 = vrsqrt.f32 %v3862_v62 }
0x1660   : > { %v10286_v1 = vpop.eup %10285 }
0x1661   : > { %v3864_v2 = vmul.f32 %v10286_v1, %v3861_v63 }
0x1663   : > { %v3869_v7 = vmul.f32 %v3868_v0, %v3864_v2 }
0x1665   : > { %v12006_v9 = vadd.f32 %v3873_v3, %v3869_v7 }
0x1667   : > { %9620 = vmatmul.mubr.msk.f32.vlgmr.msra.gmra.mxu1 %vm1729_vm4, %v12006_v9 }
0x1668   : > { %9634 = vmatprep.mubr.msk.f32.mxu1 %vm11067_vm1, %v11066_v4 }
0x16d3   : > { %v4723_v12 = vpop.f32.mrf.mxu1 }
0x16d4   : > { %v4724_v13 = vadd.f32 %v8976_v11, %v4723_v12 }
0x16d5   : > { %v9599_v14 = vpop.f32.mrf.mxu1 }
0x16d6   : > { %v4727_v15 = vadd.f32 %v4724_v13, %v11879_v60  ;;  %v8980_v60 = vld [vmem:[#allocation19] ss:$0 sm:$0xff] }
0x16d8   : > { %v4728_v43 = vsel %vm1729_vm4, %v4727_v15, 0.0  ;;  %v4732_v10 = vmul.f32 %v4727_v15, %v4727_v15 }
0x16d9   : > { %4729 = vadd.xlane.f32.xlu0 %v4728_v43 }
0x16da   : > { %v4733_v16 = vsel %vm1729_vm4, %v4732_v10, 0.0 }
0x16dd   : > { %4734 = vadd.xlane.f32.xlu0 %v4733_v16 }
0x1727   : > { %v4917_v24 = vpop.f32.mrf.mxu1 }
0x1728   : > { %v12023_v25 = vadd.f32 %v8980_v60, %v4917_v24 }
0x1729   : > { %v9621_v27 = vpop.f32.mrf.mxu1 }
0x172a   : > { %5092 = vrot.lane.b32.xlu1 %v12023_v25, %s12658_s9 }
0x172e   : > { %5258 = vrot.lane.b32.xlu1 %v12023_v25, %s12659_s10 }
0x1762   : > { %v4730_v28 = vpop.xlane.xlu0 %4729 }
0x1763   : > { %v4731_v29 = vmul.f32 0.03125, %v4730_v28 }
0x1765   : > { %v4737_v53 = vmul.f32 %v4731_v29, %v4731_v29  ;;  %v4739_v35 = vsub.f32 %v4727_v15, %v4731_v29 }
0x1766   : > { %v4735_v30 = vpop.xlane.xlu0 %4734 }
0x1767   : > { %v4736_v31 = vmul.f32 0.03125, %v4735_v30 }
0x1769   : > { %v4738_v32 = vsub.f32 %v4736_v31, %v4737_v53 }
0x176b   : > { %v4740_v33 = vadd.f32 1e-05, %v4738_v32 }
0x176d   : > { %10287 = vrsqrt.f32 %v4740_v33 }
0x177a   : > { %v10288_v37 = vpop.eup %10287 }
0x177b   : > { %v4742_v38 = vmul.f32 %v10288_v37, %v4739_v35 }
0x177d   : > { %v4747_v40 = vmul.f32 %v4746_v36, %v4742_v38 }
0x177f   : > { %v12036_v41 = vadd.f32 %v4751_v39, %v4747_v40 }
0x1781   : > { %9609 = vmatmul.mubr.msk.f32.vlgmr.msra.gmra.mxu0 %vm1729_vm4, %v12036_v41 }
0x1782   : > { %9623 = vmatpush3.xpose.msk.msra.mxu0 %vm1811_vm5, %v12023_v25  ;;  %9624 = vmatprep.mubr.msk.f32.mxu0 %vm11067_vm1, %v11066_v4 }
0x1783   : > { %9627 = vmatprep.subr.mxu0 %v11066_v4 }
0x179c   : > { %v5093_v42 = vpop.permute.xlu1 %5092 }
0x179d   : > { %9633 = vmatpush3.xpose.msk.msra.mxu1 %vm1811_vm5, %v5093_v42 }
0x179e   : > { %9642 = vmatprep.subr.mxu1 %v11066_v4 }
0x17a0   : > { %v5259_v50 = vpop.permute.xlu1 %5258 }
0x1841   : > { %v4833_v47 = vpop.f32.mrf.mxu0 }
0x1842   : > { %v4834_v48 = vadd.f32 %v8978_v44, %v4833_v47 }
0x1843   : > { %v9610_v49 = vpop.f32.mrf.mxu0 }
0x1844   : > { %5090 = vrot.lane.b32.xlu0 %v4834_v48, %s12658_s9  ;;  %5256 = vrot.lane.b32.xlu1 %v4834_v48, %s12659_s10 }
0x1845   : > { %9625 = vmatmul.mubr.msk.f32.vlgmr.msra.gmra.mxu0 %vm1811_vm5, %v4834_v48 }
0x1846   : > { %9629 = vmatprep.mubr.msk.f32.mxu0 %vm11067_vm1, %v11066_v4 }
0x1848   : > { %5424 = vrot.lane.b32.xlu0 %v12023_v25, %s12660_s11  ;;  %5422 = vrot.lane.b32.xlu1 %v4834_v48, %s12660_s11 }
0x18b6   : > { %v5091_v51 = vpop.permute.xlu0 %5090  ;;  %v5257_v54 = vpop.permute.xlu1 %5256 }
0x18b7   : > { %9635 = vmatmul.mubr.msk.f32.vlgmr.msra.gmra.mxu1 %vm1811_vm5, %v5091_v51 }
0x18b8   : > { %9643 = vmatpush3.xpose.msk.msra.mxu1 %vm1811_vm5, %v5259_v50  ;;  %9644 = vmatprep.mubr.msk.f32.mxu1 %vm11067_vm1, %v11066_v4 }
0x18b9   : > { %9652 = vmatprep.subr.mxu1 %v11066_v4 }
0x18ba   : > { %v5425_v20 = vpop.permute.xlu0 %5424  ;;  %v5423_v52 = vpop.permute.xlu1 %5422 }
0x18bb   : > { %9645 = vmatmul.mubr.msk.f32.vlgmr.msra.gmra.mxu1 %vm1811_vm5, %v5257_v54 }
0x18bc   : > { %9653 = vmatpush3.xpose.msk.msra.mxu1 %vm1811_vm5, %v5425_v20  ;;  %9654 = vmatprep.mubr.msk.f32.mxu1 %vm11067_vm1, %v11066_v4 }
0x18bd   : > { %9662 = vmatprep.subr.mxu1 %v11066_v4 }
0x18bf   : > { %9655 = vmatmul.mubr.msk.f32.vlgmr.msra.gmra.mxu1 %vm1811_vm5, %v5423_v52 }
0x18c0   : > { %9670 = vmatprep.mubr.msk.f32.mxu1 %vm11067_vm1, %v11066_v4 }
0x1905   : > { %v4998_v19 = vpop.f32.mrf.mxu0 }
0x1906   : > { %v5002_v55 = vmul.f32 0.35355338, %v4998_v19  ;;  %v4924_v19 = vld [vmem:[#allocation20 + $0x18] sm:$0xff] }
0x1907   : > { %v9626_v56 = vpop.f32.mrf.mxu0  ;;  %9663 = vmatpush3.msra.mxu1 %v4924_v19  ;;  %v8998_v19 = vld [vmem:[#allocation26] ss:$0 sm:$0xff] }
0x1908   : > { %v5003_v57 = vsel %vm1811_vm5, %v5002_v55, -inf  ;;  %9664 = vmatprep.subr.mxu1 %v11066_v4  ;;  %v4922_v56 = vld [vmem:[#allocation20 + $0x8] sm:$0xff] }
0x1909   : > { %5004 = vmax.xlane.f32.xlu0 %v5003_v57  ;;  %v4921_v57 = vld [vmem:[#allocation20] sm:$0xff] }
0x1977   : > { %v5164_v58 = vpop.f32.mrf.mxu1 }
0x1978   : > { %v5168_v59 = vmul.f32 0.35355338, %v5164_v58 }
0x1979   : > { %v9636_v26 = vpop.f32.mrf.mxu1 }
0x197a   : > { %v5169_v61 = vsel %vm1811_vm5, %v5168_v59, -inf }
0x197b   : > { %5170 = vmax.xlane.f32.xlu1 %v5169_v61  ;;  %v5330_v62 = vpop.f32.mrf.mxu1 }
0x197c   : > { %v5334_v63 = vmul.f32 0.35355338, %v5330_v62 }
0x197d   : > { %v9646_v0 = vpop.f32.mrf.mxu1 }
0x197e   : > { %v5335_v1 = vsel %vm1811_vm5, %v5334_v63, -inf }
0x197f   : > { %5336 = vmax.xlane.f32.xlu0 %v5335_v1  ;;  %v5496_v2 = vpop.f32.mrf.mxu1 }
0x1980   : > { %v5500_v3 = vmul.f32 0.35355338, %v5496_v2 }
0x1981   : > { %v9656_v7 = vpop.f32.mrf.mxu1 }
0x1982   : > { %v5501_v11 = vsel %vm1811_vm5, %v5500_v3, -inf }
0x1983   : > { %5502 = vmax.xlane.f32.xlu0 %v5501_v11 }
0x198c   : > { %5014 = vrot.lane.b32.xlu1 %v12023_v25, %s12656_s1 }
0x1992   : > { %v5005_v12 = vpop.xlane.xlu0 %5004 }
0x1993   : > { %v5006_v13 = vsub.f32 %v5002_v55, %v5005_v12  ;;  %v4923_v55 = vld [vmem:[#allocation20 + $0x10] sm:$0xff]  ;;  %v8994_v12 = vld [vmem:[#allocation22] ss:$0 sm:$0xff] }
0x1994   : > { %9665 = vmatpush3.msra.mxu1 %v4923_v55 }
0x1995   : > { %v5007_v14 = vmul.f32 1.442695, %v5006_v13  ;;  %9666 = vmatprep.subr.mxu1 %v11066_v4 }
0x1996   : > { %9667 = vmatpush3.msra.mxu1 %v4922_v56 }
0x1997   : > { %10289 = vpow2.f32 %v5007_v14  ;;  %9668 = vmatprep.subr.mxu1 %v11066_v4 }
0x1998   : > { %9669 = vmatpush3.msra.mxu1 %v4921_v57 }
0x1999   : > { %9684 = vmatprep.subr.mxu1 %v11066_v4 }
0x19a4   : > { %v10290_v15 = vpop.eup %10289 }
0x19a5   : > { %v5009_v43 = vsel %vm1811_vm5, %v10290_v15, 0.0 }
0x19b0   : > { %5010 = vadd.xlane.f32.xlu1 %v5009_v43 }
0x1a04   : > { %v5171_v10 = vpop.xlane.xlu1 %5170 }
0x1a05   : > { %v5172_v16 = vsub.f32 %v5168_v59, %v5171_v10 }
0x1a07   : > { %v5173_v17 = vmul.f32 1.442695, %v5172_v16 }
0x1a08   : > { %v5015_v18 = vpop.permute.xlu1 %5014  ;;  %v5337_v21 = vpop.xlane.xlu0 %5336 }
0x1a09   : > { %10291 = vpow2.f32 %v5173_v17  ;;  %v5338_v22 = vsub.f32 %v5334_v63, %v5337_v21  ;;  %9628 = vmatpush3.msra.mxu0 %v5015_v18  ;;  %v5711_v18 = vld [vmem:[#allocation23 + $0x18] sm:$0xff]  ;;  %v5710_v21 = vld [vmem:[#allocation23 + $0x10] sm:$0xff] }
0x1a0a   : > { %9637 = vmatprep.subr.mxu0 %v11066_v4 }
0x1a0b   : > { %v5339_v60 = vmul.f32 1.442695, %v5338_v22  ;;  %v5709_v22 = vld [vmem:[#allocation23 + $0x8] sm:$0xff] }
0x1a0c   : > { %v5503_v24 = vpop.xlane.xlu0 %5502 }
0x1a0d   : > { %10293 = vpow2.f32 %v5339_v60  ;;  %v5504_v27 = vsub.f32 %v5500_v3, %v5503_v24  ;;  %v5800_v60 = vld [vmem:[%s12665_s21 + $0x38] sm:$0xff]  ;;  %v5799_v24 = vld [vmem:[%s12665_s21 + $0x30] sm:$0xff] }
0x1a0f   : > { %v5505_v28 = vmul.f32 1.442695, %v5504_v27  ;;  %v5798_v27 = vld [vmem:[%s12665_s21 + $0x28] sm:$0xff] }
0x1a11   : > { %10295 = vpow2.f32 %v5505_v28  ;;  %v5797_v28 = vld [vmem:[%s12665_s21 + $0x20] sm:$0xff] }
0x1a16   : > { %v10292_v29 = vpop.eup %10291 }
0x1a17   : > { %v5175_v30 = vsel %vm1811_vm5, %v10292_v29, 0.0 }
0x1a18   : > { %5176 = vadd.xlane.f32.xlu0 %v5175_v30 }
0x1a1a   : > { %v10294_v53 = vpop.eup %10293 }
0x1a1b   : > { %v5341_v31 = vsel %vm1811_vm5, %v10294_v53, 0.0 }
0x1a1c   : > { %5342 = vadd.xlane.f32.xlu1 %v5341_v31 }
0x1a1e   : > { %v10296_v32 = vpop.eup %10295 }
0x1a1f   : > { %v5507_v33 = vsel %vm1811_vm5, %v10296_v32, 0.0 }
0x1a20   : > { %5508 = vadd.xlane.f32.xlu0 %v5507_v33 }
0x1a2d   : > { %5346 = vrot.lane.b32.xlu1 %v12023_v25, %s12657_s8 }
0x1a31   : > { %5512 = vrot.lane.b32.xlu1 %v12023_v25, %s12645_s0 }
0x1a36   : > { %5180 = vrot.lane.b32.xlu0 %v12023_v25, %s12655_s6 }
0x1a39   : > { %v5011_v35 = vpop.xlane.xlu1 %5010 }
0x1a3a   : > { %10297 = vrcp.f32 %v5011_v35 }
0x1a47   : > { %v10298_v36 = vpop.eup %10297 }
0x1a48   : > { %v5013_v37 = vmul.f32 %v10298_v36, %v10290_v15 }
0x1a4a   : > { %9630 = vmatmul.mubr.msk.f32.vlgmr.msra.gmra.mxu0 %vm1811_vm5, %v5013_v37 }
0x1a4b   : > { %9639 = vmatprep.mubr.msk.f32.mxu0 %vm11067_vm1, %v11066_v4 }
0x1aa1   : > { %v5177_v38 = vpop.xlane.xlu0 %5176 }
0x1aa2   : > { %10299 = vrcp.f32 %v5177_v38  ;;  %v5701_v38 = vrot.slane %v12030_v34, %v11735_v45 }
0x1aa5   : > { %v5343_v39 = vpop.xlane.xlu1 %5342 }
0x1aa6   : > { %10301 = vrcp.f32 %v5343_v39 }
0x1aa9   : > { %v5509_v40 = vpop.xlane.xlu0 %5508  ;;  %v5347_v25 = vpop.permute.xlu1 %5346 }
0x1aaa   : > { %10303 = vrcp.f32 %v5509_v40 }
0x1aad   : > { %v5181_v42 = vpop.permute.xlu0 %5180  ;;  %v5513_v50 = vpop.permute.xlu1 %5512 }
0x1aae   : > { %9638 = vmatpush3.msra.mxu0 %v5181_v42  ;;  %v5706_v42 = vrot.slane %v12030_v34, %v11738_v46 }
0x1aaf   : > { %v10300_v44 = vpop.eup %10299  ;;  %9647 = vmatprep.subr.mxu0 %v11066_v4 }
0x1ab0   : > { %v5179_v47 = vmul.f32 %v10300_v44, %v10292_v29  ;;  %v5796_v29 = vld [vmem:[%s12665_s21 + $0x18] sm:$0xff] }
0x1ab2   : > { %9640 = vmatmul.mubr.msk.f32.vlgmr.msra.gmra.mxu0 %vm1811_vm5, %v5179_v47  ;;  %v5795_v47 = vld [vmem:[%s12665_s21 + $0x10] sm:$0xff] }
0x1ab3   : > { %v10302_v48 = vpop.eup %10301  ;;  %9648 = vmatpush3.msra.mxu0 %v5347_v25  ;;  %9649 = vmatprep.mubr.msk.f32.mxu0 %vm11067_vm1, %v11066_v4 }
0x1ab4   : > { %9657 = vmatprep.subr.mxu0 %v11066_v4  ;;  %v5345_v49 = vmul.f32 %v10302_v48, %v10294_v53  ;;  %v5794_v48 = vld [vmem:[%s12665_s21 + $0x8] sm:$0xff] }
0x1ab6   : > { %9650 = vmatmul.mubr.msk.f32.vlgmr.msra.gmra.mxu0 %vm1811_vm5, %v5345_v49  ;;  %v5793_v49 = vld [vmem:[%s12665_s21] sm:$0xff] }
0x1ab7   : > { %v10304_v51 = vpop.eup %10303  ;;  %9658 = vmatpush3.msra.mxu0 %v5513_v50  ;;  %9659 = vmatprep.mubr.msk.f32.mxu0 %vm11067_vm1, %v11066_v4  ;;  %v8996_v50 = vld [vmem:[#allocation25] ss:$0 sm:$0xff] }
0x1ab8   : > { %v5511_v54 = vmul.f32 %v10304_v51, %v10296_v32  ;;  %9673 = vmatprep.subr.mxu0 %v11066_v4 }
0x1aba   : > { %9660 = vmatmul.mubr.msk.f32.vlgmr.msra.gmra.mxu0 %vm1811_vm5, %v5511_v54 }
0x1abb   : > { %9681 = vmatprep.mubr.msk.f32.mxu0 %vm11067_vm1, %v11066_v4  ;;  %9674 = vmatpush3.msra.mxu0 %v5711_v18 }
0x1abc   : > { %9675 = vmatprep.subr.mxu0 %v11066_v4 }
0x1abd   : > { %9676 = vmatpush3.msra.mxu0 %v5710_v21 }
0x1abe   : > { %9677 = vmatprep.subr.mxu0 %v11066_v4 }
0x1abf   : > { %9678 = vmatpush3.msra.mxu0 %v5709_v22 }
0x1ac0   : > { %9679 = vmatprep.subr.mxu0 %v11066_v4 }
0x1b0a   : > { %v5086_v20 = vpop.f32.mrf.mxu0 }
0x1b0c   : > { %v9631_v52 = vpop.f32.mrf.mxu0 }
0x1b72   : > { %v5252_v58 = vpop.f32.mrf.mxu0 }
0x1b73   : > { %5589 = vrot.lane.b32.xlu0 %v5252_v58, %s12650_s12 }
0x1b74   : > { %v9641_v59 = vpop.f32.mrf.mxu0 }
0x1b76   : > { %v5418_v26 = vpop.f32.mrf.mxu0 }
0x1b77   : > { %5593 = vrot.lane.b32.xlu1 %v5418_v26, %s12651_s18 }
0x1b78   : > { %v9651_v61 = vpop.f32.mrf.mxu0 }
0x1b7a   : > { %v5584_v62 = vpop.f32.mrf.mxu0 }
0x1b7b   : > { %5597 = vrot.lane.b32.xlu0 %v5584_v62, %s12652_s3  ;;  %v9004_v62 = vld [vmem:[%s12653_s5 + $0x38] sm:$0xff] }
0x1b7c   : > { %v9661_v63 = vpop.f32.mrf.mxu0 }
0x1b7d   : > { %v9003_v63 = vld [vmem:[%s12653_s5 + $0x30] sm:$0xff] }
0x1be5   : > { %v5590_v0 = vpop.permute.xlu0 %5589 }
0x1be6   : > { %v5600_v2 = vsel %vm1811_vm5, %v5086_v20, %v5590_v0  ;;  %v9002_v0 = vld [vmem:[%s12653_s5 + $0x28] sm:$0xff] }
0x1be9   : > { %v5594_v1 = vpop.permute.xlu1 %5593 }
0x1bea   : > { %v5601_v3 = vsel %vm1476_vm0, %v5600_v2, %v5594_v1  ;;  %v9001_v1 = vld [vmem:[%s12653_s5 + $0x20] sm:$0xff] }
0x1bed   : > { %v5598_v7 = vpop.permute.xlu0 %5597 }
0x1bee   : > { %v5602_v11 = vsel %vm2486_vm6, %v5601_v3, %v5598_v7 }
0x1bef   : > { %9671 = vmatmul.mubr.msk.f32.vlgmr.msra.gmra.mxu1 %vm1729_vm4, %v5602_v11 }
0x1bf0   : > { %9700 = vmatprep.mubr.msk.f32.mxu1 %vm11067_vm1, %v11066_v4  ;;  %9685 = vmatpush3.msra.mxu1 %v5800_v60  ;;  %v9005_v60 = vld [vmem:[#allocation14 + $0x1] ss:$0 sm:$0xff] }
0x1bf1   : > { %9686 = vmatprep.subr.mxu1 %v11066_v4 }
0x1bf2   : > { %9687 = vmatpush3.msra.mxu1 %v5799_v24 }
0x1bf3   : > { %9688 = vmatprep.subr.mxu1 %v11066_v4 }
0x1bf4   : > { %9689 = vmatpush3.msra.mxu1 %v5798_v27 }
0x1bf5   : > { %9690 = vmatprep.subr.mxu1 %v11066_v4 }
0x1bf6   : > { %9691 = vmatpush3.msra.mxu1 %v5797_v28 }
0x1bf7   : > { %9692 = vmatprep.subr.mxu1 %v11066_v4 }
0x1bf8   : > { %9693 = vmatpush3.msra.mxu1 %v5796_v29 }
0x1bf9   : > { %9694 = vmatprep.subr.mxu1 %v11066_v4 }
0x1bfa   : > { %9695 = vmatpush3.msra.mxu1 %v5795_v47 }
0x1bfb   : > { %9696 = vmatprep.subr.mxu1 %v11066_v4 }
0x1bfc   : > { %9697 = vmatpush3.msra.mxu1 %v5794_v48 }
0x1bfd   : > { %9698 = vmatprep.subr.mxu1 %v11066_v4 }
0x1bfe   : > { %9699 = vmatpush3.msra.mxu1 %v5793_v49 }
0x1bff   : > { %9724 = vmatprep.subr.mxu1 %v11066_v4 }
0x1caf   : > { %v5678_v13 = vpop.f32.mrf.mxu1 }
0x1cb0   : > { %v5679_v14 = vadd.f32 %v8994_v12, %v5678_v13 }
0x1cb1   : > { %v9672_v15 = vpop.f32.mrf.mxu1 }
0x1cb2   : > { %v5682_v43 = vadd.f32 %v5679_v14, %v12036_v41  ;;  %v5708_v41 = vld [vmem:[#allocation23] sm:$0xff]  ;;  %v5899_v15 = vsub.s32 4, %v11698_v5 }
0x1cb3   : > { %9680 = vmatpush3.msra.mxu0 %v5708_v41 }
0x1cb4   : > { %v5683_v10 = vsel %vm1729_vm4, %v5682_v43, 0.0  ;;  %v5687_v16 = vmul.f32 %v5682_v43, %v5682_v43  ;;  %9703 = vmatprep.subr.mxu0 %v11066_v4 }
0x1cb5   : > { %5684 = vadd.xlane.f32.xlu1 %v5683_v10 }
0x1cb6   : > { %v5688_v17 = vsel %vm1729_vm4, %v5687_v16, 0.0  ;;  %v5900_v16 = vrot.slane %v12030_v34, %v5899_v15 }
0x1cb7   : > { %5689 = vadd.xlane.f32.xlu0 %v5688_v17 }
0x1d3e   : > { %v5685_v30 = vpop.xlane.xlu1 %5684 }
0x1d3f   : > { %v5686_v53 = vmul.f32 0.03125, %v5685_v30 }
0x1d40   : > { %v5690_v31 = vpop.xlane.xlu0 %5689 }
0x1d41   : > { %v5692_v32 = vmul.f32 %v5686_v53, %v5686_v53  ;;  %v5691_v33 = vmul.f32 0.03125, %v5690_v31  ;;  %v5694_v37 = vsub.f32 %v5682_v43, %v5686_v53  ;;  %v5904_v43 = vsub.s32 5, %v11698_v5 }
0x1d43   : > { %v5693_v35 = vsub.f32 %v5691_v33, %v5692_v32  ;;  %v5905_v21 = vrot.slane %v12030_v34, %v5904_v43 }
0x1d45   : > { %v5695_v36 = vadd.f32 1e-05, %v5693_v35 }
0x1d47   : > { %10305 = vrsqrt.f32 %v5695_v36 }
0x1d54   : > { %v10306_v39 = vpop.eup %10305 }
0x1d55   : > { %v5697_v40 = vmul.f32 %v10306_v39, %v5694_v37 }
0x1d57   : > { %v5702_v44 = vmul.f32 %v5701_v38, %v5697_v40 }
0x1d59   : > { %v5707_v25 = vadd.f32 %v5706_v42, %v5702_v44 }
0x1d5b   : > { %9682 = vmatmul.mubr.msk.f32.vlgmr.msra.gmra.mxu0 %vm1729_vm4, %v5707_v25 }
0x1d5c   : > { %9711 = vmatprep.mubr.msk.f32.mxu0 %vm11067_vm1, %v11066_v4  ;;  %9704 = vmatpush3.msra.mxu0 %v9004_v62 }
0x1d5d   : > { %9705 = vmatprep.subr.mxu0 %v11066_v4 }
0x1d5e   : > { %9706 = vmatpush3.msra.mxu0 %v9003_v63 }
0x1d5f   : > { %9707 = vmatprep.subr.mxu0 %v11066_v4 }
0x1d60   : > { %9708 = vmatpush3.msra.mxu0 %v9002_v0 }
0x1d61   : > { %9709 = vmatprep.subr.mxu0 %v11066_v4 }
0x1d62   : > { %9710 = vmatpush3.msra.mxu0 %v9001_v1 }
0x1d63   : > { %9714 = vmatprep.subr.mxu0 %v11066_v4 }
0x1e1b   : > { %v5788_v51 = vpop.f32.mrf.mxu0 }
0x1e1c   : > { %v5789_v54 = vadd.f32 %v8996_v50, %v5788_v51  ;;  %v10348_v51 = vld [vmem:[#allocation7] sm:$0xff] }
0x1e1d   : > { %v9683_v20 = vpop.f32.mrf.mxu0 }
0x1e1e   : > { %v5792_v52 = vmax.f32 %v5789_v54, 0.0 }
0x1e20   : > { %9701 = vmatmul.mubr.msk.f32.vlgmr.msra.gmra.mxu1 %vm2694_vm7, %v5792_v52 }
0x1e21   : > { %9726 = vmatprep.mubr.msk.f32.mxu1 %vm11067_vm1, %v11066_v4 }
0x1ee0   : > { %v5877_v55 = vpop.f32.mrf.mxu1 }
0x1ee1   : > { %v5878_v56 = vadd.f32 %v8998_v19, %v5877_v55 }
0x1ee2   : > { %v9702_v57 = vpop.f32.mrf.mxu1 }
0x1ee3   : > { %v5881_v58 = vadd.f32 %v5878_v56, %v5707_v25 }
0x1ee5   : > { %v5882_v59 = vsel %vm1729_vm4, %v5881_v58, 0.0  ;;  %v5886_v26 = vmul.f32 %v5881_v58, %v5881_v58 }
0x1ee6   : > { %5883 = vadd.xlane.f32.xlu0 %v5882_v59 }
0x1ee7   : > { %v5887_v61 = vsel %vm1729_vm4, %v5886_v26, 0.0 }
0x1ee8   : > { %5888 = vadd.xlane.f32.xlu1 %v5887_v61 }
0x1f6f   : > { %v5884_v2 = vpop.xlane.xlu0 %5883 }
0x1f70   : > { %v5885_v3 = vmul.f32 0.03125, %v5884_v2 }
0x1f71   : > { %v5889_v7 = vpop.xlane.xlu1 %5888 }
0x1f72   : > { %v5891_v11 = vmul.f32 %v5885_v3, %v5885_v3  ;;  %v5890_v12 = vmul.f32 0.03125, %v5889_v7  ;;  %v5893_v10 = vsub.f32 %v5881_v58, %v5885_v3 }
0x1f74   : > { %v5892_v13 = vsub.f32 %v5890_v12, %v5891_v11 }
0x1f76   : > { %v5894_v14 = vadd.f32 1e-05, %v5892_v13 }
0x1f78   : > { %10307 = vrsqrt.f32 %v5894_v14 }
0x1f85   : > { %v10308_v17 = vpop.eup %10307 }
0x1f86   : > { %v5896_v18 = vmul.f32 %v10308_v17, %v5893_v10 }
0x1f88   : > { %v5901_v22 = vmul.f32 %v5900_v16, %v5896_v18 }
0x1f8a   : > { %v12164_v41 = vadd.f32 %v5905_v21, %v5901_v22 }
0x1f8c   : > { %9712 = vmatmul.mubr.msk.f32.vlgmr.msra.gmra.mxu0 %vm1729_vm4, %v12164_v41 }
0x1f8d   : > { %9716 = vmatprep.mubr.msk.f32.mxu0 %vm11067_vm1, %v11066_v4 }
0x204c   : > { %v5991_v24 = vpop.f32.mrf.mxu0 }
0x204d   : > { %v12170_v27 = vadd.f32 %v9005_v60, %v5991_v24 }
0x204e   : > { %v9713_v28 = vpop.f32.mrf.mxu0 }
0x204f   : > { %6170 = vrot.lane.b32.xlu1 %v12170_v27, %s12655_s6  ;;  %6003 = vrot.lane.b32.xlu0 %v12170_v27, %s12656_s1 }
0x2053   : > { %6168 = vrot.lane.b32.xlu1 %v12170_v27, %s12658_s9  ;;  %6337 = vrot.lane.b32.xlu0 %v12170_v27, %s12657_s8 }
0x2057   : > { %6335 = vrot.lane.b32.xlu1 %v12170_v27, %s12659_s10  ;;  %6504 = vrot.lane.b32.xlu0 %v12170_v27, %s12645_s0 }
0x205b   : > { %6502 = vrot.lane.b32.xlu1 %v12170_v27, %s12660_s11 }
0x20c1   : > { %v6171_v34 = vpop.permute.xlu1 %6170  ;;  %v6004_v29 = vpop.permute.xlu0 %6003 }
0x20c2   : > { %9715 = vmatpush3.xpose.msk.msra.mxu0 %vm1811_vm5, %v6004_v29  ;;  %9725 = vmatpush3.xpose.msk.msra.mxu1 %vm1811_vm5, %v6171_v34 }
0x20c3   : > { %9734 = vmatprep.subr.mxu1 %v11066_v4  ;;  %9719 = vmatprep.subr.mxu0 %v11066_v4 }
0x20c5   : > { %v6169_v30 = vpop.permute.xlu1 %6168  ;;  %9717 = vmatmul.mubr.msk.f32.vlgmr.msra.gmra.mxu0 %vm1811_vm5, %v12170_v27  ;;  %v6338_v53 = vpop.permute.xlu0 %6337 }
0x20c6   : > { %9727 = vmatmul.mubr.msk.f32.vlgmr.msra.gmra.mxu1 %vm1811_vm5, %v6169_v30  ;;  %9721 = vmatprep.mubr.msk.f32.mxu0 %vm11067_vm1, %v11066_v4 }
0x20c7   : > { %9735 = vmatpush3.xpose.msk.msra.mxu1 %vm1811_vm5, %v6338_v53  ;;  %9736 = vmatprep.mubr.msk.f32.mxu1 %vm11067_vm1, %v11066_v4 }
0x20c8   : > { %9744 = vmatprep.subr.mxu1 %v11066_v4 }
0x20c9   : > { %v6336_v31 = vpop.permute.xlu1 %6335  ;;  %v6505_v32 = vpop.permute.xlu0 %6504 }
0x20ca   : > { %9737 = vmatmul.mubr.msk.f32.vlgmr.msra.gmra.mxu1 %vm1811_vm5, %v6336_v31 }
0x20cb   : > { %9745 = vmatpush3.xpose.msk.msra.mxu1 %vm1811_vm5, %v6505_v32  ;;  %9746 = vmatprep.mubr.msk.f32.mxu1 %vm11067_vm1, %v11066_v4 }
0x20cc   : > { %9754 = vmatprep.subr.mxu1 %v11066_v4 }
0x20cd   : > { %v6503_v33 = vpop.permute.xlu1 %6502 }
0x20ce   : > { %9747 = vmatmul.mubr.msk.f32.vlgmr.msra.gmra.mxu1 %vm1811_vm5, %v6503_v33 }
0x20cf   : > { %9762 = vmatprep.mubr.msk.f32.mxu1 %vm11067_vm1, %v11066_v4 }
0x2185   : > { %v6075_v35 = vpop.f32.mrf.mxu0 }
0x2186   : > { %v6079_v36 = vmul.f32 0.35355338, %v6075_v35  ;;  %v6242_v37 = vpop.f32.mrf.mxu1 }
0x2187   : > { %v6246_v38 = vmul.f32 0.35355338, %v6242_v37  ;;  %v9718_v39 = vpop.f32.mrf.mxu0 }
0x2188   : > { %v6080_v40 = vadd.f32 %v6079_v36, %v11935_v23  ;;  %v9728_v42 = vpop.f32.mrf.mxu1  ;;  %v9009_v39 = vld [vmem:[%s12661_s13 + $0x30] sm:$0xff] }
0x2189   : > { %v6247_v44 = vadd.f32 %v6246_v38, %v11935_v23  ;;  %v9010_v38 = vld [vmem:[%s12661_s13 + $0x38] sm:$0xff]  ;;  %v9007_v42 = vld [vmem:[%s12661_s13 + $0x20] sm:$0xff] }
0x218a   : > { %v6409_v25 = vpop.f32.mrf.mxu1  ;;  %v6081_v47 = vsel %vm1811_vm5, %v6080_v40, -inf  ;;  %9755 = vmatpush3.msra.mxu1 %v9010_v38 }
0x218b   : > { %v6413_v48 = vmul.f32 0.35355338, %v6409_v25  ;;  %6082 = vmax.xlane.f32.xlu0 %v6081_v47  ;;  %v6248_v49 = vsel %vm1811_vm5, %v6247_v44, -inf  ;;  %9756 = vmatprep.subr.mxu1 %v11066_v4 }
0x218c   : > { %6249 = vmax.xlane.f32.xlu1 %v6248_v49  ;;  %v9738_v50 = vpop.f32.mrf.mxu1  ;;  %9757 = vmatpush3.msra.mxu1 %v9009_v39 }
0x218d   : > { %v6414_v54 = vadd.f32 %v10348_v51, %v6413_v48  ;;  %9758 = vmatprep.subr.mxu1 %v11066_v4 }
0x218e   : > { %v6576_v20 = vpop.f32.mrf.mxu1 }
0x218f   : > { %v6580_v52 = vmul.f32 0.35355338, %v6576_v20  ;;  %v6415_v19 = vsel %vm1811_vm5, %v6414_v54, -inf }
0x2190   : > { %6416 = vmax.xlane.f32.xlu0 %v6415_v19  ;;  %v9748_v55 = vpop.f32.mrf.mxu1 }
0x2191   : > { %v6581_v56 = vadd.f32 %v10348_v51, %v6580_v52 }
0x2193   : > { %v6582_v23 = vsel %vm1811_vm5, %v6581_v56, -inf }
0x2194   : > { %6583 = vmax.xlane.f32.xlu0 %v6582_v23  ;;  %v9034_v23 = vld [vmem:[%s12662_s17 + $0x38] sm:$0xff] }
0x219d   : > { %6092 = vrot.lane.b32.xlu1 %v12170_v27, %s12647_s2 }
0x2214   : > { %v6083_v57 = vpop.xlane.xlu0 %6082 }
0x2215   : > { %v6084_v58 = vsub.f32 %v6080_v40, %v6083_v57  ;;  %v6250_v59 = vpop.xlane.xlu1 %6249  ;;  %v9008_v40 = vld [vmem:[%s12661_s13 + $0x28] sm:$0xff] }
0x2216   : > { %v6251_v26 = vsub.f32 %v6247_v44, %v6250_v59  ;;  %9759 = vmatpush3.msra.mxu1 %v9008_v40  ;;  %v9032_v59 = vld [vmem:[%s12662_s17 + $0x28] sm:$0xff] }
0x2217   : > { %v6085_v61 = vmul.f32 1.442695, %v6084_v58  ;;  %9760 = vmatprep.subr.mxu1 %v11066_v4  ;;  %v9033_v58 = vld [vmem:[%s12662_s17 + $0x30] sm:$0xff] }
0x2218   : > { %v6252_v62 = vmul.f32 1.442695, %v6251_v26  ;;  %9761 = vmatpush3.msra.mxu1 %v9007_v42  ;;  %v9031_v26 = vld [vmem:[%s12662_s17 + $0x20] sm:$0xff] }
0x2219   : > { %10309 = vpow2.f32 %v6085_v61  ;;  %v6093_v63 = vpop.permute.xlu1 %6092  ;;  %v6417_v0 = vpop.xlane.xlu0 %6416  ;;  %9776 = vmatprep.subr.mxu1 %v11066_v4  ;;  %v9023_v61 = vld [vmem:[#allocation16 + $0x1] ss:$0 sm:$0xff] }
0x221a   : > { %10311 = vpow2.f32 %v6252_v62  ;;  %v6418_v1 = vsub.f32 %v6414_v54, %v6417_v0  ;;  %9720 = vmatpush3.msra.mxu0 %v6093_v63 }
0x221b   : > { %9729 = vmatprep.subr.mxu0 %v11066_v4 }
0x221c   : > { %v6419_v2 = vmul.f32 1.442695, %v6418_v1 }
0x221d   : > { %v6584_v3 = vpop.xlane.xlu0 %6583 }
0x221e   : > { %10313 = vpow2.f32 %v6419_v2  ;;  %v6585_v7 = vsub.f32 %v6581_v56, %v6584_v3 }
0x2220   : > { %v6586_v11 = vmul.f32 1.442695, %v6585_v7 }
0x2222   : > { %10315 = vpow2.f32 %v6586_v11 }
0x2226   : > { %v10310_v12 = vpop.eup %10309 }
0x2227   : > { %v10312_v13 = vpop.eup %10311  ;;  %v6087_v14 = vsel %vm1811_vm5, %v10310_v12, 0.0 }
0x2228   : > { %6088 = vadd.xlane.f32.xlu1 %v6087_v14  ;;  %v6254_v10 = vsel %vm1811_vm5, %v10312_v13, 0.0  ;;  %v9035_v14 = vld [vmem:[#allocation19 + $0x1] ss:$0 sm:$0xff] }
0x2229   : > { %6255 = vadd.xlane.f32.xlu0 %v6254_v10  ;;  %v9026_v10 = vld [vmem:[%s12663_s19 + $0x28] sm:$0xff] }
0x222b   : > { %v10314_v16 = vpop.eup %10313 }
0x222c   : > { %v6421_v17 = vsel %vm1811_vm5, %v10314_v16, 0.0 }
0x222d   : > { %6422 = vadd.xlane.f32.xlu1 %v6421_v17 }
0x222f   : > { %v10316_v18 = vpop.eup %10315 }
0x2230   : > { %v6588_v21 = vsel %vm1811_vm5, %v10316_v18, 0.0 }
0x2231   : > { %6589 = vadd.xlane.f32.xlu0 %v6588_v21 }
0x223e   : > { %6426 = vrot.lane.b32.xlu1 %v12170_v27, %s12648_s28 }
0x2242   : > { %6593 = vrot.lane.b32.xlu1 %v12170_v27, %s12649_s15 }
0x2247   : > { %6259 = vrot.lane.b32.xlu0 %v12170_v27, %s12646_s4 }
0x22b1   : > { %v6089_v22 = vpop.xlane.xlu1 %6088 }
0x22b2   : > { %10317 = vrcp.f32 %v6089_v22  ;;  %v6256_v60 = vpop.xlane.xlu0 %6255 }
0x22b3   : > { %10319 = vrcp.f32 %v6256_v60 }
0x22b6   : > { %v6423_v24 = vpop.xlane.xlu1 %6422 }
0x22b7   : > { %10321 = vrcp.f32 %v6423_v24 }
0x22ba   : > { %v6590_v28 = vpop.xlane.xlu0 %6589  ;;  %v6427_v31 = vpop.permute.xlu1 %6426 }
0x22bb   : > { %10323 = vrcp.f32 %v6590_v28 }
0x22be   : > { %v6260_v53 = vpop.permute.xlu0 %6259  ;;  %v6594_v36 = vpop.permute.xlu1 %6593 }
0x22bf   : > { %v10318_v34 = vpop.eup %10317 }
0x22c0   : > { %v6091_v29 = vmul.f32 %v10318_v34, %v10310_v12  ;;  %v10320_v30 = vpop.eup %10319  ;;  %v9028_v12 = vld [vmem:[%s12663_s19 + $0x38] sm:$0xff] }
0x22c1   : > { %v6258_v27 = vmul.f32 %v10320_v30, %v10312_v13  ;;  %v9027_v13 = vld [vmem:[%s12663_s19 + $0x30] sm:$0xff] }
0x22c2   : > { %9722 = vmatmul.mubr.msk.f32.vlgmr.msra.gmra.mxu0 %vm1811_vm5, %v6091_v29  ;;  %v12288_v29 = vld [vmem:[%s12664_s20 + $0x8] sm:$0x3f] }
0x22c3   : > { %9730 = vmatpush3.msra.mxu0 %v6260_v53  ;;  %9731 = vmatprep.mubr.msk.f32.mxu0 %vm11067_vm1, %v11066_v4  ;;  %v6782_v53 = vrot.slane %v12288_v29, %v11701_v6  ;;  %v9029_v6 = vld [vmem:[#allocation17 + $0x1] ss:$0 sm:$0xff] }
0x22c4   : > { %9739 = vmatprep.subr.mxu0 %v11066_v4  ;;  %v10322_v32 = vpop.eup %10321 }
0x22c5   : > { %v6425_v33 = vmul.f32 %v10322_v32, %v10314_v16  ;;  %v6787_v32 = vrot.slane %v12288_v29, %v11706_v8 }
0x22c6   : > { %9732 = vmatmul.mubr.msk.f32.vlgmr.msra.gmra.mxu0 %vm1811_vm5, %v6258_v27 }
0x22c7   : > { %9740 = vmatpush3.msra.mxu0 %v6427_v31  ;;  %9741 = vmatprep.mubr.msk.f32.mxu0 %vm11067_vm1, %v11066_v4 }
0x22c8   : > { %9749 = vmatprep.subr.mxu0 %v11066_v4  ;;  %v10324_v35 = vpop.eup %10323 }
0x22c9   : > { %v6592_v37 = vmul.f32 %v10324_v35, %v10316_v18 }
0x22ca   : > { %9742 = vmatmul.mubr.msk.f32.vlgmr.msra.gmra.mxu0 %vm1811_vm5, %v6425_v33 }
0x22cb   : > { %9750 = vmatpush3.msra.mxu0 %v6594_v36  ;;  %9751 = vmatprep.mubr.msk.f32.mxu0 %vm11067_vm1, %v11066_v4 }
0x22cc   : > { %9765 = vmatprep.subr.mxu0 %v11066_v4 }
0x22ce   : > { %9752 = vmatmul.mubr.msk.f32.vlgmr.msra.gmra.mxu0 %vm1811_vm5, %v6592_v37 }
0x22cf   : > { %9773 = vmatprep.mubr.msk.f32.mxu0 %vm11067_vm1, %v11066_v4  ;;  %9766 = vmatpush3.msra.mxu0 %v9028_v12 }
0x22d0   : > { %9767 = vmatprep.subr.mxu0 %v11066_v4 }
0x22d1   : > { %9768 = vmatpush3.msra.mxu0 %v9027_v13 }
0x22d2   : > { %9769 = vmatprep.subr.mxu0 %v11066_v4 }
0x22d3   : > { %9770 = vmatpush3.msra.mxu0 %v9026_v10 }
0x22d4   : > { %9771 = vmatprep.subr.mxu0 %v11066_v4 }
0x2382   : > { %v6164_v44 = vpop.f32.mrf.mxu0 }
0x2384   : > { %v9723_v25 = vpop.f32.mrf.mxu0 }
0x2386   : > { %v6331_v47 = vpop.f32.mrf.mxu0 }
0x2387   : > { %6670 = vrot.lane.b32.xlu0 %v6331_v47, %s12650_s12 }
0x2388   : > { %v9733_v48 = vpop.f32.mrf.mxu0 }
0x238a   : > { %v6498_v49 = vpop.f32.mrf.mxu0 }
0x238b   : > { %6674 = vrot.lane.b32.xlu1 %v6498_v49, %s12651_s18 }
0x238c   : > { %v9743_v50 = vpop.f32.mrf.mxu0 }
0x238e   : > { %v6665_v51 = vpop.f32.mrf.mxu0 }
0x238f   : > { %6678 = vrot.lane.b32.xlu0 %v6665_v51, %s12652_s3 }
0x2390   : > { %v9753_v54 = vpop.f32.mrf.mxu0 }
0x23f9   : > { %v6671_v20 = vpop.permute.xlu0 %6670 }
0x23fa   : > { %v6681_v19 = vsel %vm1811_vm5, %v6164_v44, %v6671_v20 }
0x23fd   : > { %v6675_v52 = vpop.permute.xlu1 %6674 }
0x23fe   : > { %v6682_v55 = vsel %vm1476_vm0, %v6681_v19, %v6675_v52 }
0x2401   : > { %v6679_v56 = vpop.permute.xlu0 %6678 }
0x2402   : > { %v6683_v57 = vsel %vm2486_vm6, %v6682_v55, %v6679_v56 }
0x2403   : > { %9763 = vmatmul.mubr.msk.f32.vlgmr.msra.gmra.mxu1 %vm1729_vm4, %v6683_v57 }
0x2404   : > { %9777 = vmatpush3.msra.mxu1 %v9034_v23  ;;  %9784 = vmatprep.mubr.msk.f32.mxu1 %vm11067_vm1, %v11066_v4 }
0x2405   : > { %9778 = vmatprep.subr.mxu1 %v11066_v4 }
0x2406   : > { %9779 = vmatpush3.msra.mxu1 %v9033_v58 }
0x2407   : > { %9780 = vmatprep.subr.mxu1 %v11066_v4 }
0x2408   : > { %9781 = vmatpush3.msra.mxu1 %v9032_v59 }
0x2409   : > { %9782 = vmatprep.subr.mxu1 %v11066_v4 }
0x240a   : > { %9783 = vmatpush3.msra.mxu1 %v9031_v26 }
0x240b   : > { %9785 = vmatmul.mubr.msk.f32.vlgmr.msra.gmra.mxu1 %vm1729_vm4, %v12006_v9  ;;  %9797 = vmatprep.subr.mxu1 %v11066_v4 }
0x240c   : > { %9799 = vmatprep.mubr.msk.f32.mxu1 %vm11067_vm1, %v11066_v4 }
0x24c3   : > { %v6759_v62 = vpop.f32.mrf.mxu1 }
0x24c4   : > { %v6760_v63 = vadd.f32 %v9023_v61, %v6759_v62 }
0x24c5   : > { %v9764_v0 = vpop.f32.mrf.mxu1 }
0x24c6   : > { %v6763_v1 = vadd.f32 %v6760_v63, %v12164_v41  ;;  %v9025_v41 = vld [vmem:[%s12663_s19 + $0x20] sm:$0xff] }
0x24c7   : > { %9772 = vmatpush3.msra.mxu0 %v9025_v41 }
0x24c8   : > { %v6764_v2 = vsel %vm1729_vm4, %v6763_v1, 0.0  ;;  %v6768_v3 = vmul.f32 %v6763_v1, %v6763_v1  ;;  %9787 = vmatprep.subr.mxu0 %v11066_v4 }
0x24c9   : > { %6765 = vadd.xlane.f32.xlu1 %v6764_v2 }
0x24ca   : > { %v6769_v9 = vsel %vm1729_vm4, %v6768_v3, 0.0 }
0x24cb   : > { %v6954_v7 = vpop.f32.mrf.mxu1  ;;  %6770 = vadd.xlane.f32.xlu0 %v6769_v9 }
0x24cc   : > { %v12277_v16 = vadd.f32 %v9035_v14, %v6954_v7 }
0x24cd   : > { %v9786_v11 = vpop.f32.mrf.mxu1 }
0x24e1   : > { %7131 = vrot.lane.b32.xlu0 %v12277_v16, %s12658_s9 }
0x2552   : > { %v6766_v17 = vpop.xlane.xlu1 %6765 }
0x2553   : > { %v6767_v18 = vmul.f32 0.03125, %v6766_v17 }
0x2554   : > { %v6771_v21 = vpop.xlane.xlu0 %6770 }
0x2555   : > { %v6773_v22 = vmul.f32 %v6767_v18, %v6767_v18  ;;  %v6772_v60 = vmul.f32 0.03125, %v6771_v21  ;;  %v6775_v30 = vsub.f32 %v6763_v1, %v6767_v18 }
0x2557   : > { %v6774_v24 = vsub.f32 %v6772_v60, %v6773_v22 }
0x2558   : > { %v7132_v28 = vpop.permute.xlu0 %7131 }
0x2559   : > { %v6776_v34 = vadd.f32 1e-05, %v6774_v24  ;;  %9798 = vmatpush3.xpose.msk.msra.mxu1 %vm1811_vm5, %v7132_v28 }
0x255a   : > { %9807 = vmatprep.subr.mxu1 %v11066_v4 }
0x255b   : > { %10325 = vrsqrt.f32 %v6776_v34 }
0x2568   : > { %v10326_v31 = vpop.eup %10325 }
0x2569   : > { %v6778_v27 = vmul.f32 %v10326_v31, %v6775_v30 }
0x256b   : > { %v6783_v33 = vmul.f32 %v6782_v53, %v6778_v27 }
0x256d   : > { %v12294_v35 = vadd.f32 %v6787_v32, %v6783_v33 }
0x256f   : > { %9774 = vmatmul.mubr.msk.f32.vlgmr.msra.gmra.mxu0 %vm1729_vm4, %v12294_v35 }
0x2570   : > { %9788 = vmatpush3.xpose.msk.msra.mxu0 %vm1811_vm5, %v12277_v16  ;;  %9789 = vmatprep.mubr.msk.f32.mxu0 %vm11067_vm1, %v11066_v4 }
0x2571   : > { %9792 = vmatprep.subr.mxu0 %v11066_v4 }
0x262f   : > { %v6871_v36 = vpop.f32.mrf.mxu0 }
0x2630   : > { %v6872_v37 = vadd.f32 %v9029_v6, %v6871_v36 }
0x2631   : > { %v9775_v38 = vpop.f32.mrf.mxu0 }
0x2632   : > { %7129 = vrot.lane.b32.xlu1 %v6872_v37, %s12658_s9  ;;  %7295 = vrot.lane.b32.xlu0 %v6872_v37, %s12659_s10  ;;  %s12666_s9 = sld [smem:[#allocation77_spill]] }
0x2633   : > { %9790 = vmatmul.mubr.msk.f32.vlgmr.msra.gmra.mxu0 %vm1811_vm5, %v6872_v37 }
0x2634   : > { %9794 = vmatprep.mubr.msk.f32.mxu0 %vm11067_vm1, %v11066_v4 }
0x2636   : > { %7297 = vrot.lane.b32.xlu1 %v12277_v16, %s12659_s10  ;;  %7461 = vrot.lane.b32.xlu0 %v6872_v37, %s12660_s11 }
0x263a   : > { %7463 = vrot.lane.b32.xlu1 %v12277_v16, %s12660_s11  ;;  %s11082_s11 = smov [#allocation35]  }
0x263b   : > { %s10899_s2 = sshll.u32 %s11082_s11, 4  ;;  %s10900_s2 = int_to_ptr.vmem [resolvable:$false] %s10899_s2 }
0x263c   : > { %s10901_s4 = scalar_lea.vmem %s10900_s2, 256 }
0x26a4   : > { %v7130_v8 = vpop.permute.xlu1 %7129  ;;  %v7296_v40 = vpop.permute.xlu0 %7295 }
0x26a5   : > { %9800 = vmatmul.mubr.msk.f32.vlgmr.msra.gmra.mxu1 %vm1811_vm5, %v7130_v8 }
0x26a6   : > { %9809 = vmatprep.mubr.msk.f32.mxu1 %vm11067_vm1, %v11066_v4 }
0x26a8   : > { %v7298_v39 = vpop.permute.xlu1 %7297  ;;  %v7462_v44 = vpop.permute.xlu0 %7461 }
0x26a9   : > { %9808 = vmatpush3.xpose.msk.msra.mxu1 %vm1811_vm5, %v7298_v39 }
0x26aa   : > { %9817 = vmatprep.subr.mxu1 %v11066_v4 }
0x26ac   : > { %v7464_v42 = vpop.permute.xlu1 %7463  ;;  %9810 = vmatmul.mubr.msk.f32.vlgmr.msra.gmra.mxu1 %vm1811_vm5, %v7296_v40 }
0x26ad   : > { %9818 = vmatpush3.xpose.msk.msra.mxu1 %vm1811_vm5, %v7464_v42  ;;  %9819 = vmatprep.mubr.msk.f32.mxu1 %vm11067_vm1, %v11066_v4  ;;  %v6962_v42 = vld [vmem:[#allocation20 + $0x38] sm:$0xff] }
0x26ae   : > { %9827 = vmatprep.subr.mxu1 %v11066_v4 }
0x26b0   : > { %9820 = vmatmul.mubr.msk.f32.vlgmr.msra.gmra.mxu1 %vm1811_vm5, %v7462_v44  ;;  %v6961_v44 = vld [vmem:[#allocation20 + $0x30] sm:$0xff] }
0x26b1   : > { %9835 = vmatprep.mubr.msk.f32.mxu1 %vm11067_vm1, %v11066_v4  ;;  %9828 = vmatpush3.msra.mxu1 %v6962_v42 }
0x26b2   : > { %9829 = vmatprep.subr.mxu1 %v11066_v4 }
0x26b3   : > { %9830 = vmatpush3.msra.mxu1 %v6961_v44 }
0x26b4   : > { %9831 = vmatprep.subr.mxu1 %v11066_v4 }
0x26f3   : > { %v7037_v25 = vpop.f32.mrf.mxu0 }
0x26f4   : > { %v7041_v47 = vmul.f32 0.35355338, %v7037_v25  ;;  %v6960_v25 = vld [vmem:[#allocation20 + $0x28] sm:$0xff] }
0x26f5   : > { %v9791_v48 = vpop.f32.mrf.mxu0  ;;  %9832 = vmatpush3.msra.mxu1 %v6960_v25 }
0x26f6   : > { %v7042_v49 = vsel %vm1811_vm5, %v7041_v47, -inf  ;;  %9833 = vmatprep.subr.mxu1 %v11066_v4 }
0x26f7   : > { %7043 = vmax.xlane.f32.xlu1 %v7042_v49 }
0x2765   : > { %v7203_v50 = vpop.f32.mrf.mxu1 }
0x2766   : > { %v7207_v51 = vmul.f32 0.35355338, %v7203_v50 }
0x2767   : > { %v9801_v54 = vpop.f32.mrf.mxu1 }
0x2768   : > { %v7208_v20 = vsel %vm1811_vm5, %v7207_v51, -inf }
0x2769   : > { %7209 = vmax.xlane.f32.xlu0 %v7208_v20 }
0x276c   : > { %v7369_v52 = vpop.f32.mrf.mxu1 }
0x276d   : > { %v7373_v19 = vmul.f32 0.35355338, %v7369_v52 }
0x276e   : > { %v9811_v55 = vpop.f32.mrf.mxu1 }
0x276f   : > { %v7374_v56 = vsel %vm1811_vm5, %v7373_v19, -inf }
0x2770   : > { %7375 = vmax.xlane.f32.xlu0 %v7374_v56  ;;  %v7535_v23 = vpop.f32.mrf.mxu1 }
0x2771   : > { %v7539_v57 = vmul.f32 0.35355338, %v7535_v23 }
0x2772   : > { %v9821_v58 = vpop.f32.mrf.mxu1 }
0x2773   : > { %v7540_v59 = vsel %vm1811_vm5, %v7539_v57, -inf  ;;  %v9049_v58 = vld [vmem:[#allocation22 + $0x1] ss:$0 sm:$0xff] }
0x2774   : > { %7541 = vmax.xlane.f32.xlu1 %v7540_v59 }
0x2780   : > { %v7044_v26 = vpop.xlane.xlu1 %7043 }
0x2781   : > { %v7045_v61 = vsub.f32 %v7041_v47, %v7044_v26  ;;  %v6959_v47 = vld [vmem:[#allocation20 + $0x20] sm:$0xff] }
0x2782   : > { %9834 = vmatpush3.msra.mxu1 %v6959_v47 }
0x2783   : > { %v7046_v62 = vmul.f32 1.442695, %v7045_v61  ;;  %9849 = vmatprep.subr.mxu1 %v11066_v4 }
0x2785   : > { %10327 = vpow2.f32 %v7046_v62  ;;  %7219 = vrot.lane.b32.xlu1 %v12277_v16, %s12655_s6 }
0x2792   : > { %v10328_v63 = vpop.eup %10327 }
0x2793   : > { %v7048_v0 = vsel %vm1811_vm5, %v10328_v63, 0.0 }
0x2794   : > { %7049 = vadd.xlane.f32.xlu0 %v7048_v0 }
0x27aa   : > { %7053 = vrot.lane.b32.xlu0 %v12277_v16, %s12656_s1  ;;  %s9074_s1 = sshll.u32 %s11304_s22, 7 }
0x27f2   : > { %v7210_v1 = vpop.xlane.xlu0 %7209 }
0x27f3   : > { %v7211_v2 = vsub.f32 %v7207_v51, %v7210_v1 }
0x27f5   : > { %v7212_v3 = vmul.f32 1.442695, %v7211_v2  ;;  %v7751_v2 = vld [vmem:[#allocation23 + $0x38] sm:$0xff] }
0x27f7   : > { %10329 = vpow2.f32 %v7212_v3  ;;  %v7750_v3 = vld [vmem:[#allocation23 + $0x30] sm:$0xff] }
0x27f9   : > { %v7376_v9 = vpop.xlane.xlu0 %7375 }
0x27fa   : > { %v7377_v7 = vsub.f32 %v7373_v19, %v7376_v9  ;;  %v7749_v9 = vld [vmem:[#allocation23 + $0x28] sm:$0xff] }
0x27fc   : > { %v7378_v11 = vmul.f32 1.442695, %v7377_v7  ;;  %v9060_v7 = vld [vmem:[%s12665_s21 + $0x78] sm:$0xff] }
0x27fd   : > { %v7542_v12 = vpop.xlane.xlu1 %7541 }
0x27fe   : > { %10331 = vpow2.f32 %v7378_v11  ;;  %v7543_v13 = vsub.f32 %v7539_v57, %v7542_v12  ;;  %v9059_v11 = vld [vmem:[%s12665_s21 + $0x70] sm:$0xff]  ;;  %v9058_v12 = vld [vmem:[%s12665_s21 + $0x68] sm:$0xff] }
0x2800   : > { %v7544_v14 = vmul.f32 1.442695, %v7543_v13  ;;  %v9057_v13 = vld [vmem:[%s12665_s21 + $0x60] sm:$0xff] }
0x2801   : > { %v7220_v30 = vpop.permute.xlu1 %7219 }
0x2802   : > { %10333 = vpow2.f32 %v7544_v14  ;;  %v9056_v14 = vld [vmem:[%s12665_s21 + $0x58] sm:$0xff] }
0x2804   : > { %v10330_v10 = vpop.eup %10329 }
0x2805   : > { %v7214_v41 = vsel %vm1811_vm5, %v10330_v10, 0.0 }
0x2806   : > { %7215 = vadd.xlane.f32.xlu1 %v7214_v41 }
0x280b   : > { %v10332_v17 = vpop.eup %10331 }
0x280c   : > { %v7380_v18 = vsel %vm1811_vm5, %v10332_v17, 0.0 }
0x280d   : > { %7381 = vadd.xlane.f32.xlu0 %v7380_v18 }
0x280f   : > { %v10334_v21 = vpop.eup %10333 }
0x2810   : > { %v7546_v22 = vsel %vm1811_vm5, %v10334_v21, 0.0 }
0x2811   : > { %7547 = vadd.xlane.f32.xlu1 %v7546_v22 }
0x281d   : > { %v7050_v60 = vpop.xlane.xlu0 %7049 }
0x281e   : > { %10335 = vrcp.f32 %v7050_v60 }
0x2821   : > { %v7054_v24 = vpop.permute.xlu0 %7053 }
0x2822   : > { %9793 = vmatpush3.msra.mxu0 %v7054_v24  ;;  %7385 = vrot.lane.b32.xlu1 %v12277_v16, %s12657_s8 }
0x2823   : > { %7551 = vrot.lane.b32.xlu0 %v12277_v16, %s12645_s0  ;;  %9802 = vmatprep.subr.mxu0 %v11066_v4 }
0x282b   : > { %v10336_v28 = vpop.eup %10335 }
0x282c   : > { %v7052_v34 = vmul.f32 %v10336_v28, %v10328_v63  ;;  %v7740_v28 = vrot.slane %v12288_v29, %v11735_v45  ;;  %v9051_v45 = vld [vmem:[#allocation25 + $0x1] ss:$0 sm:$0xff] }
0x282e   : > { %9795 = vmatmul.mubr.msk.f32.vlgmr.msra.gmra.mxu0 %vm1811_vm5, %v7052_v34 }
0x282f   : > { %9803 = vmatpush3.msra.mxu0 %v7220_v30  ;;  %9804 = vmatprep.mubr.msk.f32.mxu0 %vm11067_vm1, %v11066_v4 }
0x2830   : > { %9812 = vmatprep.subr.mxu0 %v11066_v4 }
0x288f   : > { %v7216_v53 = vpop.xlane.xlu1 %7215 }
0x2890   : > { %10337 = vrcp.f32 %v7216_v53  ;;  %v7745_v53 = vrot.slane %v12288_v29, %v11738_v46 }
0x2896   : > { %v7382_v31 = vpop.xlane.xlu0 %7381 }
0x2897   : > { %10339 = vrcp.f32 %v7382_v31 }
0x289a   : > { %v7548_v27 = vpop.xlane.xlu1 %7547  ;;  %v7552_v37 = vpop.permute.xlu0 %7551 }
0x289b   : > { %10341 = vrcp.f32 %v7548_v27 }
0x289d   : > { %v10338_v16 = vpop.eup %10337 }
0x289e   : > { %v7386_v32 = vpop.permute.xlu1 %7385  ;;  %v7218_v33 = vmul.f32 %v10338_v16, %v10330_v10  ;;  %v9055_v16 = vld [vmem:[%s12665_s21 + $0x50] sm:$0xff] }
0x28a0   : > { %9805 = vmatmul.mubr.msk.f32.vlgmr.msra.gmra.mxu0 %vm1811_vm5, %v7218_v33  ;;  %v9053_v33 = vld [vmem:[%s12665_s21 + $0x40] sm:$0xff] }
0x28a1   : > { %9813 = vmatpush3.msra.mxu0 %v7386_v32  ;;  %9814 = vmatprep.mubr.msk.f32.mxu0 %vm11067_vm1, %v11066_v4  ;;  %v9054_v32 = vld [vmem:[%s12665_s21 + $0x48] sm:$0xff] }
0x28a2   : > { %9822 = vmatprep.subr.mxu0 %v11066_v4 }
0x28a4   : > { %v10340_v6 = vpop.eup %10339 }
0x28a5   : > { %v7384_v36 = vmul.f32 %v10340_v6, %v10332_v17 }
0x28a7   : > { %9815 = vmatmul.mubr.msk.f32.vlgmr.msra.gmra.mxu0 %vm1811_vm5, %v7384_v36 }
0x28a8   : > { %v10342_v38 = vpop.eup %10341  ;;  %9823 = vmatpush3.msra.mxu0 %v7552_v37  ;;  %9824 = vmatprep.mubr.msk.f32.mxu0 %vm11067_vm1, %v11066_v4 }
0x28a9   : > { %v7550_v8 = vmul.f32 %v10342_v38, %v10334_v21  ;;  %9838 = vmatprep.subr.mxu0 %v11066_v4  ;;  %v9061_v38 = vld [vmem:[#allocation26 + $0x1] ss:$0 sm:$0xff] }
0x28ab   : > { %9825 = vmatmul.mubr.msk.f32.vlgmr.msra.gmra.mxu0 %vm1811_vm5, %v7550_v8 }
0x28ac   : > { %9846 = vmatprep.mubr.msk.f32.mxu0 %vm11067_vm1, %v11066_v4  ;;  %9839 = vmatpush3.msra.mxu0 %v7751_v2  ;;  %v8196_v2 = vld [vmem:[#allocation29 + $0x28] sm:$0xff] }
0x28ad   : > { %9840 = vmatprep.subr.mxu0 %v11066_v4 }
0x28ae   : > { %9841 = vmatpush3.msra.mxu0 %v7750_v3 }
0x28af   : > { %9842 = vmatprep.subr.mxu0 %v11066_v4 }
0x28b0   : > { %9843 = vmatpush3.msra.mxu0 %v7749_v9  ;;  %v8044_v9 = vld [vmem:[#allocation29 + $0x8] sm:$0xff] }
0x28b1   : > { %9844 = vmatprep.subr.mxu0 %v11066_v4 }
0x28ee   : > { %v7125_v39 = vpop.f32.mrf.mxu0 }
0x28f0   : > { %v9796_v40 = vpop.f32.mrf.mxu0 }
0x2960   : > { %v7291_v48 = vpop.f32.mrf.mxu0 }
0x2961   : > { %7628 = vrot.lane.b32.xlu1 %v7291_v48, %s12650_s12  ;;  %v7953_v48 = vld [vmem:[%s12666_s9 + $0x18] sm:$0xff]  ;;  %s8532_s12 = scalar_lea.hbm %s11281_s14, %s9074_s1 }
0x2962   : > { %v9806_v49 = vpop.f32.mrf.mxu0 }
0x2963   : > { %v7952_v49 = vld [vmem:[%s12666_s9 + $0x10] sm:$0xff] }
0x2967   : > { %v7457_v50 = vpop.f32.mrf.mxu0 }
0x2968   : > { %7632 = vrot.lane.b32.xlu0 %v7457_v50, %s12651_s18  ;;  %v7951_v50 = vld [vmem:[%s12666_s9 + $0x8] sm:$0xff] }
0x2969   : > { %v9816_v51 = vpop.f32.mrf.mxu0 }
0x296a   : > { %v7950_v51 = vld [vmem:[%s12666_s9] sm:$0xff] }
0x296b   : > { %v7623_v54 = vpop.f32.mrf.mxu0 }
0x296c   : > { %7636 = vrot.lane.b32.xlu1 %v7623_v54, %s12652_s3  ;;  %s1453_s3 = sand.u32 1, %s10991_s16  }
0x296d   : > { %v9826_v20 = vpop.f32.mrf.mxu0  ;;  %s8891_s8 = sshll.u32 %s1453_s3, 3  ;;  %s8521_s15 = scalar_lea.sflag [#allocation4], %s1453_s3 }
0x296e   : > { %s1455_s10 = scalar_lea.vmem [#allocation35], %s8891_s8 }
0x296f   : > { %s8534_s28 = sshll.u32 %s1455_s10, 4  ;;  %s8535_s28 = int_to_ptr.vmem [resolvable:$true] %s8534_s28 }
0x2970   : > { %s10895_s18 = scalar_lea.vmem %s8535_s28, 128  ;;  %p10902_p9 = scmp.lt.s32.totalorder %s8535_s28, %s10900_s2 }
0x2971   : > { %p10896_p11 = scmp.ne.s32.totalorder %s8535_s28, %s10895_s18  ;;  %p10903_p3 = scmp.lt.s32.totalorder %s10901_s4, %s10895_s18 }
0x2973   : > { %p10897_p1 = pnand %p10896_p11, %p12667_p0  ;;  %p10904_p4 = por %p10903_p3, %p10902_p9 }
0x2975   : > { %p10898_p2 = pneg %p10897_p1 }
0x2977   : > { %p10905_p13 = pnand %p10904_p4, %p10898_p2 }
0x29d3   : > { %v7629_v52 = vpop.permute.xlu1 %7628 }
0x29d4   : > { %v7639_v55 = vsel %vm1811_vm5, %v7125_v39, %v7629_v52 }
0x29da   : > { %v7633_v19 = vpop.permute.xlu0 %7632 }
0x29db   : > { %v7640_v56 = vsel %vm1476_vm0, %v7639_v55, %v7633_v19 }
0x29de   : > { %v7637_v23 = vpop.permute.xlu1 %7636 }
0x29df   : > { %v7641_v57 = vsel %vm2486_vm6, %v7640_v56, %v7637_v23 }
0x29e0   : > { %9836 = vmatmul.mubr.msk.f32.vlgmr.msra.gmra.mxu1 %vm1729_vm4, %v7641_v57 }
0x29e1   : > { %9865 = vmatprep.mubr.msk.f32.mxu1 %vm11067_vm1, %v11066_v4  ;;  %9850 = vmatpush3.msra.mxu1 %v9060_v7 }
0x29e2   : > { %9851 = vmatprep.subr.mxu1 %v11066_v4 }
0x29e3   : > { %9852 = vmatpush3.msra.mxu1 %v9059_v11 }
0x29e4   : > { %9853 = vmatprep.subr.mxu1 %v11066_v4 }
0x29e5   : > { %9854 = vmatpush3.msra.mxu1 %v9058_v12  ;;  %v8043_v12 = vld [vmem:[#allocation29] sm:$0xff] }
0x29e6   : > { %9855 = vmatprep.subr.mxu1 %v11066_v4 }
0x29e7   : > { %9856 = vmatpush3.msra.mxu1 %v9057_v13 }
0x29e8   : > { %9857 = vmatprep.subr.mxu1 %v11066_v4 }
0x29e9   : > { %9858 = vmatpush3.msra.mxu1 %v9056_v14 }
0x29ea   : > { %9859 = vmatprep.subr.mxu1 %v11066_v4 }
0x29eb   : > { %9860 = vmatpush3.msra.mxu1 %v9055_v16 }
0x29ec   : > { %9861 = vmatprep.subr.mxu1 %v11066_v4 }
0x29ed   : > { %9862 = vmatpush3.msra.mxu1 %v9054_v32  ;;  %v8437_v32 = vld [vmem:[#allocation32 + $0x28] sm:$0xff] }
0x29ee   : > { %9863 = vmatprep.subr.mxu1 %v11066_v4 }
0x29ef   : > { %9864 = vmatpush3.msra.mxu1 %v9053_v33 }
0x29f0   : > { %9893 = vmatprep.subr.mxu1 %v11066_v4 }
0x2aa0   : > { %v7717_v59 = vpop.f32.mrf.mxu1 }
0x2aa1   : > { %v7718_v26 = vadd.f32 %v9049_v58, %v7717_v59  ;;  %v7943_v58 = vrot.slane %v12288_v29, %v5899_v15  ;;  %v8195_v15 = vld [vmem:[#allocation29 + $0x20] sm:$0xff] }
0x2aa2   : > { %v9837_v61 = vpop.f32.mrf.mxu1 }
0x2aa3   : > { %v7721_v62 = vadd.f32 %v7718_v26, %v12294_v35  ;;  %v7748_v35 = vld [vmem:[#allocation23 + $0x20] sm:$0xff]  ;;  %v7948_v61 = vrot.slane %v12288_v29, %v5904_v43 }
0x2aa4   : > { %9845 = vmatpush3.msra.mxu0 %v7748_v35  ;;  %v9063_v43 = vld [vmem:[#allocation28] ss:$0 sm:$0xff] }
0x2aa5   : > { %v7722_v63 = vsel %vm1729_vm4, %v7721_v62, 0.0  ;;  %v7726_v0 = vmul.f32 %v7721_v62, %v7721_v62  ;;  %9868 = vmatprep.subr.mxu0 %v11066_v4 }
0x2aa6   : > { %7723 = vadd.xlane.f32.xlu0 %v7722_v63 }
0x2aa7   : > { %v7727_v1 = vsel %vm1729_vm4, %v7726_v0, 0.0  ;;  %v8047_v0 = vld [vmem:[#allocation29 + $0x18] sm:$0xff] }
0x2aa8   : > { %7728 = vadd.xlane.f32.xlu1 %v7727_v1  ;;  %v8046_v1 = vld [vmem:[#allocation29 + $0x10] sm:$0xff] }
0x2b2f   : > { %v7724_v10 = vpop.xlane.xlu0 %7723 }
0x2b30   : > { %v7725_v41 = vmul.f32 0.03125, %v7724_v10  ;;  %v8288_v10 = vld [vmem:[#allocation32 + $0x18] sm:$0xff] }
0x2b31   : > { %v7729_v17 = vpop.xlane.xlu1 %7728 }
0x2b32   : > { %v7731_v18 = vmul.f32 %v7725_v41, %v7725_v41  ;;  %v7730_v21 = vmul.f32 0.03125, %v7729_v17  ;;  %v7733_v24 = vsub.f32 %v7721_v62, %v7725_v41  ;;  %v8287_v41 = vld [vmem:[#allocation32 + $0x10] sm:$0xff]  ;;  %v8285_v17 = vld [vmem:[#allocation32 + $0x8] sm:$0xff] }
0x2b34   : > { %v7732_v22 = vsub.f32 %v7730_v21, %v7731_v18  ;;  %v8284_v18 = vld [vmem:[#allocation32] sm:$0xff] }
0x2b36   : > { %v7734_v60 = vadd.f32 1e-05, %v7732_v22 }
0x2b38   : > { %10343 = vrsqrt.f32 %v7734_v60 }
0x2b45   : > { %v10344_v34 = vpop.eup %10343 }
0x2b46   : > { %v7736_v30 = vmul.f32 %v10344_v34, %v7733_v24 }
0x2b48   : > { %v7741_v31 = vmul.f32 %v7740_v28, %v7736_v30  ;;  %v9068_v30 = vld [vmem:[#allocation31] ss:$0 sm:$0xff] }
0x2b4a   : > { %v7746_v27 = vadd.f32 %v7745_v53, %v7741_v31 }
0x2b4c   : > { %9847 = vmatmul.mubr.msk.f32.vlgmr.msra.gmra.mxu0 %vm1729_vm4, %v7746_v27 }
0x2b4d   : > { %9876 = vmatprep.mubr.msk.f32.mxu0 %vm11067_vm1, %v11066_v4  ;;  %9869 = vmatpush3.msra.mxu0 %v7953_v48 }
0x2b4e   : > { %9870 = vmatprep.subr.mxu0 %v11066_v4 }
0x2b4f   : > { %9871 = vmatpush3.msra.mxu0 %v7952_v49 }
0x2b50   : > { %9872 = vmatprep.subr.mxu0 %v11066_v4 }
0x2b51   : > { %9873 = vmatpush3.msra.mxu0 %v7951_v50 }
0x2b52   : > { %9874 = vmatprep.subr.mxu0 %v11066_v4 }
0x2b53   : > { %9875 = vmatpush3.msra.mxu0 %v7950_v51 }
0x2b54   : > { %9879 = vmatprep.subr.mxu0 %v11066_v4 }
0x2c0c   : > { %v7829_v46 = vpop.f32.mrf.mxu0 }
0x2c0d   : > { %v7830_v6 = vadd.f32 %v9051_v45, %v7829_v46  ;;  %v8436_v45 = vld [vmem:[#allocation32 + $0x20] sm:$0xff] }
0x2c0e   : > { %v9848_v36 = vpop.f32.mrf.mxu0 }
0x2c0f   : > { %v7833_v37 = vmax.f32 %v7830_v6, 0.0 }
0x2c11   : > { %9866 = vmatmul.mubr.msk.f32.vlgmr.msra.gmra.mxu1 %vm2694_vm7, %v7833_v37 }
0x2c12   : > { %9897 = vmatprep.mubr.msk.f32.mxu1 %vm11067_vm1, %v11066_v4  ;;  %9894 = vmatpush3.msra.mxu1 %v8196_v2 }
0x2c13   : > { %9895 = vmatprep.subr.mxu1 %v11066_v4 }
0x2c14   : > { %9896 = vmatpush3.msra.mxu1 %v8195_v15 }
0x2c15   : > { %9907 = vmatprep.subr.mxu1 %v11066_v4 }
0x2cd1   : > { %v7920_v8 = vpop.f32.mrf.mxu1 }
0x2cd2   : > { %v7921_v39 = vadd.f32 %v9061_v38, %v7920_v8 }
0x2cd3   : > { %v9867_v40 = vpop.f32.mrf.mxu1 }
0x2cd4   : > { %v7924_v42 = vadd.f32 %v7921_v39, %v7746_v27  ;;  %v9072_v40 = vld [vmem:[#allocation34] ss:$0 sm:$0xff] }
0x2cd6   : > { %v7925_v44 = vsel %vm1729_vm4, %v7924_v42, 0.0  ;;  %v7929_v25 = vmul.f32 %v7924_v42, %v7924_v42 }
0x2cd7   : > { %7926 = vadd.xlane.f32.xlu0 %v7925_v44 }
0x2cd8   : > { %v7930_v47 = vsel %vm1729_vm4, %v7929_v25, 0.0 }
0x2cdb   : > { %7931 = vadd.xlane.f32.xlu0 %v7930_v47 }
0x2d60   : > { %v7927_v54 = vpop.xlane.xlu0 %7926 }
0x2d61   : > { %v7928_v20 = vmul.f32 0.03125, %v7927_v54 }
0x2d63   : > { %v7934_v19 = vmul.f32 %v7928_v20, %v7928_v20  ;;  %v7936_v57 = vsub.f32 %v7924_v42, %v7928_v20 }
0x2d64   : > { %v7932_v52 = vpop.xlane.xlu0 %7931 }
0x2d65   : > { %v7933_v55 = vmul.f32 0.03125, %v7932_v52 }
0x2d67   : > { %v7935_v56 = vsub.f32 %v7933_v55, %v7934_v19 }
0x2d69   : > { %v7937_v23 = vadd.f32 1e-05, %v7935_v56 }
0x2d6b   : > { %10345 = vrsqrt.f32 %v7937_v23 }
0x2d78   : > { %v10346_v59 = vpop.eup %10345 }
0x2d79   : > { %v7939_v26 = vmul.f32 %v10346_v59, %v7936_v57 }
0x2d7b   : > { %v7944_v62 = vmul.f32 %v7943_v58, %v7939_v26 }
0x2d7d   : > { %v7949_v63 = vadd.f32 %v7948_v61, %v7944_v62 }
0x2d7f   : > { %9877 = vmatmul.mubr.msk.f32.vlgmr.msra.gmra.mxu0 %vm1729_vm4, %v7949_v63 }
0x2d80   : > { %9883 = vmatprep.mubr.msk.f32.mxu0 %vm11067_vm1, %v11066_v4  ;;  %9880 = vmatpush3.msra.mxu0 %v8047_v0 }
0x2d81   : > { %9881 = vmatprep.subr.mxu0 %v11066_v4 }
0x2d82   : > { %9882 = vmatpush3.msra.mxu0 %v8046_v1 }
0x2d83   : > { %9886 = vmatprep.subr.mxu0 %v11066_v4 }
0x2e3f   : > { %v8030_v29 = vpop.f32.mrf.mxu0 }
0x2e40   : > { %v8031_v3 = vadd.f32 %v9063_v43, %v8030_v29 }
0x2e41   : > { %v9878_v35 = vpop.f32.mrf.mxu0 }
0x2e42   : > { %v8039_v7 = vrot.slane %v8031_v3, 7  ;;  %v8041_v11 = vrot.slane %v8031_v3, 1  ;;  %9884 = vmatmul.mubr.msk.f32.vlgmr.msra.gmra.mxu0 %vm1476_vm0, %v8031_v3 }
0x2e43   : > { %9887 = vmatpush3.msra.mxu0 %v8044_v9  ;;  %9890 = vmatprep.mubr.msk.f32.mxu0 %vm11067_vm1, %v11066_v4 }
0x2e44   : > { %9888 = vmatprep.subr.mxu0 %v11066_v4  ;;  %v8042_v13 = vsel %vm8037_vm8, 0.0, %v8041_v11  ;;  %v8040_v14 = vsel %vm8036_vm9, 0.0, %v8039_v7 }
0x2e45   : > { %9889 = vmatpush3.msra.mxu0 %v8043_v12  ;;  %9898 = vmatmul.mubr.msk.f32.vlgmr.msra.gmra.mxu1 %vm1476_vm0, %v8042_v13 }
0x2e46   : > { %9891 = vmatmul.mubr.msk.f32.vlgmr.msra.gmra.mxu0 %vm1476_vm0, %v8040_v14  ;;  %9900 = vmatprep.subr.mxu0 %v11066_v4 }
0x2e47   : > { %9904 = vmatprep.mubr.msk.f32.mxu0 %vm11067_vm1, %v11066_v4  ;;  %9911 = vmatprep.mubr.msk.f32.mxu1 %vm11067_vm1, %v11066_v4 }
0x2e48   : > { %9901 = vmatpush3.msra.mxu0 %v8288_v10  ;;  %9908 = vmatpush3.msra.mxu1 %v8285_v17 }
0x2e49   : > { %9902 = vmatprep.subr.mxu0 %v11066_v4  ;;  %9909 = vmatprep.subr.mxu1 %v11066_v4 }
0x2e4a   : > { %9903 = vmatpush3.msra.mxu0 %v8287_v41  ;;  %9910 = vmatpush3.msra.mxu1 %v8284_v18 }
0x2e4b   : > { %9914 = vmatprep.subr.mxu0 %v11066_v4 }
0x2f02   : > { %v8117_v21 = vpop.f32.mrf.mxu0 }
0x2f04   : > { %v9885_v22 = vpop.f32.mrf.mxu0 }
0x2f05   : > { %v8266_v60 = vpop.f32.mrf.mxu1 }
0x2f06   : > { %v8190_v24 = vpop.f32.mrf.mxu0 }
0x2f07   : > { %v8191_v28 = vadd.f32 %v8190_v24, %v8117_v21  ;;  %v9899_v34 = vpop.f32.mrf.mxu1 }
0x2f08   : > { %v9892_v53 = vpop.f32.mrf.mxu0 }
0x2f09   : > { %v8270_v31 = vadd.f32 %v8266_v60, %v8191_v28 }
0x2f0b   : > { %v8277_v27 = vadd.f32 %v9068_v30, %v8270_v31 }
0x2f0d   : > { %v8278_v16 = vmax.f32 %v8277_v27, 0.0 }
0x2f0f   : > { %9905 = vmatmul.mubr.msk.f32.vlgmr.msra.gmra.mxu0 %vm1476_vm0, %v8278_v16  ;;  %v8280_v33 = vrot.slane %v8278_v16, 7  ;;  %v8282_v46 = vrot.slane %v8278_v16, 1 }
0x2f10   : > { %9915 = vmatpush3.msra.mxu0 %v8437_v32  ;;  %9918 = vmatprep.mubr.msk.f32.mxu0 %vm11067_vm1, %v11066_v4 }
0x2f11   : > { %9916 = vmatprep.subr.mxu0 %v11066_v4  ;;  %v8281_v6 = vsel %vm8036_vm9, 0.0, %v8280_v33  ;;  %v8283_v36 = vsel %vm8037_vm8, 0.0, %v8282_v46 }
0x2f12   : > { %9912 = vmatmul.mubr.msk.f32.vlgmr.msra.gmra.mxu1 %vm1476_vm0, %v8281_v6  ;;  %9917 = vmatpush3.msra.mxu0 %v8436_v45 }
0x2f13   : > { %9919 = vmatmul.mubr.msk.f32.vlgmr.msra.gmra.mxu0 %vm1476_vm0, %v8283_v36 }
0x2fcf   : > { %v8358_v37 = vpop.f32.mrf.mxu0 }
0x2fd1   : > { %v9906_v38 = vpop.f32.mrf.mxu0 }
0x2fd2   : > { %v8431_v8 = vpop.f32.mrf.mxu1 }
0x2fd3   : > { %v8432_v39 = vadd.f32 %v8431_v8, %v8358_v37  ;;  %v8507_v4 = vpop.f32.mrf.mxu0 }
0x2fd4   : > { %v9913_v42 = vpop.f32.mrf.mxu1 }
0x2fd5   : > { %v8511_v5 = vadd.f32 %v8507_v4, %v8432_v39  ;;  %v9920_v44 = vpop.f32.mrf.mxu0 }
0x2fd7   : > { %v8518_v25 = vadd.f32 %v9072_v40, %v8511_v5 }
0x2fd9   : > { %8519 = vst.msk [vmem:[%s1455_s10] sm:$0xff] %vm1476_vm0, %v8518_v25 }
0x2fda   : > { %10908 = shalt.err (!%p10905_p13)
}
0x2fdb   : > { %s10909_s22 = scalar_lea.hbm %s8532_s12, 128  ;;  %s10913_s0 = scalar_lea.hbm %s11281_s14, 256 }
0x2fdc   : > { %p10910_p5 = scmp.ne.s32.totalorder %s8532_s12, %s10909_s22  ;;  %p10914_p10 = scmp.lt.s32.totalorder %s8532_s12, %s11281_s14 }
0x2fdd   : > { %p10915_p7 = scmp.lt.s32.totalorder %s10913_s0, %s10909_s22 }
0x2fde   : > { %p10911_p6 = pnand %p10910_p5, %p12667_p0 }
0x2fdf   : > { %p10916_p8 = por %p10915_p7, %p10914_p10 }
0x2fe0   : > { %p10912_p12 = pneg %p10911_p6 }
0x2fe2   : > { %p10917_p11 = pnand %p10916_p8, %p10912_p12 }
0x2fe4   : > { %10920 = shalt.err (!%p10917_p11)
}
0x2fe5   : > { %10005 = dma.vmem_to_hbm [thread:$0]  (%p12667_p0), %s8535_s28, 128, %s8532_s12, %s8521_s15  }
0x2fe6 PF: > { %s12668_s6 = sld [smem:[#allocation85_spill]] }
0x2fe7   : > { %s12669_s3 = sld [smem:[#allocation83_spill]] }
0x2fe8   : > { %s12670_s8 = sld [smem:[#allocation88_spill]] }
0x2fec   : > { %p10117_p1 = scmp.ge.s32.totalorder %s12668_s6, 2 }
0x2fed   : > { %s8546_s1 = sand.u32 1, %s12669_s3  }
0x2fee   : > { %p12671_p2 = scmp.ne.s32.totalorder %s12670_s8, 0  ;;  %s8547_s10 = scalar_lea.sflag [#allocation4], %s8546_s1 }
0x2ff0   : > { %p10072_p9 = pnand %p10117_p1, %p12671_p2 }
0x2ff2   : > { %p10073_p3 = pneg %p10072_p9 }
0x2ff4   : > { %10982 = dma.done.wait (%p10073_p3), %s8547_s10, 128  }
0x2ff5   : > { %10984 = vsyncadd (%p10073_p3), %s8547_s10, 4294967168  ;;  %s12672_s0 = sld [smem:[#allocation86_spill]]  ;;  %s12675_s15 = smov %s10991_s16 }
0x2ff6   : > { %s12673_s18 = sld [smem:[#allocation84_spill]] }
0x2ff7   : > { %s12674_s11 = sld [smem:[#allocation87_spill]] }
0x2ffb   : > { %p98_p4 = scmp.ge.s32.totalorder %s12672_s0, 4  }
0x2ffc   : > { %s12676_s16 = smov %s12673_s18 }
0x2ffd   : > { %s12677_s18 = smov %s12674_s11  ;;  %100 = sbr.rel (!%p98_p4) target bundleno = 93 (0x5d), region = 361 }
0x3002   :  { %8552 = vsyncpa [#allocation3], 1 }
0x3003   :  { %8554 = vsyncpa [#allocation3 + $0x1], 1 }
0x3004   :  { %8555 = vsyncpa [#allocation6], 1 }
0x3005   :  { %8556 = vsyncpa [#allocation9], 1 }
0x3006   :  { %8557 = vsyncpa [#allocation12], 1 }
0x3007   :  { %8558 = vsyncpa [#allocation15], 1 }
0x3008   :  { %8559 = vsyncpa [#allocation18], 1 }
0x3009   :  { %8560 = vsyncpa [#allocation21], 1 }
0x300a   :  { %8561 = vsyncpa [#allocation24], 1 }
0x300b   :  { %8562 = vsyncpa [#allocation27], 1 }
0x300c   :  { %8563 = vsyncpa [#allocation30], 1 }
0x300d   :  { %8564 = vsyncpa [#allocation33], 1 }
0x300e   :  { %8565 = vsyncpa [#allocation4], 1 }
0x300f   :  { %8567 = vsyncpa [#allocation4 + $0x1], 1 }

</bundles_post_ra>
